<compile_context>
chip_gen: v6e
topology: v6e:2x2x1
jax: 0.10.0
libtpu: 0.0.40
codegen_flags: <defaults>
</compile_context>

<pallas_src>
import math

import numpy as np
import jax
import jax.numpy as jnp
from jax import lax
from jax.experimental import pallas as pl
from jax.experimental.pallas import tpu as pltpu


def _round_up(x, m):
    return (x + m - 1) // m * m


def _layer_dims(params, c_in0, L0, k):
    pad = k // 2
    n = len(params)
    cfg = []
    l_in, c_in = L0, c_in0
    for i, (w, _) in enumerate(params):
        c_out = w.shape[0]
        stride = 1 if i == n - 1 else 2
        l_out = (l_in + 2 * pad - k) // stride + 1
        width = l_out + (k - 1) // stride
        cfg.append(dict(c_in=c_in, c_in_pad=_round_up(c_in, 8), c_out=c_out,
                        stride=stride, l_in=l_in, l_out=l_out, width=width))
        l_in, c_in = l_out, c_out
    return cfg


def _pack_inputs(params, cfg, k, n_fold):
    """Pre-pack weights (block-diag over folded batch), biases and the merged
    phase-gather selection matrices on the host."""
    pad = k // 2
    Ws, Bs, Sels = [], [], []
    for (w, b), c in zip(params, cfg):
        c_in, c_in_pad, c_out = c["c_in"], c["c_in_pad"], c["c_out"]
        stride, l_in, width = c["stride"], c["l_in"], c["width"]

        # Merged-phase one-hot gather matrix: column r*width + j selects
        # zero-padded input position stride*j + r.  Exact 0/1 -> exact in bf16.
        p = np.arange(l_in)[:, None]
        col = np.arange(stride * width)[None, :]
        r, j = col // width, col % width
        sel = (p == stride * j + r - pad).astype(np.float32)
        Sels.append(jnp.asarray(sel, dtype=jnp.bfloat16))

        # Weight (C_out, C_in, k) -> lane-dense (C_out, k*C_in_pad), columns
        # ordered (tau, c); block-diagonal across the n_fold batch items so
        # the batch can live on sublanes of a single conv matmul.
        wp = np.asarray(w, np.float32)
        wp = np.pad(wp, ((0, 0), (0, c_in_pad - c_in), (0, 0)))
        wp = np.transpose(wp, (0, 2, 1)).reshape(c_out, k * c_in_pad)
        wp = np.kron(np.eye(n_fold, dtype=np.float32), wp)
        Ws.append(jnp.asarray(wp, dtype=jnp.bfloat16))

        bb = np.tile(np.asarray(b, np.float32).reshape(c_out, 1), (n_fold, 1))
        Bs.append(jnp.asarray(bb))
    return Ws, Bs, Sels


def _make_kernel(cfg, k, n_fold):
    n_layers = len(cfg)

    def kernel(*refs):
        x_ref = refs[0]
        w_refs = refs[1:1 + n_layers]
        b_refs = refs[1 + n_layers:1 + 2 * n_layers]
        s_refs = refs[1 + 2 * n_layers:1 + 3 * n_layers]
        o_ref = refs[1 + 3 * n_layers]

        h = x_ref[...].astype(jnp.bfloat16)          # (n_fold*Cin_pad0, L0)
        for li, c in enumerate(cfg):
            c_in, c_out = c["c_in_pad"], c["c_out"]
            stride, l_out, width = c["stride"], c["l_out"], c["width"]
            last = li == n_layers - 1

            # One merged phase-gather matmul for all stride phases and all
            # folded batch items (one-hot select => exact).
            g = jnp.dot(h, s_refs[li][...],
                        preferred_element_type=jnp.float32)
            g = g.astype(jnp.bfloat16)

            # im2col: k shifted views, batch folded along sublanes to match
            # the block-diagonal weight packing (rows = f*k*c_in + tau*c_in+c).
            pieces = []
            for f in range(n_fold):
                for tau in range(k):
                    col = (tau % stride) * width + tau // stride
                    pieces.append(g[f * c_in:(f + 1) * c_in, col:col + l_out])
            patches = jnp.concatenate(pieces, axis=0)  # (n_fold*k*c_in, l_out)

            y = jnp.dot(w_refs[li][...], patches,
                        preferred_element_type=jnp.float32)
            y = y + b_refs[li][...]                    # (n_fold*c_out, l_out)
            if last:
                # Final mean over the length axis; only this tile goes to HBM.
                o_ref[...] = jnp.mean(y, axis=1, keepdims=True)
            else:
                h = jnp.maximum(y, 0.0).astype(jnp.bfloat16)

    return kernel


def _tensorcores_per_chip():
    try:
        kind = jax.devices()[0].device_kind.lower()
    except Exception:
        return 1
    return 2 if ("v7" in kind or "7x" in kind) else 1


def signal_matrix_net_pallas(x, params, *, k=11, batch_fold=None):
    """Forward of SignalMatrixNet.  x: (B, 4, L) f32, params: list of (w, b)."""
    B, c_in0, L0 = x.shape
    if batch_fold is None:
        # single-TC chips (v5e/v6e): fold the batch into the matmuls (one grid
        # step); dual-TC chips (v7x): keep the batch as a parallel grid axis.
        batch_fold = _tensorcores_per_chip() < 2 or B == 1
    n_fold = B if batch_fold else 1

    cfg = _layer_dims(params, c_in0, L0, k)
    Ws, Bs, Sels = _pack_inputs(params, cfg, k, n_fold)
    c_in_pad0 = cfg[0]["c_in_pad"]
    outputs = cfg[-1]["c_out"]

    xp = x.astype(jnp.float32)
    if c_in_pad0 > c_in0:
        xp = jnp.pad(xp, ((0, 0), (0, c_in_pad0 - c_in0), (0, 0)))

    const2d = lambda i: (0, 0)
    w_specs = [pl.BlockSpec(w.shape, const2d) for w in Ws]
    b_specs = [pl.BlockSpec(b.shape, const2d) for b in Bs]
    s_specs = [pl.BlockSpec(s.shape, const2d) for s in Sels]

    flops = 0
    for c in cfg:
        flops += 2 * B * c["c_in_pad"] * c["l_in"] * c["stride"] * c["width"]
        flops += 2 * B * c["c_out"] * k * c["c_in_pad"] * c["l_out"]
    bytes_accessed = int(xp.size * 4 + sum(w.size * 2 for w in Ws)
                         + sum(s.size * 2 for s in Sels)
                         + sum(b.size * 4 for b in Bs) + B * outputs * 4)
    cost = pl.CostEstimate(flops=int(flops), transcendentals=0,
                           bytes_accessed=bytes_accessed)

    if batch_fold:
        xf = xp.reshape(B * c_in_pad0, L0)             # batch on sublanes
        out = pl.pallas_call(
            _make_kernel(cfg, k, n_fold),
            out_shape=jax.ShapeDtypeStruct((B * outputs, 1), jnp.float32),
            grid=(1,),
            in_specs=[pl.BlockSpec((B * c_in_pad0, L0), const2d)]
                     + w_specs + b_specs + s_specs,
            out_specs=pl.BlockSpec((B * outputs, 1), const2d),
            compiler_params=pltpu.CompilerParams(
                dimension_semantics=("arbitrary",)),
            cost_estimate=cost,
        )(xf, *Ws, *Bs, *Sels)
        return out.reshape(B, outputs)
    else:
        out = pl.pallas_call(
            _make_kernel(cfg, k, n_fold),
            out_shape=jax.ShapeDtypeStruct((B, outputs, 1), jnp.float32),
            grid=(B,),
            in_specs=[pl.BlockSpec((None, c_in_pad0, L0), lambda b: (b, 0, 0))]
                     + w_specs + b_specs + s_specs,
            out_specs=pl.BlockSpec((None, outputs, 1), lambda b: (b, 0, 0)),
            compiler_params=pltpu.CompilerParams(
                dimension_semantics=("parallel",)),
            cost_estimate=cost,
        )(xp, *Ws, *Bs, *Sels)
        return out[:, :, 0]


def init_params(key, k=11, hidden_channels=32, outputs=8):
    """Deterministic init mimicking PyTorch Conv1d default U(+/- 1/sqrt(fan_in))."""
    layer_dims = ([(4, hidden_channels)]
                  + [(hidden_channels, hidden_channels)] * 6
                  + [(hidden_channels, outputs)])
    params = []
    for (cin, cout) in layer_dims:
        key, kw, kb = jax.random.split(key, 3)
        bound = 1.0 / math.sqrt(cin * k)
        w = jax.random.uniform(kw, (cout, cin, k), jnp.float32, -bound, bound)
        b = jax.random.uniform(kb, (cout,), jnp.float32, -bound, bound)
        params.append((w, b))
    return params


def signal_matrix_net_ref(x, params):
    """Pure-JAX f32 reference (lax conv) for correctness check."""
    h = x
    n = len(params)
    for i, (w, b) in enumerate(params):
        last = (i == n - 1)
        stride = 1 if last else 2
        pad = w.shape[2] // 2
        h = lax.conv_general_dilated(h, w, (stride,), [(pad, pad)],
                                     dimension_numbers=("NCH", "OIH", "NCH"))
        h = h + b[None, :, None]
        if not last:
            h = jnp.maximum(h, 0.0)
    return jnp.mean(h, axis=2)


if __name__ == "__main__":
    key = jax.random.PRNGKey(0)
    kp, kx = jax.random.split(key)
    params = init_params(kp, k=11, hidden_channels=32, outputs=8)

    B, C, L = 2, 4, 256
    x = jax.random.normal(kx, (B, C, L), jnp.float32)

    ref = jax.block_until_ready(signal_matrix_net_ref(x, params))

    # Auto-selected batch strategy for the current chip generation.
    out = jax.block_until_ready(signal_matrix_net_pallas(x, params))
    assert out.shape == (B, 8), out.shape
    # bf16 MXU operands (per perf review) -> slightly relaxed tolerance vs f32.
    np.testing.assert_allclose(np.asarray(out), np.asarray(ref),
                               rtol=2e-2, atol=2e-3)

    # Exercise BOTH batch strategies (batch-folded single step for v5e/v6e,
    # per-batch parallel grid for v7x) so both code paths are validated here.
    for fold in (True, False):
        o = jax.block_until_ready(
            signal_matrix_net_pallas(x, params, batch_fold=fold))
        np.testing.assert_allclose(np.asarray(o), np.asarray(ref),
                                   rtol=2e-2, atol=2e-3)

    print("KERNEL_OK")
</pallas_src>

<mosaic_0001>
module attributes {stable_mosaic.version = 11 : i64} {
  func.func @kernel(%arg0: i32, %arg1: memref<16x256xf32, #tpu.memory_space<vmem>>, %arg2: memref<64x176xbf16, #tpu.memory_space<vmem>>, %arg3: memref<64x704xbf16, #tpu.memory_space<vmem>>, %arg4: memref<64x704xbf16, #tpu.memory_space<vmem>>, %arg5: memref<64x704xbf16, #tpu.memory_space<vmem>>, %arg6: memref<64x704xbf16, #tpu.memory_space<vmem>>, %arg7: memref<64x704xbf16, #tpu.memory_space<vmem>>, %arg8: memref<64x704xbf16, #tpu.memory_space<vmem>>, %arg9: memref<16x704xbf16, #tpu.memory_space<vmem>>, %arg10: memref<64x1xf32, #tpu.memory_space<vmem>>, %arg11: memref<64x1xf32, #tpu.memory_space<vmem>>, %arg12: memref<64x1xf32, #tpu.memory_space<vmem>>, %arg13: memref<64x1xf32, #tpu.memory_space<vmem>>, %arg14: memref<64x1xf32, #tpu.memory_space<vmem>>, %arg15: memref<64x1xf32, #tpu.memory_space<vmem>>, %arg16: memref<64x1xf32, #tpu.memory_space<vmem>>, %arg17: memref<16x1xf32, #tpu.memory_space<vmem>>, %arg18: memref<256x266xbf16, #tpu.memory_space<vmem>>, %arg19: memref<128x138xbf16, #tpu.memory_space<vmem>>, %arg20: memref<64x74xbf16, #tpu.memory_space<vmem>>, %arg21: memref<32x42xbf16, #tpu.memory_space<vmem>>, %arg22: memref<16x26xbf16, #tpu.memory_space<vmem>>, %arg23: memref<8x18xbf16, #tpu.memory_space<vmem>>, %arg24: memref<4x14xbf16, #tpu.memory_space<vmem>>, %arg25: memref<2x12xbf16, #tpu.memory_space<vmem>>, %arg26: memref<16x1xf32, #tpu.memory_space<vmem>>) attributes {dimension_semantics = [#tpu.dimension_semantics<arbitrary>], iteration_bounds = array<i64: 1>, scalar_prefetch = 0 : i64, scratch_operands = 0 : i64, tpu.core_type = #tpu.core_type<tc>, window_params = [{pipeline_mode = #tpu.pipeline_mode<synchronous>, transform_indices = @transform_0, window_bounds = array<i64: 16, 256>}, {pipeline_mode = #tpu.pipeline_mode<synchronous>, transform_indices = @transform_1, window_bounds = array<i64: 64, 176>}, {pipeline_mode = #tpu.pipeline_mode<synchronous>, transform_indices = @transform_2, window_bounds = array<i64: 64, 704>}, {pipeline_mode = #tpu.pipeline_mode<synchronous>, transform_indices = @transform_3, window_bounds = array<i64: 64, 704>}, {pipeline_mode = #tpu.pipeline_mode<synchronous>, transform_indices = @transform_4, window_bounds = array<i64: 64, 704>}, {pipeline_mode = #tpu.pipeline_mode<synchronous>, transform_indices = @transform_5, window_bounds = array<i64: 64, 704>}, {pipeline_mode = #tpu.pipeline_mode<synchronous>, transform_indices = @transform_6, window_bounds = array<i64: 64, 704>}, {pipeline_mode = #tpu.pipeline_mode<synchronous>, transform_indices = @transform_7, window_bounds = array<i64: 64, 704>}, {pipeline_mode = #tpu.pipeline_mode<synchronous>, transform_indices = @transform_8, window_bounds = array<i64: 16, 704>}, {pipeline_mode = #tpu.pipeline_mode<synchronous>, transform_indices = @transform_9, window_bounds = array<i64: 64, 1>}, {pipeline_mode = #tpu.pipeline_mode<synchronous>, transform_indices = @transform_10, window_bounds = array<i64: 64, 1>}, {pipeline_mode = #tpu.pipeline_mode<synchronous>, transform_indices = @transform_11, window_bounds = array<i64: 64, 1>}, {pipeline_mode = #tpu.pipeline_mode<synchronous>, transform_indices = @transform_12, window_bounds = array<i64: 64, 1>}, {pipeline_mode = #tpu.pipeline_mode<synchronous>, transform_indices = @transform_13, window_bounds = array<i64: 64, 1>}, {pipeline_mode = #tpu.pipeline_mode<synchronous>, transform_indices = @transform_14, window_bounds = array<i64: 64, 1>}, {pipeline_mode = #tpu.pipeline_mode<synchronous>, transform_indices = @transform_15, window_bounds = array<i64: 64, 1>}, {pipeline_mode = #tpu.pipeline_mode<synchronous>, transform_indices = @transform_16, window_bounds = array<i64: 16, 1>}, {pipeline_mode = #tpu.pipeline_mode<synchronous>, transform_indices = @transform_17, window_bounds = array<i64: 256, 266>}, {pipeline_mode = #tpu.pipeline_mode<synchronous>, transform_indices = @transform_18, window_bounds = array<i64: 128, 138>}, {pipeline_mode = #tpu.pipeline_mode<synchronous>, transform_indices = @transform_19, window_bounds = array<i64: 64, 74>}, {pipeline_mode = #tpu.pipeline_mode<synchronous>, transform_indices = @transform_20, window_bounds = array<i64: 32, 42>}, {pipeline_mode = #tpu.pipeline_mode<synchronous>, transform_indices = @transform_21, window_bounds = array<i64: 16, 26>}, {pipeline_mode = #tpu.pipeline_mode<synchronous>, transform_indices = @transform_22, window_bounds = array<i64: 8, 18>}, {pipeline_mode = #tpu.pipeline_mode<synchronous>, transform_indices = @transform_23, window_bounds = array<i64: 4, 14>}, {pipeline_mode = #tpu.pipeline_mode<synchronous>, transform_indices = @transform_24, window_bounds = array<i64: 2, 12>}, {pipeline_mode = #tpu.pipeline_mode<synchronous>, transform_indices = @transform_25, window_bounds = array<i64: 16, 1>}]} {
    %c0 = arith.constant 0 : index
    %c0_0 = arith.constant 0 : index
    %0 = vector.load %arg1[%c0, %c0_0] : memref<16x256xf32, #tpu.memory_space<vmem>>, vector<16x256xf32>
    %1 = arith.truncf %0 : vector<16x256xf32> to vector<16x256xbf16>
    %c0_1 = arith.constant 0 : index
    %c0_2 = arith.constant 0 : index
    %2 = vector.load %arg18[%c0_1, %c0_2] : memref<256x266xbf16, #tpu.memory_space<vmem>>, vector<256x266xbf16>
    %cst = arith.constant dense<0.000000e+00> : vector<16x266xf32>
    %3 = tpu.matmul %1, %2, %cst {dimension_numbers = #tpu.dot_dimension_numbers<[1], [0], [0], [1], [0, 0, 1, 1], [], []>} : vector<16x256xbf16>, vector<256x266xbf16>, vector<16x266xf32> -> vector<16x266xf32>
    %4 = arith.truncf %3 : vector<16x266xf32> to vector<16x266xbf16>
    %5 = vector.extract_strided_slice %4 {offsets = [0, 0], sizes = [8, 128], strides = [1, 1]} : vector<16x266xbf16> to vector<8x128xbf16>
    %6 = vector.extract_strided_slice %4 {offsets = [0, 133], sizes = [8, 128], strides = [1, 1]} : vector<16x266xbf16> to vector<8x128xbf16>
    %7 = vector.extract_strided_slice %4 {offsets = [0, 1], sizes = [8, 128], strides = [1, 1]} : vector<16x266xbf16> to vector<8x128xbf16>
    %8 = vector.extract_strided_slice %4 {offsets = [0, 134], sizes = [8, 128], strides = [1, 1]} : vector<16x266xbf16> to vector<8x128xbf16>
    %9 = vector.extract_strided_slice %4 {offsets = [0, 2], sizes = [8, 128], strides = [1, 1]} : vector<16x266xbf16> to vector<8x128xbf16>
    %10 = vector.extract_strided_slice %4 {offsets = [0, 135], sizes = [8, 128], strides = [1, 1]} : vector<16x266xbf16> to vector<8x128xbf16>
    %11 = vector.extract_strided_slice %4 {offsets = [0, 3], sizes = [8, 128], strides = [1, 1]} : vector<16x266xbf16> to vector<8x128xbf16>
    %12 = vector.extract_strided_slice %4 {offsets = [0, 136], sizes = [8, 128], strides = [1, 1]} : vector<16x266xbf16> to vector<8x128xbf16>
    %13 = vector.extract_strided_slice %4 {offsets = [0, 4], sizes = [8, 128], strides = [1, 1]} : vector<16x266xbf16> to vector<8x128xbf16>
    %14 = vector.extract_strided_slice %4 {offsets = [0, 137], sizes = [8, 128], strides = [1, 1]} : vector<16x266xbf16> to vector<8x128xbf16>
    %15 = vector.extract_strided_slice %4 {offsets = [0, 5], sizes = [8, 128], strides = [1, 1]} : vector<16x266xbf16> to vector<8x128xbf16>
    %16 = vector.extract_strided_slice %4 {offsets = [8, 0], sizes = [8, 128], strides = [1, 1]} : vector<16x266xbf16> to vector<8x128xbf16>
    %17 = vector.extract_strided_slice %4 {offsets = [8, 133], sizes = [8, 128], strides = [1, 1]} : vector<16x266xbf16> to vector<8x128xbf16>
    %18 = vector.extract_strided_slice %4 {offsets = [8, 1], sizes = [8, 128], strides = [1, 1]} : vector<16x266xbf16> to vector<8x128xbf16>
    %19 = vector.extract_strided_slice %4 {offsets = [8, 134], sizes = [8, 128], strides = [1, 1]} : vector<16x266xbf16> to vector<8x128xbf16>
    %20 = vector.extract_strided_slice %4 {offsets = [8, 2], sizes = [8, 128], strides = [1, 1]} : vector<16x266xbf16> to vector<8x128xbf16>
    %21 = vector.extract_strided_slice %4 {offsets = [8, 135], sizes = [8, 128], strides = [1, 1]} : vector<16x266xbf16> to vector<8x128xbf16>
    %22 = vector.extract_strided_slice %4 {offsets = [8, 3], sizes = [8, 128], strides = [1, 1]} : vector<16x266xbf16> to vector<8x128xbf16>
    %23 = vector.extract_strided_slice %4 {offsets = [8, 136], sizes = [8, 128], strides = [1, 1]} : vector<16x266xbf16> to vector<8x128xbf16>
    %24 = vector.extract_strided_slice %4 {offsets = [8, 4], sizes = [8, 128], strides = [1, 1]} : vector<16x266xbf16> to vector<8x128xbf16>
    %25 = vector.extract_strided_slice %4 {offsets = [8, 137], sizes = [8, 128], strides = [1, 1]} : vector<16x266xbf16> to vector<8x128xbf16>
    %26 = vector.extract_strided_slice %4 {offsets = [8, 5], sizes = [8, 128], strides = [1, 1]} : vector<16x266xbf16> to vector<8x128xbf16>
    %27 = tpu.concatenate %5, %6, %7, %8, %9, %10, %11, %12, %13, %14, %15, %16, %17, %18, %19, %20 in 0 : vector<8x128xbf16>, vector<8x128xbf16>, vector<8x128xbf16>, vector<8x128xbf16>, vector<8x128xbf16>, vector<8x128xbf16>, vector<8x128xbf16>, vector<8x128xbf16>, vector<8x128xbf16>, vector<8x128xbf16>, vector<8x128xbf16>, vector<8x128xbf16>, vector<8x128xbf16>, vector<8x128xbf16>, vector<8x128xbf16>, vector<8x128xbf16> -> vector<128x128xbf16>
    %28 = tpu.concatenate %21, %22, %23, %24, %25, %26 in 0 : vector<8x128xbf16>, vector<8x128xbf16>, vector<8x128xbf16>, vector<8x128xbf16>, vector<8x128xbf16>, vector<8x128xbf16> -> vector<48x128xbf16>
    %29 = tpu.concatenate %27, %28 in 0 : vector<128x128xbf16>, vector<48x128xbf16> -> vector<176x128xbf16>
    %c0_3 = arith.constant 0 : index
    %c0_4 = arith.constant 0 : index
    %30 = vector.load %arg2[%c0_3, %c0_4] : memref<64x176xbf16, #tpu.memory_space<vmem>>, vector<64x176xbf16>
    %cst_5 = arith.constant dense<0.000000e+00> : vector<64x128xf32>
    %31 = tpu.matmul %30, %29, %cst_5 {dimension_numbers = #tpu.dot_dimension_numbers<[1], [0], [0], [1], [0, 0, 1, 1], [], []>} : vector<64x176xbf16>, vector<176x128xbf16>, vector<64x128xf32> -> vector<64x128xf32>
    %c0_6 = arith.constant 0 : index
    %c0_7 = arith.constant 0 : index
    %32 = vector.load %arg10[%c0_6, %c0_7] : memref<64x1xf32, #tpu.memory_space<vmem>>, vector<64x1xf32>
    %33 = vector.broadcast %32 : vector<64x1xf32> to vector<64x128xf32>
    %34 = arith.addf %31, %33 : vector<64x128xf32>
    %cst_8 = arith.constant 0.000000e+00 : f32
    %35 = vector.broadcast %cst_8 : f32 to vector<64x128xf32>
    %36 = arith.maximumf %34, %35 : vector<64x128xf32>
    %37 = arith.truncf %36 : vector<64x128xf32> to vector<64x128xbf16>
    %c0_9 = arith.constant 0 : index
    %c0_10 = arith.constant 0 : index
    %38 = vector.load %arg19[%c0_9, %c0_10] : memref<128x138xbf16, #tpu.memory_space<vmem>>, vector<128x138xbf16>
    %cst_11 = arith.constant dense<0.000000e+00> : vector<64x138xf32>
    %39 = tpu.matmul %37, %38, %cst_11 {dimension_numbers = #tpu.dot_dimension_numbers<[1], [0], [0], [1], [0, 0, 1, 1], [], []>} : vector<64x128xbf16>, vector<128x138xbf16>, vector<64x138xf32> -> vector<64x138xf32>
    %40 = arith.truncf %39 : vector<64x138xf32> to vector<64x138xbf16>
    %41 = vector.extract_strided_slice %40 {offsets = [0, 0], sizes = [32, 64], strides = [1, 1]} : vector<64x138xbf16> to vector<32x64xbf16>
    %42 = vector.extract_strided_slice %40 {offsets = [0, 69], sizes = [32, 64], strides = [1, 1]} : vector<64x138xbf16> to vector<32x64xbf16>
    %43 = vector.extract_strided_slice %40 {offsets = [0, 1], sizes = [32, 64], strides = [1, 1]} : vector<64x138xbf16> to vector<32x64xbf16>
    %44 = vector.extract_strided_slice %40 {offsets = [0, 70], sizes = [32, 64], strides = [1, 1]} : vector<64x138xbf16> to vector<32x64xbf16>
    %45 = vector.extract_strided_slice %40 {offsets = [0, 2], sizes = [32, 64], strides = [1, 1]} : vector<64x138xbf16> to vector<32x64xbf16>
    %46 = vector.extract_strided_slice %40 {offsets = [0, 71], sizes = [32, 64], strides = [1, 1]} : vector<64x138xbf16> to vector<32x64xbf16>
    %47 = vector.extract_strided_slice %40 {offsets = [0, 3], sizes = [32, 64], strides = [1, 1]} : vector<64x138xbf16> to vector<32x64xbf16>
    %48 = vector.extract_strided_slice %40 {offsets = [0, 72], sizes = [32, 64], strides = [1, 1]} : vector<64x138xbf16> to vector<32x64xbf16>
    %49 = vector.extract_strided_slice %40 {offsets = [0, 4], sizes = [32, 64], strides = [1, 1]} : vector<64x138xbf16> to vector<32x64xbf16>
    %50 = vector.extract_strided_slice %40 {offsets = [0, 73], sizes = [32, 64], strides = [1, 1]} : vector<64x138xbf16> to vector<32x64xbf16>
    %51 = vector.extract_strided_slice %40 {offsets = [0, 5], sizes = [32, 64], strides = [1, 1]} : vector<64x138xbf16> to vector<32x64xbf16>
    %52 = vector.extract_strided_slice %40 {offsets = [32, 0], sizes = [32, 64], strides = [1, 1]} : vector<64x138xbf16> to vector<32x64xbf16>
    %53 = vector.extract_strided_slice %40 {offsets = [32, 69], sizes = [32, 64], strides = [1, 1]} : vector<64x138xbf16> to vector<32x64xbf16>
    %54 = vector.extract_strided_slice %40 {offsets = [32, 1], sizes = [32, 64], strides = [1, 1]} : vector<64x138xbf16> to vector<32x64xbf16>
    %55 = vector.extract_strided_slice %40 {offsets = [32, 70], sizes = [32, 64], strides = [1, 1]} : vector<64x138xbf16> to vector<32x64xbf16>
    %56 = vector.extract_strided_slice %40 {offsets = [32, 2], sizes = [32, 64], strides = [1, 1]} : vector<64x138xbf16> to vector<32x64xbf16>
    %57 = vector.extract_strided_slice %40 {offsets = [32, 71], sizes = [32, 64], strides = [1, 1]} : vector<64x138xbf16> to vector<32x64xbf16>
    %58 = vector.extract_strided_slice %40 {offsets = [32, 3], sizes = [32, 64], strides = [1, 1]} : vector<64x138xbf16> to vector<32x64xbf16>
    %59 = vector.extract_strided_slice %40 {offsets = [32, 72], sizes = [32, 64], strides = [1, 1]} : vector<64x138xbf16> to vector<32x64xbf16>
    %60 = vector.extract_strided_slice %40 {offsets = [32, 4], sizes = [32, 64], strides = [1, 1]} : vector<64x138xbf16> to vector<32x64xbf16>
    %61 = vector.extract_strided_slice %40 {offsets = [32, 73], sizes = [32, 64], strides = [1, 1]} : vector<64x138xbf16> to vector<32x64xbf16>
    %62 = vector.extract_strided_slice %40 {offsets = [32, 5], sizes = [32, 64], strides = [1, 1]} : vector<64x138xbf16> to vector<32x64xbf16>
    %63 = tpu.concatenate %41, %42, %43, %44, %45, %46, %47, %48, %49, %50, %51, %52, %53, %54, %55, %56 in 0 : vector<32x64xbf16>, vector<32x64xbf16>, vector<32x64xbf16>, vector<32x64xbf16>, vector<32x64xbf16>, vector<32x64xbf16>, vector<32x64xbf16>, vector<32x64xbf16>, vector<32x64xbf16>, vector<32x64xbf16>, vector<32x64xbf16>, vector<32x64xbf16>, vector<32x64xbf16>, vector<32x64xbf16>, vector<32x64xbf16>, vector<32x64xbf16> -> vector<512x64xbf16>
    %64 = tpu.concatenate %57, %58, %59, %60, %61, %62 in 0 : vector<32x64xbf16>, vector<32x64xbf16>, vector<32x64xbf16>, vector<32x64xbf16>, vector<32x64xbf16>, vector<32x64xbf16> -> vector<192x64xbf16>
    %65 = tpu.concatenate %63, %64 in 0 : vector<512x64xbf16>, vector<192x64xbf16> -> vector<704x64xbf16>
    %c0_12 = arith.constant 0 : index
    %c0_13 = arith.constant 0 : index
    %66 = vector.load %arg3[%c0_12, %c0_13] : memref<64x704xbf16, #tpu.memory_space<vmem>>, vector<64x704xbf16>
    %cst_14 = arith.constant dense<0.000000e+00> : vector<64x64xf32>
    %67 = tpu.matmul %66, %65, %cst_14 {dimension_numbers = #tpu.dot_dimension_numbers<[1], [0], [0], [1], [0, 0, 1, 1], [], []>} : vector<64x704xbf16>, vector<704x64xbf16>, vector<64x64xf32> -> vector<64x64xf32>
    %c0_15 = arith.constant 0 : index
    %c0_16 = arith.constant 0 : index
    %68 = vector.load %arg11[%c0_15, %c0_16] : memref<64x1xf32, #tpu.memory_space<vmem>>, vector<64x1xf32>
    %69 = vector.broadcast %68 : vector<64x1xf32> to vector<64x64xf32>
    %70 = arith.addf %67, %69 : vector<64x64xf32>
    %cst_17 = arith.constant 0.000000e+00 : f32
    %71 = vector.broadcast %cst_17 : f32 to vector<64x64xf32>
    %72 = arith.maximumf %70, %71 : vector<64x64xf32>
    %73 = arith.truncf %72 : vector<64x64xf32> to vector<64x64xbf16>
    %c0_18 = arith.constant 0 : index
    %c0_19 = arith.constant 0 : index
    %74 = vector.load %arg20[%c0_18, %c0_19] : memref<64x74xbf16, #tpu.memory_space<vmem>>, vector<64x74xbf16>
    %cst_20 = arith.constant dense<0.000000e+00> : vector<64x74xf32>
    %75 = tpu.matmul %73, %74, %cst_20 {dimension_numbers = #tpu.dot_dimension_numbers<[1], [0], [0], [1], [0, 0, 1, 1], [], []>} : vector<64x64xbf16>, vector<64x74xbf16>, vector<64x74xf32> -> vector<64x74xf32>
    %76 = arith.truncf %75 : vector<64x74xf32> to vector<64x74xbf16>
    %77 = vector.extract_strided_slice %76 {offsets = [0, 0], sizes = [32, 32], strides = [1, 1]} : vector<64x74xbf16> to vector<32x32xbf16>
    %78 = vector.extract_strided_slice %76 {offsets = [0, 37], sizes = [32, 32], strides = [1, 1]} : vector<64x74xbf16> to vector<32x32xbf16>
    %79 = vector.extract_strided_slice %76 {offsets = [0, 1], sizes = [32, 32], strides = [1, 1]} : vector<64x74xbf16> to vector<32x32xbf16>
    %80 = vector.extract_strided_slice %76 {offsets = [0, 38], sizes = [32, 32], strides = [1, 1]} : vector<64x74xbf16> to vector<32x32xbf16>
    %81 = vector.extract_strided_slice %76 {offsets = [0, 2], sizes = [32, 32], strides = [1, 1]} : vector<64x74xbf16> to vector<32x32xbf16>
    %82 = vector.extract_strided_slice %76 {offsets = [0, 39], sizes = [32, 32], strides = [1, 1]} : vector<64x74xbf16> to vector<32x32xbf16>
    %83 = vector.extract_strided_slice %76 {offsets = [0, 3], sizes = [32, 32], strides = [1, 1]} : vector<64x74xbf16> to vector<32x32xbf16>
    %84 = vector.extract_strided_slice %76 {offsets = [0, 40], sizes = [32, 32], strides = [1, 1]} : vector<64x74xbf16> to vector<32x32xbf16>
    %85 = vector.extract_strided_slice %76 {offsets = [0, 4], sizes = [32, 32], strides = [1, 1]} : vector<64x74xbf16> to vector<32x32xbf16>
    %86 = vector.extract_strided_slice %76 {offsets = [0, 41], sizes = [32, 32], strides = [1, 1]} : vector<64x74xbf16> to vector<32x32xbf16>
    %87 = vector.extract_strided_slice %76 {offsets = [0, 5], sizes = [32, 32], strides = [1, 1]} : vector<64x74xbf16> to vector<32x32xbf16>
    %88 = vector.extract_strided_slice %76 {offsets = [32, 0], sizes = [32, 32], strides = [1, 1]} : vector<64x74xbf16> to vector<32x32xbf16>
    %89 = vector.extract_strided_slice %76 {offsets = [32, 37], sizes = [32, 32], strides = [1, 1]} : vector<64x74xbf16> to vector<32x32xbf16>
    %90 = vector.extract_strided_slice %76 {offsets = [32, 1], sizes = [32, 32], strides = [1, 1]} : vector<64x74xbf16> to vector<32x32xbf16>
    %91 = vector.extract_strided_slice %76 {offsets = [32, 38], sizes = [32, 32], strides = [1, 1]} : vector<64x74xbf16> to vector<32x32xbf16>
    %92 = vector.extract_strided_slice %76 {offsets = [32, 2], sizes = [32, 32], strides = [1, 1]} : vector<64x74xbf16> to vector<32x32xbf16>
    %93 = vector.extract_strided_slice %76 {offsets = [32, 39], sizes = [32, 32], strides = [1, 1]} : vector<64x74xbf16> to vector<32x32xbf16>
    %94 = vector.extract_strided_slice %76 {offsets = [32, 3], sizes = [32, 32], strides = [1, 1]} : vector<64x74xbf16> to vector<32x32xbf16>
    %95 = vector.extract_strided_slice %76 {offsets = [32, 40], sizes = [32, 32], strides = [1, 1]} : vector<64x74xbf16> to vector<32x32xbf16>
    %96 = vector.extract_strided_slice %76 {offsets = [32, 4], sizes = [32, 32], strides = [1, 1]} : vector<64x74xbf16> to vector<32x32xbf16>
    %97 = vector.extract_strided_slice %76 {offsets = [32, 41], sizes = [32, 32], strides = [1, 1]} : vector<64x74xbf16> to vector<32x32xbf16>
    %98 = vector.extract_strided_slice %76 {offsets = [32, 5], sizes = [32, 32], strides = [1, 1]} : vector<64x74xbf16> to vector<32x32xbf16>
    %99 = tpu.concatenate %77, %78, %79, %80, %81, %82, %83, %84, %85, %86, %87, %88, %89, %90, %91, %92 in 0 : vector<32x32xbf16>, vector<32x32xbf16>, vector<32x32xbf16>, vector<32x32xbf16>, vector<32x32xbf16>, vector<32x32xbf16>, vector<32x32xbf16>, vector<32x32xbf16>, vector<32x32xbf16>, vector<32x32xbf16>, vector<32x32xbf16>, vector<32x32xbf16>, vector<32x32xbf16>, vector<32x32xbf16>, vector<32x32xbf16>, vector<32x32xbf16> -> vector<512x32xbf16>
    %100 = tpu.concatenate %93, %94, %95, %96, %97, %98 in 0 : vector<32x32xbf16>, vector<32x32xbf16>, vector<32x32xbf16>, vector<32x32xbf16>, vector<32x32xbf16>, vector<32x32xbf16> -> vector<192x32xbf16>
    %101 = tpu.concatenate %99, %100 in 0 : vector<512x32xbf16>, vector<192x32xbf16> -> vector<704x32xbf16>
    %c0_21 = arith.constant 0 : index
    %c0_22 = arith.constant 0 : index
    %102 = vector.load %arg4[%c0_21, %c0_22] : memref<64x704xbf16, #tpu.memory_space<vmem>>, vector<64x704xbf16>
    %cst_23 = arith.constant dense<0.000000e+00> : vector<64x32xf32>
    %103 = tpu.matmul %102, %101, %cst_23 {dimension_numbers = #tpu.dot_dimension_numbers<[1], [0], [0], [1], [0, 0, 1, 1], [], []>} : vector<64x704xbf16>, vector<704x32xbf16>, vector<64x32xf32> -> vector<64x32xf32>
    %c0_24 = arith.constant 0 : index
    %c0_25 = arith.constant 0 : index
    %104 = vector.load %arg12[%c0_24, %c0_25] : memref<64x1xf32, #tpu.memory_space<vmem>>, vector<64x1xf32>
    %105 = vector.broadcast %104 : vector<64x1xf32> to vector<64x32xf32>
    %106 = arith.addf %103, %105 : vector<64x32xf32>
    %cst_26 = arith.constant 0.000000e+00 : f32
    %107 = vector.broadcast %cst_26 : f32 to vector<64x32xf32>
    %108 = arith.maximumf %106, %107 : vector<64x32xf32>
    %109 = arith.truncf %108 : vector<64x32xf32> to vector<64x32xbf16>
    %c0_27 = arith.constant 0 : index
    %c0_28 = arith.constant 0 : index
    %110 = vector.load %arg21[%c0_27, %c0_28] : memref<32x42xbf16, #tpu.memory_space<vmem>>, vector<32x42xbf16>
    %cst_29 = arith.constant dense<0.000000e+00> : vector<64x42xf32>
    %111 = tpu.matmul %109, %110, %cst_29 {dimension_numbers = #tpu.dot_dimension_numbers<[1], [0], [0], [1], [0, 0, 1, 1], [], []>} : vector<64x32xbf16>, vector<32x42xbf16>, vector<64x42xf32> -> vector<64x42xf32>
    %112 = arith.truncf %111 : vector<64x42xf32> to vector<64x42xbf16>
    %113 = vector.extract_strided_slice %112 {offsets = [0, 0], sizes = [32, 16], strides = [1, 1]} : vector<64x42xbf16> to vector<32x16xbf16>
    %114 = vector.extract_strided_slice %112 {offsets = [0, 21], sizes = [32, 16], strides = [1, 1]} : vector<64x42xbf16> to vector<32x16xbf16>
    %115 = vector.extract_strided_slice %112 {offsets = [0, 1], sizes = [32, 16], strides = [1, 1]} : vector<64x42xbf16> to vector<32x16xbf16>
    %116 = vector.extract_strided_slice %112 {offsets = [0, 22], sizes = [32, 16], strides = [1, 1]} : vector<64x42xbf16> to vector<32x16xbf16>
    %117 = vector.extract_strided_slice %112 {offsets = [0, 2], sizes = [32, 16], strides = [1, 1]} : vector<64x42xbf16> to vector<32x16xbf16>
    %118 = vector.extract_strided_slice %112 {offsets = [0, 23], sizes = [32, 16], strides = [1, 1]} : vector<64x42xbf16> to vector<32x16xbf16>
    %119 = vector.extract_strided_slice %112 {offsets = [0, 3], sizes = [32, 16], strides = [1, 1]} : vector<64x42xbf16> to vector<32x16xbf16>
    %120 = vector.extract_strided_slice %112 {offsets = [0, 24], sizes = [32, 16], strides = [1, 1]} : vector<64x42xbf16> to vector<32x16xbf16>
    %121 = vector.extract_strided_slice %112 {offsets = [0, 4], sizes = [32, 16], strides = [1, 1]} : vector<64x42xbf16> to vector<32x16xbf16>
    %122 = vector.extract_strided_slice %112 {offsets = [0, 25], sizes = [32, 16], strides = [1, 1]} : vector<64x42xbf16> to vector<32x16xbf16>
    %123 = vector.extract_strided_slice %112 {offsets = [0, 5], sizes = [32, 16], strides = [1, 1]} : vector<64x42xbf16> to vector<32x16xbf16>
    %124 = vector.extract_strided_slice %112 {offsets = [32, 0], sizes = [32, 16], strides = [1, 1]} : vector<64x42xbf16> to vector<32x16xbf16>
    %125 = vector.extract_strided_slice %112 {offsets = [32, 21], sizes = [32, 16], strides = [1, 1]} : vector<64x42xbf16> to vector<32x16xbf16>
    %126 = vector.extract_strided_slice %112 {offsets = [32, 1], sizes = [32, 16], strides = [1, 1]} : vector<64x42xbf16> to vector<32x16xbf16>
    %127 = vector.extract_strided_slice %112 {offsets = [32, 22], sizes = [32, 16], strides = [1, 1]} : vector<64x42xbf16> to vector<32x16xbf16>
    %128 = vector.extract_strided_slice %112 {offsets = [32, 2], sizes = [32, 16], strides = [1, 1]} : vector<64x42xbf16> to vector<32x16xbf16>
    %129 = vector.extract_strided_slice %112 {offsets = [32, 23], sizes = [32, 16], strides = [1, 1]} : vector<64x42xbf16> to vector<32x16xbf16>
    %130 = vector.extract_strided_slice %112 {offsets = [32, 3], sizes = [32, 16], strides = [1, 1]} : vector<64x42xbf16> to vector<32x16xbf16>
    %131 = vector.extract_strided_slice %112 {offsets = [32, 24], sizes = [32, 16], strides = [1, 1]} : vector<64x42xbf16> to vector<32x16xbf16>
    %132 = vector.extract_strided_slice %112 {offsets = [32, 4], sizes = [32, 16], strides = [1, 1]} : vector<64x42xbf16> to vector<32x16xbf16>
    %133 = vector.extract_strided_slice %112 {offsets = [32, 25], sizes = [32, 16], strides = [1, 1]} : vector<64x42xbf16> to vector<32x16xbf16>
    %134 = vector.extract_strided_slice %112 {offsets = [32, 5], sizes = [32, 16], strides = [1, 1]} : vector<64x42xbf16> to vector<32x16xbf16>
    %135 = tpu.concatenate %113, %114, %115, %116, %117, %118, %119, %120, %121, %122, %123, %124, %125, %126, %127, %128 in 0 : vector<32x16xbf16>, vector<32x16xbf16>, vector<32x16xbf16>, vector<32x16xbf16>, vector<32x16xbf16>, vector<32x16xbf16>, vector<32x16xbf16>, vector<32x16xbf16>, vector<32x16xbf16>, vector<32x16xbf16>, vector<32x16xbf16>, vector<32x16xbf16>, vector<32x16xbf16>, vector<32x16xbf16>, vector<32x16xbf16>, vector<32x16xbf16> -> vector<512x16xbf16>
    %136 = tpu.concatenate %129, %130, %131, %132, %133, %134 in 0 : vector<32x16xbf16>, vector<32x16xbf16>, vector<32x16xbf16>, vector<32x16xbf16>, vector<32x16xbf16>, vector<32x16xbf16> -> vector<192x16xbf16>
    %137 = tpu.concatenate %135, %136 in 0 : vector<512x16xbf16>, vector<192x16xbf16> -> vector<704x16xbf16>
    %c0_30 = arith.constant 0 : index
    %c0_31 = arith.constant 0 : index
    %138 = vector.load %arg5[%c0_30, %c0_31] : memref<64x704xbf16, #tpu.memory_space<vmem>>, vector<64x704xbf16>
    %cst_32 = arith.constant dense<0.000000e+00> : vector<64x16xf32>
    %139 = tpu.matmul %138, %137, %cst_32 {dimension_numbers = #tpu.dot_dimension_numbers<[1], [0], [0], [1], [0, 0, 1, 1], [], []>} : vector<64x704xbf16>, vector<704x16xbf16>, vector<64x16xf32> -> vector<64x16xf32>
    %c0_33 = arith.constant 0 : index
    %c0_34 = arith.constant 0 : index
    %140 = vector.load %arg13[%c0_33, %c0_34] : memref<64x1xf32, #tpu.memory_space<vmem>>, vector<64x1xf32>
    %141 = vector.broadcast %140 : vector<64x1xf32> to vector<64x16xf32>
    %142 = arith.addf %139, %141 : vector<64x16xf32>
    %cst_35 = arith.constant 0.000000e+00 : f32
    %143 = vector.broadcast %cst_35 : f32 to vector<64x16xf32>
    %144 = arith.maximumf %142, %143 : vector<64x16xf32>
    %145 = arith.truncf %144 : vector<64x16xf32> to vector<64x16xbf16>
    %c0_36 = arith.constant 0 : index
    %c0_37 = arith.constant 0 : index
    %146 = vector.load %arg22[%c0_36, %c0_37] : memref<16x26xbf16, #tpu.memory_space<vmem>>, vector<16x26xbf16>
    %cst_38 = arith.constant dense<0.000000e+00> : vector<64x26xf32>
    %147 = tpu.matmul %145, %146, %cst_38 {dimension_numbers = #tpu.dot_dimension_numbers<[1], [0], [0], [1], [0, 0, 1, 1], [], []>} : vector<64x16xbf16>, vector<16x26xbf16>, vector<64x26xf32> -> vector<64x26xf32>
    %148 = arith.truncf %147 : vector<64x26xf32> to vector<64x26xbf16>
    %149 = vector.extract_strided_slice %148 {offsets = [0, 0], sizes = [32, 8], strides = [1, 1]} : vector<64x26xbf16> to vector<32x8xbf16>
    %150 = vector.extract_strided_slice %148 {offsets = [0, 13], sizes = [32, 8], strides = [1, 1]} : vector<64x26xbf16> to vector<32x8xbf16>
    %151 = vector.extract_strided_slice %148 {offsets = [0, 1], sizes = [32, 8], strides = [1, 1]} : vector<64x26xbf16> to vector<32x8xbf16>
    %152 = vector.extract_strided_slice %148 {offsets = [0, 14], sizes = [32, 8], strides = [1, 1]} : vector<64x26xbf16> to vector<32x8xbf16>
    %153 = vector.extract_strided_slice %148 {offsets = [0, 2], sizes = [32, 8], strides = [1, 1]} : vector<64x26xbf16> to vector<32x8xbf16>
    %154 = vector.extract_strided_slice %148 {offsets = [0, 15], sizes = [32, 8], strides = [1, 1]} : vector<64x26xbf16> to vector<32x8xbf16>
    %155 = vector.extract_strided_slice %148 {offsets = [0, 3], sizes = [32, 8], strides = [1, 1]} : vector<64x26xbf16> to vector<32x8xbf16>
    %156 = vector.extract_strided_slice %148 {offsets = [0, 16], sizes = [32, 8], strides = [1, 1]} : vector<64x26xbf16> to vector<32x8xbf16>
    %157 = vector.extract_strided_slice %148 {offsets = [0, 4], sizes = [32, 8], strides = [1, 1]} : vector<64x26xbf16> to vector<32x8xbf16>
    %158 = vector.extract_strided_slice %148 {offsets = [0, 17], sizes = [32, 8], strides = [1, 1]} : vector<64x26xbf16> to vector<32x8xbf16>
    %159 = vector.extract_strided_slice %148 {offsets = [0, 5], sizes = [32, 8], strides = [1, 1]} : vector<64x26xbf16> to vector<32x8xbf16>
    %160 = vector.extract_strided_slice %148 {offsets = [32, 0], sizes = [32, 8], strides = [1, 1]} : vector<64x26xbf16> to vector<32x8xbf16>
    %161 = vector.extract_strided_slice %148 {offsets = [32, 13], sizes = [32, 8], strides = [1, 1]} : vector<64x26xbf16> to vector<32x8xbf16>
    %162 = vector.extract_strided_slice %148 {offsets = [32, 1], sizes = [32, 8], strides = [1, 1]} : vector<64x26xbf16> to vector<32x8xbf16>
    %163 = vector.extract_strided_slice %148 {offsets = [32, 14], sizes = [32, 8], strides = [1, 1]} : vector<64x26xbf16> to vector<32x8xbf16>
    %164 = vector.extract_strided_slice %148 {offsets = [32, 2], sizes = [32, 8], strides = [1, 1]} : vector<64x26xbf16> to vector<32x8xbf16>
    %165 = vector.extract_strided_slice %148 {offsets = [32, 15], sizes = [32, 8], strides = [1, 1]} : vector<64x26xbf16> to vector<32x8xbf16>
    %166 = vector.extract_strided_slice %148 {offsets = [32, 3], sizes = [32, 8], strides = [1, 1]} : vector<64x26xbf16> to vector<32x8xbf16>
    %167 = vector.extract_strided_slice %148 {offsets = [32, 16], sizes = [32, 8], strides = [1, 1]} : vector<64x26xbf16> to vector<32x8xbf16>
    %168 = vector.extract_strided_slice %148 {offsets = [32, 4], sizes = [32, 8], strides = [1, 1]} : vector<64x26xbf16> to vector<32x8xbf16>
    %169 = vector.extract_strided_slice %148 {offsets = [32, 17], sizes = [32, 8], strides = [1, 1]} : vector<64x26xbf16> to vector<32x8xbf16>
    %170 = vector.extract_strided_slice %148 {offsets = [32, 5], sizes = [32, 8], strides = [1, 1]} : vector<64x26xbf16> to vector<32x8xbf16>
    %171 = tpu.concatenate %149, %150, %151, %152, %153, %154, %155, %156, %157, %158, %159, %160, %161, %162, %163, %164 in 0 : vector<32x8xbf16>, vector<32x8xbf16>, vector<32x8xbf16>, vector<32x8xbf16>, vector<32x8xbf16>, vector<32x8xbf16>, vector<32x8xbf16>, vector<32x8xbf16>, vector<32x8xbf16>, vector<32x8xbf16>, vector<32x8xbf16>, vector<32x8xbf16>, vector<32x8xbf16>, vector<32x8xbf16>, vector<32x8xbf16>, vector<32x8xbf16> -> vector<512x8xbf16>
    %172 = tpu.concatenate %165, %166, %167, %168, %169, %170 in 0 : vector<32x8xbf16>, vector<32x8xbf16>, vector<32x8xbf16>, vector<32x8xbf16>, vector<32x8xbf16>, vector<32x8xbf16> -> vector<192x8xbf16>
    %173 = tpu.concatenate %171, %172 in 0 : vector<512x8xbf16>, vector<192x8xbf16> -> vector<704x8xbf16>
    %c0_39 = arith.constant 0 : index
    %c0_40 = arith.constant 0 : index
    %174 = vector.load %arg6[%c0_39, %c0_40] : memref<64x704xbf16, #tpu.memory_space<vmem>>, vector<64x704xbf16>
    %cst_41 = arith.constant dense<0.000000e+00> : vector<64x8xf32>
    %175 = tpu.matmul %174, %173, %cst_41 {dimension_numbers = #tpu.dot_dimension_numbers<[1], [0], [0], [1], [0, 0, 1, 1], [], []>} : vector<64x704xbf16>, vector<704x8xbf16>, vector<64x8xf32> -> vector<64x8xf32>
    %c0_42 = arith.constant 0 : index
    %c0_43 = arith.constant 0 : index
    %176 = vector.load %arg14[%c0_42, %c0_43] : memref<64x1xf32, #tpu.memory_space<vmem>>, vector<64x1xf32>
    %177 = vector.broadcast %176 : vector<64x1xf32> to vector<64x8xf32>
    %178 = arith.addf %175, %177 : vector<64x8xf32>
    %cst_44 = arith.constant 0.000000e+00 : f32
    %179 = vector.broadcast %cst_44 : f32 to vector<64x8xf32>
    %180 = arith.maximumf %178, %179 : vector<64x8xf32>
    %181 = arith.truncf %180 : vector<64x8xf32> to vector<64x8xbf16>
    %c0_45 = arith.constant 0 : index
    %c0_46 = arith.constant 0 : index
    %182 = vector.load %arg23[%c0_45, %c0_46] : memref<8x18xbf16, #tpu.memory_space<vmem>>, vector<8x18xbf16>
    %cst_47 = arith.constant dense<0.000000e+00> : vector<64x18xf32>
    %183 = tpu.matmul %181, %182, %cst_47 {dimension_numbers = #tpu.dot_dimension_numbers<[1], [0], [0], [1], [0, 0, 1, 1], [], []>} : vector<64x8xbf16>, vector<8x18xbf16>, vector<64x18xf32> -> vector<64x18xf32>
    %184 = arith.truncf %183 : vector<64x18xf32> to vector<64x18xbf16>
    %185 = vector.extract_strided_slice %184 {offsets = [0, 0], sizes = [32, 4], strides = [1, 1]} : vector<64x18xbf16> to vector<32x4xbf16>
    %186 = vector.extract_strided_slice %184 {offsets = [0, 9], sizes = [32, 4], strides = [1, 1]} : vector<64x18xbf16> to vector<32x4xbf16>
    %187 = vector.extract_strided_slice %184 {offsets = [0, 1], sizes = [32, 4], strides = [1, 1]} : vector<64x18xbf16> to vector<32x4xbf16>
    %188 = vector.extract_strided_slice %184 {offsets = [0, 10], sizes = [32, 4], strides = [1, 1]} : vector<64x18xbf16> to vector<32x4xbf16>
    %189 = vector.extract_strided_slice %184 {offsets = [0, 2], sizes = [32, 4], strides = [1, 1]} : vector<64x18xbf16> to vector<32x4xbf16>
    %190 = vector.extract_strided_slice %184 {offsets = [0, 11], sizes = [32, 4], strides = [1, 1]} : vector<64x18xbf16> to vector<32x4xbf16>
    %191 = vector.extract_strided_slice %184 {offsets = [0, 3], sizes = [32, 4], strides = [1, 1]} : vector<64x18xbf16> to vector<32x4xbf16>
    %192 = vector.extract_strided_slice %184 {offsets = [0, 12], sizes = [32, 4], strides = [1, 1]} : vector<64x18xbf16> to vector<32x4xbf16>
    %193 = vector.extract_strided_slice %184 {offsets = [0, 4], sizes = [32, 4], strides = [1, 1]} : vector<64x18xbf16> to vector<32x4xbf16>
    %194 = vector.extract_strided_slice %184 {offsets = [0, 13], sizes = [32, 4], strides = [1, 1]} : vector<64x18xbf16> to vector<32x4xbf16>
    %195 = vector.extract_strided_slice %184 {offsets = [0, 5], sizes = [32, 4], strides = [1, 1]} : vector<64x18xbf16> to vector<32x4xbf16>
    %196 = vector.extract_strided_slice %184 {offsets = [32, 0], sizes = [32, 4], strides = [1, 1]} : vector<64x18xbf16> to vector<32x4xbf16>
    %197 = vector.extract_strided_slice %184 {offsets = [32, 9], sizes = [32, 4], strides = [1, 1]} : vector<64x18xbf16> to vector<32x4xbf16>
    %198 = vector.extract_strided_slice %184 {offsets = [32, 1], sizes = [32, 4], strides = [1, 1]} : vector<64x18xbf16> to vector<32x4xbf16>
    %199 = vector.extract_strided_slice %184 {offsets = [32, 10], sizes = [32, 4], strides = [1, 1]} : vector<64x18xbf16> to vector<32x4xbf16>
    %200 = vector.extract_strided_slice %184 {offsets = [32, 2], sizes = [32, 4], strides = [1, 1]} : vector<64x18xbf16> to vector<32x4xbf16>
    %201 = vector.extract_strided_slice %184 {offsets = [32, 11], sizes = [32, 4], strides = [1, 1]} : vector<64x18xbf16> to vector<32x4xbf16>
    %202 = vector.extract_strided_slice %184 {offsets = [32, 3], sizes = [32, 4], strides = [1, 1]} : vector<64x18xbf16> to vector<32x4xbf16>
    %203 = vector.extract_strided_slice %184 {offsets = [32, 12], sizes = [32, 4], strides = [1, 1]} : vector<64x18xbf16> to vector<32x4xbf16>
    %204 = vector.extract_strided_slice %184 {offsets = [32, 4], sizes = [32, 4], strides = [1, 1]} : vector<64x18xbf16> to vector<32x4xbf16>
    %205 = vector.extract_strided_slice %184 {offsets = [32, 13], sizes = [32, 4], strides = [1, 1]} : vector<64x18xbf16> to vector<32x4xbf16>
    %206 = vector.extract_strided_slice %184 {offsets = [32, 5], sizes = [32, 4], strides = [1, 1]} : vector<64x18xbf16> to vector<32x4xbf16>
    %207 = tpu.concatenate %185, %186, %187, %188, %189, %190, %191, %192, %193, %194, %195, %196, %197, %198, %199, %200 in 0 : vector<32x4xbf16>, vector<32x4xbf16>, vector<32x4xbf16>, vector<32x4xbf16>, vector<32x4xbf16>, vector<32x4xbf16>, vector<32x4xbf16>, vector<32x4xbf16>, vector<32x4xbf16>, vector<32x4xbf16>, vector<32x4xbf16>, vector<32x4xbf16>, vector<32x4xbf16>, vector<32x4xbf16>, vector<32x4xbf16>, vector<32x4xbf16> -> vector<512x4xbf16>
    %208 = tpu.concatenate %201, %202, %203, %204, %205, %206 in 0 : vector<32x4xbf16>, vector<32x4xbf16>, vector<32x4xbf16>, vector<32x4xbf16>, vector<32x4xbf16>, vector<32x4xbf16> -> vector<192x4xbf16>
    %209 = tpu.concatenate %207, %208 in 0 : vector<512x4xbf16>, vector<192x4xbf16> -> vector<704x4xbf16>
    %c0_48 = arith.constant 0 : index
    %c0_49 = arith.constant 0 : index
    %210 = vector.load %arg7[%c0_48, %c0_49] : memref<64x704xbf16, #tpu.memory_space<vmem>>, vector<64x704xbf16>
    %cst_50 = arith.constant dense<0.000000e+00> : vector<64x4xf32>
    %211 = tpu.matmul %210, %209, %cst_50 {dimension_numbers = #tpu.dot_dimension_numbers<[1], [0], [0], [1], [0, 0, 1, 1], [], []>} : vector<64x704xbf16>, vector<704x4xbf16>, vector<64x4xf32> -> vector<64x4xf32>
    %c0_51 = arith.constant 0 : index
    %c0_52 = arith.constant 0 : index
    %212 = vector.load %arg15[%c0_51, %c0_52] : memref<64x1xf32, #tpu.memory_space<vmem>>, vector<64x1xf32>
    %213 = vector.broadcast %212 : vector<64x1xf32> to vector<64x4xf32>
    %214 = arith.addf %211, %213 : vector<64x4xf32>
    %cst_53 = arith.constant 0.000000e+00 : f32
    %215 = vector.broadcast %cst_53 : f32 to vector<64x4xf32>
    %216 = arith.maximumf %214, %215 : vector<64x4xf32>
    %217 = arith.truncf %216 : vector<64x4xf32> to vector<64x4xbf16>
    %c0_54 = arith.constant 0 : index
    %c0_55 = arith.constant 0 : index
    %218 = vector.load %arg24[%c0_54, %c0_55] : memref<4x14xbf16, #tpu.memory_space<vmem>>, vector<4x14xbf16>
    %cst_56 = arith.constant dense<0.000000e+00> : vector<64x14xf32>
    %219 = tpu.matmul %217, %218, %cst_56 {dimension_numbers = #tpu.dot_dimension_numbers<[1], [0], [0], [1], [0, 0, 1, 1], [], []>} : vector<64x4xbf16>, vector<4x14xbf16>, vector<64x14xf32> -> vector<64x14xf32>
    %220 = arith.truncf %219 : vector<64x14xf32> to vector<64x14xbf16>
    %221 = vector.extract_strided_slice %220 {offsets = [0, 0], sizes = [32, 2], strides = [1, 1]} : vector<64x14xbf16> to vector<32x2xbf16>
    %222 = vector.extract_strided_slice %220 {offsets = [0, 7], sizes = [32, 2], strides = [1, 1]} : vector<64x14xbf16> to vector<32x2xbf16>
    %223 = vector.extract_strided_slice %220 {offsets = [0, 1], sizes = [32, 2], strides = [1, 1]} : vector<64x14xbf16> to vector<32x2xbf16>
    %224 = vector.extract_strided_slice %220 {offsets = [0, 8], sizes = [32, 2], strides = [1, 1]} : vector<64x14xbf16> to vector<32x2xbf16>
    %225 = vector.extract_strided_slice %220 {offsets = [0, 2], sizes = [32, 2], strides = [1, 1]} : vector<64x14xbf16> to vector<32x2xbf16>
    %226 = vector.extract_strided_slice %220 {offsets = [0, 9], sizes = [32, 2], strides = [1, 1]} : vector<64x14xbf16> to vector<32x2xbf16>
    %227 = vector.extract_strided_slice %220 {offsets = [0, 3], sizes = [32, 2], strides = [1, 1]} : vector<64x14xbf16> to vector<32x2xbf16>
    %228 = vector.extract_strided_slice %220 {offsets = [0, 10], sizes = [32, 2], strides = [1, 1]} : vector<64x14xbf16> to vector<32x2xbf16>
    %229 = vector.extract_strided_slice %220 {offsets = [0, 4], sizes = [32, 2], strides = [1, 1]} : vector<64x14xbf16> to vector<32x2xbf16>
    %230 = vector.extract_strided_slice %220 {offsets = [0, 11], sizes = [32, 2], strides = [1, 1]} : vector<64x14xbf16> to vector<32x2xbf16>
    %231 = vector.extract_strided_slice %220 {offsets = [0, 5], sizes = [32, 2], strides = [1, 1]} : vector<64x14xbf16> to vector<32x2xbf16>
    %232 = vector.extract_strided_slice %220 {offsets = [32, 0], sizes = [32, 2], strides = [1, 1]} : vector<64x14xbf16> to vector<32x2xbf16>
    %233 = vector.extract_strided_slice %220 {offsets = [32, 7], sizes = [32, 2], strides = [1, 1]} : vector<64x14xbf16> to vector<32x2xbf16>
    %234 = vector.extract_strided_slice %220 {offsets = [32, 1], sizes = [32, 2], strides = [1, 1]} : vector<64x14xbf16> to vector<32x2xbf16>
    %235 = vector.extract_strided_slice %220 {offsets = [32, 8], sizes = [32, 2], strides = [1, 1]} : vector<64x14xbf16> to vector<32x2xbf16>
    %236 = vector.extract_strided_slice %220 {offsets = [32, 2], sizes = [32, 2], strides = [1, 1]} : vector<64x14xbf16> to vector<32x2xbf16>
    %237 = vector.extract_strided_slice %220 {offsets = [32, 9], sizes = [32, 2], strides = [1, 1]} : vector<64x14xbf16> to vector<32x2xbf16>
    %238 = vector.extract_strided_slice %220 {offsets = [32, 3], sizes = [32, 2], strides = [1, 1]} : vector<64x14xbf16> to vector<32x2xbf16>
    %239 = vector.extract_strided_slice %220 {offsets = [32, 10], sizes = [32, 2], strides = [1, 1]} : vector<64x14xbf16> to vector<32x2xbf16>
    %240 = vector.extract_strided_slice %220 {offsets = [32, 4], sizes = [32, 2], strides = [1, 1]} : vector<64x14xbf16> to vector<32x2xbf16>
    %241 = vector.extract_strided_slice %220 {offsets = [32, 11], sizes = [32, 2], strides = [1, 1]} : vector<64x14xbf16> to vector<32x2xbf16>
    %242 = vector.extract_strided_slice %220 {offsets = [32, 5], sizes = [32, 2], strides = [1, 1]} : vector<64x14xbf16> to vector<32x2xbf16>
    %243 = tpu.concatenate %221, %222, %223, %224, %225, %226, %227, %228, %229, %230, %231, %232, %233, %234, %235, %236 in 0 : vector<32x2xbf16>, vector<32x2xbf16>, vector<32x2xbf16>, vector<32x2xbf16>, vector<32x2xbf16>, vector<32x2xbf16>, vector<32x2xbf16>, vector<32x2xbf16>, vector<32x2xbf16>, vector<32x2xbf16>, vector<32x2xbf16>, vector<32x2xbf16>, vector<32x2xbf16>, vector<32x2xbf16>, vector<32x2xbf16>, vector<32x2xbf16> -> vector<512x2xbf16>
    %244 = tpu.concatenate %237, %238, %239, %240, %241, %242 in 0 : vector<32x2xbf16>, vector<32x2xbf16>, vector<32x2xbf16>, vector<32x2xbf16>, vector<32x2xbf16>, vector<32x2xbf16> -> vector<192x2xbf16>
    %245 = tpu.concatenate %243, %244 in 0 : vector<512x2xbf16>, vector<192x2xbf16> -> vector<704x2xbf16>
    %c0_57 = arith.constant 0 : index
    %c0_58 = arith.constant 0 : index
    %246 = vector.load %arg8[%c0_57, %c0_58] : memref<64x704xbf16, #tpu.memory_space<vmem>>, vector<64x704xbf16>
    %cst_59 = arith.constant dense<0.000000e+00> : vector<64x2xf32>
    %247 = tpu.matmul %246, %245, %cst_59 {dimension_numbers = #tpu.dot_dimension_numbers<[1], [0], [0], [1], [0, 0, 1, 1], [], []>} : vector<64x704xbf16>, vector<704x2xbf16>, vector<64x2xf32> -> vector<64x2xf32>
    %c0_60 = arith.constant 0 : index
    %c0_61 = arith.constant 0 : index
    %248 = vector.load %arg16[%c0_60, %c0_61] : memref<64x1xf32, #tpu.memory_space<vmem>>, vector<64x1xf32>
    %249 = vector.broadcast %248 : vector<64x1xf32> to vector<64x2xf32>
    %250 = arith.addf %247, %249 : vector<64x2xf32>
    %cst_62 = arith.constant 0.000000e+00 : f32
    %251 = vector.broadcast %cst_62 : f32 to vector<64x2xf32>
    %252 = arith.maximumf %250, %251 : vector<64x2xf32>
    %253 = arith.truncf %252 : vector<64x2xf32> to vector<64x2xbf16>
    %c0_63 = arith.constant 0 : index
    %c0_64 = arith.constant 0 : index
    %254 = vector.load %arg25[%c0_63, %c0_64] : memref<2x12xbf16, #tpu.memory_space<vmem>>, vector<2x12xbf16>
    %cst_65 = arith.constant dense<0.000000e+00> : vector<64x12xf32>
    %255 = tpu.matmul %253, %254, %cst_65 {dimension_numbers = #tpu.dot_dimension_numbers<[1], [0], [0], [1], [0, 0, 1, 1], [], []>} : vector<64x2xbf16>, vector<2x12xbf16>, vector<64x12xf32> -> vector<64x12xf32>
    %256 = arith.truncf %255 : vector<64x12xf32> to vector<64x12xbf16>
    %257 = vector.extract_strided_slice %256 {offsets = [0, 0], sizes = [32, 2], strides = [1, 1]} : vector<64x12xbf16> to vector<32x2xbf16>
    %258 = vector.extract_strided_slice %256 {offsets = [0, 1], sizes = [32, 2], strides = [1, 1]} : vector<64x12xbf16> to vector<32x2xbf16>
    %259 = vector.extract_strided_slice %256 {offsets = [0, 2], sizes = [32, 2], strides = [1, 1]} : vector<64x12xbf16> to vector<32x2xbf16>
    %260 = vector.extract_strided_slice %256 {offsets = [0, 3], sizes = [32, 2], strides = [1, 1]} : vector<64x12xbf16> to vector<32x2xbf16>
    %261 = vector.extract_strided_slice %256 {offsets = [0, 4], sizes = [32, 2], strides = [1, 1]} : vector<64x12xbf16> to vector<32x2xbf16>
    %262 = vector.extract_strided_slice %256 {offsets = [0, 5], sizes = [32, 2], strides = [1, 1]} : vector<64x12xbf16> to vector<32x2xbf16>
    %263 = vector.extract_strided_slice %256 {offsets = [0, 6], sizes = [32, 2], strides = [1, 1]} : vector<64x12xbf16> to vector<32x2xbf16>
    %264 = vector.extract_strided_slice %256 {offsets = [0, 7], sizes = [32, 2], strides = [1, 1]} : vector<64x12xbf16> to vector<32x2xbf16>
    %265 = vector.extract_strided_slice %256 {offsets = [0, 8], sizes = [32, 2], strides = [1, 1]} : vector<64x12xbf16> to vector<32x2xbf16>
    %266 = vector.extract_strided_slice %256 {offsets = [0, 9], sizes = [32, 2], strides = [1, 1]} : vector<64x12xbf16> to vector<32x2xbf16>
    %267 = vector.extract_strided_slice %256 {offsets = [0, 10], sizes = [32, 2], strides = [1, 1]} : vector<64x12xbf16> to vector<32x2xbf16>
    %268 = vector.extract_strided_slice %256 {offsets = [32, 0], sizes = [32, 2], strides = [1, 1]} : vector<64x12xbf16> to vector<32x2xbf16>
    %269 = vector.extract_strided_slice %256 {offsets = [32, 1], sizes = [32, 2], strides = [1, 1]} : vector<64x12xbf16> to vector<32x2xbf16>
    %270 = vector.extract_strided_slice %256 {offsets = [32, 2], sizes = [32, 2], strides = [1, 1]} : vector<64x12xbf16> to vector<32x2xbf16>
    %271 = vector.extract_strided_slice %256 {offsets = [32, 3], sizes = [32, 2], strides = [1, 1]} : vector<64x12xbf16> to vector<32x2xbf16>
    %272 = vector.extract_strided_slice %256 {offsets = [32, 4], sizes = [32, 2], strides = [1, 1]} : vector<64x12xbf16> to vector<32x2xbf16>
    %273 = vector.extract_strided_slice %256 {offsets = [32, 5], sizes = [32, 2], strides = [1, 1]} : vector<64x12xbf16> to vector<32x2xbf16>
    %274 = vector.extract_strided_slice %256 {offsets = [32, 6], sizes = [32, 2], strides = [1, 1]} : vector<64x12xbf16> to vector<32x2xbf16>
    %275 = vector.extract_strided_slice %256 {offsets = [32, 7], sizes = [32, 2], strides = [1, 1]} : vector<64x12xbf16> to vector<32x2xbf16>
    %276 = vector.extract_strided_slice %256 {offsets = [32, 8], sizes = [32, 2], strides = [1, 1]} : vector<64x12xbf16> to vector<32x2xbf16>
    %277 = vector.extract_strided_slice %256 {offsets = [32, 9], sizes = [32, 2], strides = [1, 1]} : vector<64x12xbf16> to vector<32x2xbf16>
    %278 = vector.extract_strided_slice %256 {offsets = [32, 10], sizes = [32, 2], strides = [1, 1]} : vector<64x12xbf16> to vector<32x2xbf16>
    %279 = tpu.concatenate %257, %258, %259, %260, %261, %262, %263, %264, %265, %266, %267, %268, %269, %270, %271, %272 in 0 : vector<32x2xbf16>, vector<32x2xbf16>, vector<32x2xbf16>, vector<32x2xbf16>, vector<32x2xbf16>, vector<32x2xbf16>, vector<32x2xbf16>, vector<32x2xbf16>, vector<32x2xbf16>, vector<32x2xbf16>, vector<32x2xbf16>, vector<32x2xbf16>, vector<32x2xbf16>, vector<32x2xbf16>, vector<32x2xbf16>, vector<32x2xbf16> -> vector<512x2xbf16>
    %280 = tpu.concatenate %273, %274, %275, %276, %277, %278 in 0 : vector<32x2xbf16>, vector<32x2xbf16>, vector<32x2xbf16>, vector<32x2xbf16>, vector<32x2xbf16>, vector<32x2xbf16> -> vector<192x2xbf16>
    %281 = tpu.concatenate %279, %280 in 0 : vector<512x2xbf16>, vector<192x2xbf16> -> vector<704x2xbf16>
    %c0_66 = arith.constant 0 : index
    %c0_67 = arith.constant 0 : index
    %282 = vector.load %arg9[%c0_66, %c0_67] : memref<16x704xbf16, #tpu.memory_space<vmem>>, vector<16x704xbf16>
    %cst_68 = arith.constant dense<0.000000e+00> : vector<16x2xf32>
    %283 = tpu.matmul %282, %281, %cst_68 {dimension_numbers = #tpu.dot_dimension_numbers<[1], [0], [0], [1], [0, 0, 1, 1], [], []>} : vector<16x704xbf16>, vector<704x2xbf16>, vector<16x2xf32> -> vector<16x2xf32>
    %c0_69 = arith.constant 0 : index
    %c0_70 = arith.constant 0 : index
    %284 = vector.load %arg17[%c0_69, %c0_70] : memref<16x1xf32, #tpu.memory_space<vmem>>, vector<16x1xf32>
    %285 = vector.broadcast %284 : vector<16x1xf32> to vector<16x2xf32>
    %286 = arith.addf %283, %285 : vector<16x2xf32>
    %cst_71 = arith.constant dense<0.000000e+00> : vector<16xf32>
    %287 = vector.multi_reduction <add>, %286, %cst_71 [1] : vector<16x2xf32> to vector<16xf32>
    %288 = vector.shape_cast %287 : vector<16xf32> to vector<16x1xf32>
    %cst_72 = arith.constant 2.000000e+00 : f32
    %289 = vector.broadcast %cst_72 : f32 to vector<16x1xf32>
    %290 = arith.divf %288, %289 : vector<16x1xf32>
    %c0_73 = arith.constant 0 : index
    %c0_74 = arith.constant 0 : index
    %291 = vector.load %arg26[%c0_73, %c0_74] : memref<16x1xf32, #tpu.memory_space<vmem>>, vector<16x1xf32>
    tpu.vector_store %arg26[%c0_73, %c0_74], %290 {strides = array<i32>} : memref<16x1xf32, #tpu.memory_space<vmem>>, vector<16x1xf32>,
    return
  }
  func.func @transform_0(%arg0: i32) -> (i32, i32) {
    %c0_i32 = arith.constant 0 : i32
    %c0_i32_0 = arith.constant 0 : i32
    %c0_i32_1 = arith.constant 0 : i32
    return %c0_i32, %c0_i32_0 : i32, i32
  }
  func.func @transform_1(%arg0: i32) -> (i32, i32) {
    %c0_i32 = arith.constant 0 : i32
    %c0_i32_0 = arith.constant 0 : i32
    %c0_i32_1 = arith.constant 0 : i32
    return %c0_i32, %c0_i32_0 : i32, i32
  }
  func.func @transform_2(%arg0: i32) -> (i32, i32) {
    %c0_i32 = arith.constant 0 : i32
    %c0_i32_0 = arith.constant 0 : i32
    %c0_i32_1 = arith.constant 0 : i32
    return %c0_i32, %c0_i32_0 : i32, i32
  }
  func.func @transform_3(%arg0: i32) -> (i32, i32) {
    %c0_i32 = arith.constant 0 : i32
    %c0_i32_0 = arith.constant 0 : i32
    %c0_i32_1 = arith.constant 0 : i32
    return %c0_i32, %c0_i32_0 : i32, i32
  }
  func.func @transform_4(%arg0: i32) -> (i32, i32) {
    %c0_i32 = arith.constant 0 : i32
    %c0_i32_0 = arith.constant 0 : i32
    %c0_i32_1 = arith.constant 0 : i32
    return %c0_i32, %c0_i32_0 : i32, i32
  }
  func.func @transform_5(%arg0: i32) -> (i32, i32) {
    %c0_i32 = arith.constant 0 : i32
    %c0_i32_0 = arith.constant 0 : i32
    %c0_i32_1 = arith.constant 0 : i32
    return %c0_i32, %c0_i32_0 : i32, i32
  }
  func.func @transform_6(%arg0: i32) -> (i32, i32) {
    %c0_i32 = arith.constant 0 : i32
    %c0_i32_0 = arith.constant 0 : i32
    %c0_i32_1 = arith.constant 0 : i32
    return %c0_i32, %c0_i32_0 : i32, i32
  }
  func.func @transform_7(%arg0: i32) -> (i32, i32) {
    %c0_i32 = arith.constant 0 : i32
    %c0_i32_0 = arith.constant 0 : i32
    %c0_i32_1 = arith.constant 0 : i32
    return %c0_i32, %c0_i32_0 : i32, i32
  }
  func.func @transform_8(%arg0: i32) -> (i32, i32) {
    %c0_i32 = arith.constant 0 : i32
    %c0_i32_0 = arith.constant 0 : i32
    %c0_i32_1 = arith.constant 0 : i32
    return %c0_i32, %c0_i32_0 : i32, i32
  }
  func.func @transform_9(%arg0: i32) -> (i32, i32) {
    %c0_i32 = arith.constant 0 : i32
    %c0_i32_0 = arith.constant 0 : i32
    %c0_i32_1 = arith.constant 0 : i32
    return %c0_i32, %c0_i32_0 : i32, i32
  }
  func.func @transform_10(%arg0: i32) -> (i32, i32) {
    %c0_i32 = arith.constant 0 : i32
    %c0_i32_0 = arith.constant 0 : i32
    %c0_i32_1 = arith.constant 0 : i32
    return %c0_i32, %c0_i32_0 : i32, i32
  }
  func.func @transform_11(%arg0: i32) -> (i32, i32) {
    %c0_i32 = arith.constant 0 : i32
    %c0_i32_0 = arith.constant 0 : i32
    %c0_i32_1 = arith.constant 0 : i32
    return %c0_i32, %c0_i32_0 : i32, i32
  }
  func.func @transform_12(%arg0: i32) -> (i32, i32) {
    %c0_i32 = arith.constant 0 : i32
    %c0_i32_0 = arith.constant 0 : i32
    %c0_i32_1 = arith.constant 0 : i32
    return %c0_i32, %c0_i32_0 : i32, i32
  }
  func.func @transform_13(%arg0: i32) -> (i32, i32) {
    %c0_i32 = arith.constant 0 : i32
    %c0_i32_0 = arith.constant 0 : i32
    %c0_i32_1 = arith.constant 0 : i32
    return %c0_i32, %c0_i32_0 : i32, i32
  }
  func.func @transform_14(%arg0: i32) -> (i32, i32) {
    %c0_i32 = arith.constant 0 : i32
    %c0_i32_0 = arith.constant 0 : i32
    %c0_i32_1 = arith.constant 0 : i32
    return %c0_i32, %c0_i32_0 : i32, i32
  }
  func.func @transform_15(%arg0: i32) -> (i32, i32) {
    %c0_i32 = arith.constant 0 : i32
    %c0_i32_0 = arith.constant 0 : i32
    %c0_i32_1 = arith.constant 0 : i32
    return %c0_i32, %c0_i32_0 : i32, i32
  }
  func.func @transform_16(%arg0: i32) -> (i32, i32) {
    %c0_i32 = arith.constant 0 : i32
    %c0_i32_0 = arith.constant 0 : i32
    %c0_i32_1 = arith.constant 0 : i32
    return %c0_i32, %c0_i32_0 : i32, i32
  }
  func.func @transform_17(%arg0: i32) -> (i32, i32) {
    %c0_i32 = arith.constant 0 : i32
    %c0_i32_0 = arith.constant 0 : i32
    %c0_i32_1 = arith.constant 0 : i32
    return %c0_i32, %c0_i32_0 : i32, i32
  }
  func.func @transform_18(%arg0: i32) -> (i32, i32) {
    %c0_i32 = arith.constant 0 : i32
    %c0_i32_0 = arith.constant 0 : i32
    %c0_i32_1 = arith.constant 0 : i32
    return %c0_i32, %c0_i32_0 : i32, i32
  }
  func.func @transform_19(%arg0: i32) -> (i32, i32) {
    %c0_i32 = arith.constant 0 : i32
    %c0_i32_0 = arith.constant 0 : i32
    %c0_i32_1 = arith.constant 0 : i32
    return %c0_i32, %c0_i32_0 : i32, i32
  }
  func.func @transform_20(%arg0: i32) -> (i32, i32) {
    %c0_i32 = arith.constant 0 : i32
    %c0_i32_0 = arith.constant 0 : i32
    %c0_i32_1 = arith.constant 0 : i32
    return %c0_i32, %c0_i32_0 : i32, i32
  }
  func.func @transform_21(%arg0: i32) -> (i32, i32) {
    %c0_i32 = arith.constant 0 : i32
    %c0_i32_0 = arith.constant 0 : i32
    %c0_i32_1 = arith.constant 0 : i32
    return %c0_i32, %c0_i32_0 : i32, i32
  }
  func.func @transform_22(%arg0: i32) -> (i32, i32) {
    %c0_i32 = arith.constant 0 : i32
    %c0_i32_0 = arith.constant 0 : i32
    %c0_i32_1 = arith.constant 0 : i32
    return %c0_i32, %c0_i32_0 : i32, i32
  }
  func.func @transform_23(%arg0: i32) -> (i32, i32) {
    %c0_i32 = arith.constant 0 : i32
    %c0_i32_0 = arith.constant 0 : i32
    %c0_i32_1 = arith.constant 0 : i32
    return %c0_i32, %c0_i32_0 : i32, i32
  }
  func.func @transform_24(%arg0: i32) -> (i32, i32) {
    %c0_i32 = arith.constant 0 : i32
    %c0_i32_0 = arith.constant 0 : i32
    %c0_i32_1 = arith.constant 0 : i32
    return %c0_i32, %c0_i32_0 : i32, i32
  }
  func.func @transform_25(%arg0: i32) -> (i32, i32) {
    %c0_i32 = arith.constant 0 : i32
    %c0_i32_0 = arith.constant 0 : i32
    %c0_i32_1 = arith.constant 0 : i32
    return %c0_i32, %c0_i32_0 : i32, i32
  }
}

</mosaic_0001>

<bundles_post_ra>
// kernel: tpu_custom_call.1
= control target key start
LH: loop header
LB: loop body
LE: loop exit
PB: predicated region body
PF: predicated region fallthrough
CT: control target
= control target key end

     0   :  { %s8803_s0 = inlined_call_operand.hbm [shape: f32[16,256], index: 0, kind: input, shape index: {}]   ;;  %s8804_s1 = inlined_call_operand.hbm [shape: bf16[64,176], index: 1, kind: input, shape index: {}]   ;;  %s8805_s2 = inlined_call_operand.vmem [shape: bf16[64,704], index: 2, kind: input, shape index: {}]   ;;  %s8806_s3 = inlined_call_operand.vmem [shape: bf16[64,704], index: 3, kind: input, shape index: {}]   ;;  %s8807_s4 = inlined_call_operand.vmem [shape: bf16[64,704], index: 4, kind: input, shape index: {}]   ;;  %s8808_s5 = inlined_call_operand.vmem [shape: bf16[64,704], index: 5, kind: input, shape index: {}]   ;;  %s8809_s6 = inlined_call_operand.vmem [shape: bf16[64,704], index: 6, kind: input, shape index: {}]   ;;  %s8810_s7 = inlined_call_operand.hbm [shape: bf16[64,704], index: 7, kind: input, shape index: {}]   ;;  %s8811_s8 = inlined_call_operand.hbm [shape: bf16[16,704], index: 8, kind: input, shape index: {}]   ;;  %s8812_s9 = inlined_call_operand.vmem [shape: f32[64,1], index: 9, kind: input, shape index: {}]   ;;  %s8813_s10 = inlined_call_operand.vmem [shape: f32[64,1], index: 10, kind: input, shape index: {}]   ;;  %s8814_s11 = inlined_call_operand.vmem [shape: f32[64,1], index: 11, kind: input, shape index: {}]   ;;  %s8815_s12 = inlined_call_operand.vmem [shape: f32[64,1], index: 12, kind: input, shape index: {}]   ;;  %s8816_s13 = inlined_call_operand.vmem [shape: f32[64,1], index: 13, kind: input, shape index: {}]   ;;  %s8817_s14 = inlined_call_operand.vmem [shape: f32[64,1], index: 14, kind: input, shape index: {}]   ;;  %s8818_s15 = inlined_call_operand.vmem [shape: f32[64,1], index: 15, kind: input, shape index: {}]   ;;  %s8819_s16 = inlined_call_operand.vmem [shape: f32[16,1], index: 16, kind: input, shape index: {}]   ;;  %s8820_s17 = inlined_call_operand.vmem [shape: bf16[256,266], index: 17, kind: input, shape index: {}]   ;;  %s8821_s18 = inlined_call_operand.vmem [shape: bf16[128,138], index: 18, kind: input, shape index: {}]   ;;  %s8822_s19 = inlined_call_operand.vmem [shape: bf16[64,74], index: 19, kind: input, shape index: {}]   ;;  %s8823_s20 = inlined_call_operand.vmem [shape: bf16[32,42], index: 20, kind: input, shape index: {}]   ;;  %s8824_s21 = inlined_call_operand.hbm [shape: bf16[16,26], index: 21, kind: input, shape index: {}]   ;;  %s8825_s22 = inlined_call_operand.vmem [shape: bf16[8,18], index: 22, kind: input, shape index: {}]   ;;  %s8826_s23 = inlined_call_operand.hbm [shape: bf16[4,14], index: 23, kind: input, shape index: {}]   ;;  %s8827_s24 = inlined_call_operand.vmem [shape: bf16[2,12], index: 24, kind: input, shape index: {}]   ;;  %s8828_s25 = inlined_call_operand.vmem [shape: f32[16,1], index: 25, kind: output, shape index: {}]  }
   0x1   :  { %8839 = sst [smem:[#allocation16_spill]] %s8803_s0 }
   0x2   :  { %8840 = sst [smem:[#allocation17_spill]] %s8804_s1 }
   0x3   :  { %8841 = sst [smem:[#allocation18_spill]] %s8805_s2 }
   0x4   :  { %8842 = sst [smem:[#allocation19_spill]] %s8806_s3 }
   0x5   :  { %8843 = sst [smem:[#allocation20_spill]] %s8807_s4 }
   0x6   :  { %8844 = sst [smem:[#allocation21_spill]] %s8808_s5 }
   0x7   :  { %8845 = sst [smem:[#allocation22_spill]] %s8809_s6 }
   0x8   :  { %8846 = sst [smem:[#allocation23_spill]] %s8810_s7 }
   0x9   :  { %8847 = sst [smem:[#allocation24_spill]] %s8811_s8 }
   0xa   :  { %8848 = sst [smem:[#allocation25_spill]] %s8812_s9 }
   0xb   :  { %8849 = sst [smem:[#allocation26_spill]] %s8819_s16 }
   0xc   :  { %8850 = sst [smem:[#allocation27_spill]] %s8828_s25 }
   0xd   :  { %30 = vsyncpa [#allocation3], 0 }
   0xe   :  { %31 = vsyncpa [#allocation5], 0 }
   0xf   :  { %32 = vsyncpa [#allocation8], 0 }
  0x10   :  { %33 = vsyncpa [#allocation11], 0  ;;  %s6772_s29 = smov [#allocation4]  }
  0x11   :  { %s51_s2 = sshll.u32 %s6772_s29, 4  ;;  %s52_s2 = int_to_ptr.vmem [resolvable:$true] %s51_s2 }
  0x12   :  { %s6652_s6 = scalar_lea.vmem %s52_s2, 1024  ;;  %p6657_p1 = scmp.lt.s32.totalorder %s52_s2, %s52_s2 }
  0x13   :  { %p6653_p0 = scmp.ne.s32.totalorder %s52_s2, %s6652_s6  ;;  %p6658_p2 = scmp.lt.s32.totalorder %s6652_s6, %s6652_s6 }
  0x15   :  { %p6659_p3 = por %p6658_p2, %p6657_p1 }
  0x17   :  { %p6660_p4 = pnand %p6659_p3, %p6653_p0 }
  0x19   :  { %6663 = shalt.err (!%p6660_p4)
}
  0x1a   :  { %s6773_s30 = smov 128   ;;  %s8836_s7 = smov 8  }
  0x1b   :  { %s8851_s1 = sld [smem:[#allocation17_spill]]  ;;  %s6775_s8 = smov [#allocation7]  }
  0x1c   :  { %s85_s27 = sshll.u32 %s6775_s8, 4  ;;  %s6776_s4 = smov [#allocation2]   ;;  %s86_s27 = int_to_ptr.vmem [resolvable:$true] %s85_s27 }
  0x1d   :  { %s39_s28 = sshll.u32 %s6776_s4, 4  ;;  %s6672_s9 = scalar_lea.vmem %s86_s27, 768  ;;  %s40_s28 = int_to_ptr.vmem [resolvable:$true] %s39_s28 }
  0x1e   :  { %p6673_p5 = scmp.ne.s32.totalorder %s86_s27, %s6672_s9  ;;  %p6677_p6 = scmp.lt.s32.totalorder %s86_s27, %s86_s27 }
  0x1f   :  { %p6678_p7 = scmp.lt.s32.totalorder %s6672_s9, %s6672_s9 }
  0x21   :  { %57 = dma.hbm_to_vmem [thread:$0]  %s8851_s1, 1024, %s52_s2, [#allocation5], %s6773_s30, %s6773_s30, %s8836_s7  }
  0x22   :  { %p6679_p8 = por %p6678_p7, %p6677_p6 }
  0x24   :  { %p6680_p9 = pnand %p6679_p8, %p6673_p5 }
  0x26   :  { %6683 = shalt.err (!%p6680_p9)
}
  0x27   :  { %s6777_s5 = smov 384   ;;  %s6778_s0 = smov 24  }
  0x28   :  { %s8852_s25 = sld [smem:[#allocation24_spill]]  ;;  %s6692_s2 = scalar_lea.vmem %s40_s28, 512 }
  0x29   :  { %p6693_p10 = scmp.ne.s32.totalorder %s40_s28, %s6692_s2  ;;  %p6697_p11 = scmp.lt.s32.totalorder %s40_s28, %s40_s28 }
  0x2a   :  { %p6698_p12 = scmp.lt.s32.totalorder %s6692_s2, %s6692_s2 }
  0x2c   :  { %p6699_p13 = por %p6698_p12, %p6697_p11 }
  0x2e   :  { %91 = dma.hbm_to_vmem [thread:$0]  %s8852_s25, 768, %s86_s27, [#allocation8], %s6777_s5, %s6777_s5, %s6778_s0  }
  0x2f   :  { %p6700_p0 = pnand %p6699_p13, %p6693_p10 }
  0x31   :  { %6703 = shalt.err (!%p6700_p0)
}
  0x32   :  { %s6779_s30 = smov 256   ;;  %s6780_s3 = smov 16  }
  0x33   :  { %s8853_s8 = sld [smem:[#allocation16_spill]]  ;;  %s6781_s4 = smov [#allocation6]  }
  0x34   :  { %s73_s9 = sshll.u32 %s6781_s4, 4  ;;  %s6782_s7 = smov [#allocation9]   ;;  %s74_s9 = int_to_ptr.vmem [resolvable:$true] %s73_s9 }
  0x35   :  { %s121_s29 = sshll.u32 %s6782_s7, 4  ;;  %s6712_s25 = scalar_lea.vmem %s74_s9, 3072  ;;  %s122_s29 = int_to_ptr.vmem [resolvable:$true] %s121_s29 }
  0x36   :  { %p6713_p1 = scmp.ne.s32.totalorder %s74_s9, %s6712_s25  ;;  %p6717_p2 = scmp.lt.s32.totalorder %s74_s9, %s74_s9 }
  0x37   :  { %p6718_p3 = scmp.lt.s32.totalorder %s6712_s25, %s6712_s25 }
  0x39   :  { %45 = dma.hbm_to_vmem [thread:$0]  %s8853_s8, 512, %s40_s28, [#allocation3], %s6779_s30, %s6779_s30, %s6780_s3  }
  0x3a   :  { %p6719_p4 = por %p6718_p3, %p6717_p2 }
  0x3c   :  { %p6720_p5 = pnand %p6719_p4, %p6713_p1 }
  0x3e   :  { %6723 = shalt.err (!%p6720_p5)
}
  0x3f   :  { %s8854_s2 = sld [smem:[#allocation23_spill]]  ;;  %s6732_s16 = scalar_lea.vmem %s122_s29, 128 }
  0x40   :  { %p6733_p6 = scmp.ne.s32.totalorder %s122_s29, %s6732_s16  ;;  %p6737_p7 = scmp.lt.s32.totalorder %s122_s29, %s122_s29 }
  0x41   :  { %p6738_p8 = scmp.lt.s32.totalorder %s6732_s16, %s6732_s16 }
  0x43   :  { %p6739_p9 = por %p6738_p8, %p6737_p7 }
  0x45   :  { %79 = dma.hbm_to_vmem [thread:$0]  %s8854_s2, 3072, %s74_s9, [#allocation5], %s6777_s5, %s6777_s5, %s6778_s0  }
  0x46   :  { %p6740_p10 = pnand %p6739_p9, %p6733_p6 }
  0x48   :  { %6743 = shalt.err (!%p6740_p10)
}
  0x49   :  { %s6783_s7 = smov 64   ;;  %s6784_s28 = smov 4  }
  0x4a   :  { %127 = dma.hbm_to_vmem [thread:$0]  %s8824_s21, 128, %s122_s29, [#allocation8], %s6783_s7, %s6783_s7, %s6784_s28  }
  0x4b   :  { %s6785_s26 = smov [#allocation10]  }
  0x4c   :  { %s136_s1 = sshll.u32 %s6785_s26, 4  ;;  %s137_s1 = int_to_ptr.vmem [resolvable:$true] %s136_s1 }
  0x4d   :  { %s6752_s8 = scalar_lea.vmem %s137_s1, 32  ;;  %p6757_p12 = scmp.lt.s32.totalorder %s137_s1, %s137_s1 }
  0x4e   :  { %p6753_p11 = scmp.ne.s32.totalorder %s137_s1, %s6752_s8  ;;  %p6758_p13 = scmp.lt.s32.totalorder %s6752_s8, %s6752_s8 }
  0x50   :  { %p6759_p0 = por %p6758_p13, %p6757_p12 }
  0x52   :  { %p6760_p1 = pnand %p6759_p0, %p6753_p11 }
  0x54   :  { %6763 = shalt.err (!%p6760_p1)
}
  0x55   :  { %139 = dma.hbm_to_vmem [thread:$0]  %s8826_s23, 32, %s137_s1, [#allocation11]  }
  0x56   :  { %6764 = dma.done.wait [#allocation3], 512  }
  0x57   :  { %6765 = vsyncadd [#allocation3], 4294966784 }
  0x58   :  { %6766 = dma.done.wait [#allocation5], 4096  }
  0x59   :  { %6767 = vsyncadd [#allocation5], 4294963200 }
  0x5a   :  { %6768 = dma.done.wait [#allocation8], 896  }
  0x5b   :  { %6769 = vsyncadd [#allocation8], 4294966400 }
  0x5c   :  { %6770 = dma.done.wait [#allocation11], 32  }
  0x5d   :  { %6771 = vsyncadd [#allocation11], 4294967264  ;;  %v6312_v0 = vld [vmem:[%s8820_s17 + $0xac] ss:$12 sps:$4 sm:$0xff]   ;;  %v6314_v1 = vld [vmem:[%s8820_s17 + $0xa8] ss:$12 sps:$4 sm:$0xff]  }
  0x5e   :  { %487 = vmatprep.subr.bf16.mxu0 %v6312_v0  ;;  %v6315_v2 = vld [vmem:[%s8820_s17 + $0x94] ss:$12 sps:$4 sm:$0xff]   ;;  %v6317_v3 = vld [vmem:[%s8820_s17 + $0x90] ss:$12 sps:$4 sm:$0xff]   ;;  %v6320_v5 = vld [vmem:[%s8820_s17 + $0x78] ss:$12 sps:$4 sm:$0xff]  }
  0x5f   :  { %488 = vmatpush1.bf16.msra.mxu0 %v6314_v1  ;;  %v6318_v4 = vld [vmem:[%s8820_s17 + $0x7c] ss:$12 sps:$4 sm:$0xff]   ;;  %v6321_v6 = vld [vmem:[%s8820_s17 + $0x64] ss:$12 sps:$4 sm:$0xff]   ;;  %v6323_v9 = vld [vmem:[%s8820_s17 + $0x60] ss:$12 sps:$4 sm:$0xff]  }
  0x60   :  { %489 = vmatprep.subr.bf16.mxu0 %v6315_v2  ;;  %v6326_v7 = vld [vmem:[%s8820_s17 + $0x170] ss:$12 sps:$4 sm:$0xff]   ;;  %v6331_v10 = vld [vmem:[%s8820_s17 + $0x158] ss:$12 sps:$4 sm:$0xff]   ;;  %v6336_v13 = vld [vmem:[%s8820_s17 + $0x140] ss:$12 sps:$4 sm:$0xff]  }
  0x61   :  { %v6328_v8 = vld [vmem:[%s8820_s17 + $0xb0] ss:$12 sps:$4 sm:$0xff]   ;;  %5595 = vmatprep.subr.bf16.mxu1 %v6326_v7  ;;  %v6333_v11 = vld [vmem:[%s8820_s17 + $0x98] ss:$12 sps:$4 sm:$0xff]   ;;  %v6327_v14 = vld [vmem:[%s8820_s17 + $0x48] ss:$12 sps:$4 sm:$0xff]  }
  0x62   :  { %5596 = vmatpush3.bf16.msra.mxu1 %v6328_v8  ;;  %v6324_v12 = vld [vmem:[%s8820_s17 + $0x4c] ss:$12 sps:$4 sm:$0xff]   ;;  %v6329_v16 = vld [vmem:[%s8820_s17 + $0x34] ss:$12 sps:$4 sm:$0xff]   ;;  %v6332_v19 = vld [vmem:[%s8820_s17 + $0x30] ss:$12 sps:$4 sm:$0xff]  }
  0x63   :  { %490 = vmatpush1.bf16.msra.mxu0 %v6317_v3  ;;  %5597 = vmatprep.subr.bf16.mxu1 %v6331_v10  ;;  %v6338_v15 = vld [vmem:[%s8820_s17 + $0x80] ss:$12 sps:$4 sm:$0xff]   ;;  %v6341_v17 = vld [vmem:[%s8820_s17 + $0x128] ss:$12 sps:$4 sm:$0xff]   ;;  %v6346_v21 = vld [vmem:[%s8820_s17 + $0x110] ss:$12 sps:$4 sm:$0xff]  }
  0x64   :  { %491 = vmatprep.subr.bf16.mxu0 %v6318_v4  ;;  %v6343_v18 = vld [vmem:[%s8820_s17 + $0x68] ss:$12 sps:$4 sm:$0xff]   ;;  %v6337_v22 = vld [vmem:[%s8820_s17 + $0x18] ss:$12 sps:$4 sm:$0xff]   ;;  %v6348_v23 = vld [vmem:[%s8820_s17 + $0x50] ss:$12 sps:$4 sm:$0xff]  }
  0x65   :  { %v6334_v20 = vld [vmem:[%s8820_s17 + $0x1c] ss:$12 sps:$4 sm:$0xff]   ;;  %v6351_v24 = vld [vmem:[%s8820_s17 + $0xf8] ss:$12 sps:$4 sm:$0xff]   ;;  %v6342_v27 = vld [vmem:[%s8820_s17] ss:$12 sps:$4 sm:$0xff]  }
  0x66   :  { %5598 = vmatpush3.bf16.msra.mxu1 %v6333_v11  ;;  %v6339_v25 = vld [vmem:[%s8820_s17 + $0x4] ss:$12 sps:$4 sm:$0xff]   ;;  %v6356_v28 = vld [vmem:[%s8820_s17 + $0xe0] ss:$12 sps:$4 sm:$0xff]   ;;  %v6347_v30 = vld [vmem:[%s8820_s17 + $0x168] ss:$12 sps:$4 sm:$0xff]  }
  0x67   :  { %492 = vmatpush1.bf16.msra.mxu0 %v6320_v5  ;;  %5599 = vmatprep.subr.bf16.mxu1 %v6336_v13  ;;  %v6353_v26 = vld [vmem:[%s8820_s17 + $0x38] ss:$12 sps:$4 sm:$0xff]   ;;  %v6349_v31 = vld [vmem:[%s8820_s17 + $0x154] ss:$12 sps:$4 sm:$0xff]   ;;  %v162_v34 = vld [vmem:[#allocation2 + $0x8] sm:$0xff]  ;;  %s6786_s23 = smov 127  }
  0x68   :  { %493 = vmatprep.subr.bf16.mxu0 %v6321_v6  ;;  %v6344_v29 = vld [vmem:[%s8820_s17 + $0x16c] ss:$12 sps:$4 sm:$0xff]   ;;  %v6361_v33 = vld [vmem:[%s8820_s17 + $0xc8] ss:$12 sps:$4 sm:$0xff]   ;;  %v161_v38 = vld [vmem:[#allocation2] sm:$0xff]  ;;  %s6787_s27 = smov 126  }
  0x69   :  { %v6358_v32 = vld [vmem:[%s8820_s17 + $0x20] ss:$12 sps:$4 sm:$0xff]   ;;  %v164_v35 = vld [vmem:[#allocation2 + $0x18] sm:$0xff]  ;;  %v6363_v36 = vld [vmem:[%s8820_s17 + $0x8] ss:$12 sps:$4 sm:$0xff]   ;;  %s6789_s6 = smov 2  }
  0x6a   :  { %5600 = vmatpush3.bf16.msra.mxu1 %v6338_v15  ;;  %v166_v37 = vpack.c.bf16 %v164_v35, %v162_v34  ;;  %v163_v39 = vld [vmem:[#allocation2 + $0x10] sm:$0xff]  ;;  %v6354_v41 = vld [vmem:[%s8820_s17 + $0x13c] ss:$12 sps:$4 sm:$0xff]   ;;  %v6357_v43 = vld [vmem:[%s8820_s17 + $0x138] ss:$12 sps:$4 sm:$0xff]   ;;  %s6790_s2 = smov 122  }
  0x6b   :  { %494 = vmatpush1.bf16.msra.mxu0 %v6323_v9  ;;  %5601 = vmatprep.subr.bf16.mxu1 %v6341_v17  ;;  %v6352_v40 = vld [vmem:[%s8820_s17 + $0x150] ss:$12 sps:$4 sm:$0xff]   ;;  %v165_v42 = vpack.c.bf16 %v163_v39, %v161_v38  ;;  %v6362_v45 = vld [vmem:[%s8820_s17 + $0x120] ss:$12 sps:$4 sm:$0xff]   ;;  %v6366_v47 = vld [vmem:[%s8820_s17 + $0x108] ss:$12 sps:$4 sm:$0xff]  }
  0x6c   :  { %495 = vmatprep.subr.bf16.mxu0 %v6324_v12  ;;  %562 = vmatprep.mubr.bf16.mxu1 %v166_v37  ;;  %v6359_v44 = vld [vmem:[%s8820_s17 + $0x124] ss:$12 sps:$4 sm:$0xff]   ;;  %v6364_v46 = vld [vmem:[%s8820_s17 + $0x10c] ss:$12 sps:$4 sm:$0xff]   ;;  %v6367_v48 = vld [vmem:[%s8820_s17 + $0xf4] ss:$12 sps:$4 sm:$0xff]  }
  0x6d   :  { %519 = vmatprep.mubr.bf16.mxu0 %v166_v37  ;;  %v6369_v49 = vld [vmem:[%s8820_s17 + $0xf0] ss:$12 sps:$4 sm:$0xff]   ;;  %v6372_v51 = vld [vmem:[%s8820_s17 + $0xd8] ss:$12 sps:$4 sm:$0xff]   ;;  %v6375_v53 = vld [vmem:[%s8820_s17 + $0xc0] ss:$12 sps:$4 sm:$0xff]  }
  0x6e   :  { %5602 = vmatpush3.bf16.msra.mxu1 %v6343_v18  ;;  %v6370_v50 = vld [vmem:[%s8820_s17 + $0xdc] ss:$12 sps:$4 sm:$0xff]   ;;  %v6373_v52 = vld [vmem:[%s8820_s17 + $0xc4] ss:$12 sps:$4 sm:$0xff]   ;;  %s6788_s17 = smov 3   ;;  %v6791_v5 = vmov 0  }
  0x6f   :  { %496 = vmatpush1.bf16.msra.mxu0 %v6327_v14  ;;  %5603 = vmatprep.subr.bf16.mxu1 %v6346_v21  ;;  %s6792_s7 = smov 123   ;;  %s6793_s30 = smov 124   ;;  %vm692_vm0 = vcmask 15360   ;;  %vm601_vm1 = vcmask 1031168   ;;  %vm638_vm2 = vcmask 1043456   ;;  %vm828_vm3 = vcmask 392192  }
  0x70   :  { %497 = vmatprep.subr.bf16.mxu0 %v6329_v16  ;;  %6311 = vset.pattern.permute.xlu1 %v6791_v5  ;;  %s6794_s3 = smov 119   ;;  %s6795_s26 = smov 125   ;;  %v6376_v10 = vld [vmem:[#allocation4 + $0x4] ss:$8 sps:$4 sm:$0xff]   ;;  %vm681_vm4 = vcmask 23552   ;;  %vm589_vm5 = vcmask 1039360  }
  0x71   :  { %6310 = vset.pattern.permute.xlu0 %v6791_v5  ;;  %s6796_s1 = smov 120   ;;  %s6797_s8 = smov 121   ;;  %vm670_vm6 = vcmask 31744   ;;  %vm595_vm7 = vcmask 998400   ;;  %vm582_vm8 = vcmask 1006592   ;;  %vm625_vm9 = vcmask 1014784  }
  0x72   :  { %5604 = vmatpush3.bf16.msra.mxu1 %v6348_v23  ;;  %s8855_s21 = sld [smem:[#allocation25_spill]]  ;;  %vm631_vm10 = vcmask 973824   ;;  %vm613_vm11 = vcmask 1022976   ;;  %vm619_vm12 = vcmask 982016   ;;  %vm607_vm13 = vcmask 990208   ;;  %s6800_s16 = smov 57  }
  0x73   :  { %498 = vmatpush1.bf16.msra.mxu0 %v6332_v19  ;;  %5605 = vmatprep.subr.bf16.mxu1 %v6351_v24  ;;  %s6801_s5 = smov 67   ;;  %s6802_s0 = smov 68   ;;  %vm1164_vm14 = vcmask 457728   ;;  %vm1126_vm15 = vcmask 474112  }
  0x74   :  { %499 = vmatprep.subr.bf16.mxu0 %v6334_v20  ;;  %s6803_s4 = smov 66   ;;  %s6804_s9 = smov 59  }
  0x75   :  { %s6807_s25 = smov 36  }
  0x76   :  { %5606 = vmatpush3.bf16.msra.mxu1 %v6353_v26 }
  0x77   :  { %500 = vmatpush1.bf16.msra.mxu0 %v6337_v22  ;;  %5607 = vmatprep.subr.bf16.mxu1 %v6356_v28 }
  0x78   :  { %501 = vmatprep.subr.bf16.mxu0 %v6339_v25  ;;  %v745_v37 = vld [vmem:[%s8855_s21 + $0x8] sm:$0xff] }
  0x7a   :  { %5608 = vmatpush3.bf16.msra.mxu1 %v6358_v32 }
  0x7b   :  { %502 = vmatpush1.bf16.msra.mxu0 %v6342_v27  ;;  %5609 = vmatprep.subr.bf16.mxu1 %v6361_v33 }
  0x7c   :  { %503 = vmatprep.subr.bf16.mxu0 %v6344_v29 }
  0x7e   :  { %5610 = vmatpush3.bf16.msra.mxu1 %v6363_v36  ;;  %v744_v36 = vld [vmem:[%s8855_s21] sm:$0xff] }
  0x7f   :  { %504 = vmatpush2.bf16.msra.mxu0 %v6347_v30  ;;  %841 = vmatprep.subr.bf16.mxu1 %v6791_v5 }
  0x80   :  { %505 = vmatprep.subr.bf16.mxu0 %v6349_v31 }
  0x81   :  { %563 = vmatmul.mubr.bf16.vlgmr.msra.gmra.mxu1 %v165_v42 }
  0x82   :  { %5369 = vmatprep.mubr.msk.bf16.mxu1 %vm828_vm3, %v6376_v10 }
  0x83   :  { %506 = vmatpush2.bf16.msra.mxu0 %v6352_v40  ;;  %v747_v40 = vld [vmem:[%s8855_s21 + $0x18] sm:$0xff] }
  0x84   :  { %507 = vmatprep.subr.bf16.mxu0 %v6354_v41 }
  0x87   :  { %508 = vmatpush2.bf16.msra.mxu0 %v6357_v43  ;;  %v746_v43 = vld [vmem:[%s8855_s21 + $0x10] sm:$0xff] }
  0x88   :  { %509 = vmatprep.subr.bf16.mxu0 %v6359_v44 }
  0x8b   :  { %510 = vmatpush2.bf16.msra.mxu0 %v6362_v45 }
  0x8c   :  { %511 = vmatprep.subr.bf16.mxu0 %v6364_v46 }
  0x8f   :  { %512 = vmatpush2.bf16.msra.mxu0 %v6366_v47  ;;  %v749_v47 = vld [vmem:[%s8855_s21 + $0x28] sm:$0xff] }
  0x90   :  { %513 = vmatprep.subr.bf16.mxu0 %v6367_v48 }
  0x93   :  { %514 = vmatpush2.bf16.msra.mxu0 %v6369_v49 }
  0x94   :  { %515 = vmatprep.subr.bf16.mxu0 %v6370_v50  ;;  %v748_v50 = vld [vmem:[%s8855_s21 + $0x20] sm:$0xff] }
  0x97   :  { %516 = vmatpush2.bf16.msra.mxu0 %v6372_v51 }
  0x98   :  { %517 = vmatprep.subr.bf16.mxu0 %v6373_v52 }
  0x9b   :  { %518 = vmatpush2.bf16.msra.mxu0 %v6375_v53 }
  0x9e   :  { %520 = vmatmul.mubr.bf16.vlgmr.msra.gmra.mxu0 %v165_v42 }
 0x141   :  { %v5611_v54 = vpop.f32.mrf.mxu1 }
 0x143   :  { %v5612_v55 = vpop.f32.mrf.mxu1 }
 0x144   :  { %v5613_v57 = vadd.f32 %v5612_v55, %v5611_v54  ;;  %v751_v55 = vld [vmem:[%s8855_s21 + $0x38] sm:$0xff] }
 0x145   :  { %v5614_v56 = vpop.f32.mrf.mxu1 }
 0x147   :  { %v5615_v58 = vpop.f32.mrf.mxu1 }
 0x148   :  { %v5616_v59 = vadd.f32 %v5615_v58, %v5614_v56  ;;  %v750_v56 = vld [vmem:[%s8855_s21 + $0x30] sm:$0xff]  ;;  %s8856_s21 = sld [smem:[#allocation18_spill]] }
 0x14a   :  { %v573_v60 = vpack.c.bf16 %v5616_v59, %v5613_v57 }
 0x14c   :  { %v7130_v61 = vrot.slane %v573_v60, 4 }
 0x14e   :  { %674 = vrot.lane.b32.xlu1 %v7130_v61, %s6786_s23  ;;  %685 = vrot.lane.b32.xlu0 %v7130_v61, %s6787_s27 }
 0x15e   :  { %v521_v62 = vpop.f32.mrf.mxu0 }
 0x160   :  { %v523_v63 = vpop.f32.mrf.mxu0 }
 0x162   :  { %v525_v0 = vpop.f32.mrf.mxu0 }
 0x163   :  { %v7136_v1 = vpack.c.bf16 %v525_v0, %v521_v62 }
 0x164   :  { %v527_v2 = vpop.f32.mrf.mxu0 }
 0x165   :  { %v572_v3 = vpack.c.bf16 %v527_v2, %v523_v63  ;;  %677 = vrot.lane.b32.xlu0 %v7136_v1, %s6788_s17  ;;  %688 = vrot.lane.b32.xlu1 %v7136_v1, %s6789_s6 }
 0x167   :  { %v7140_v4 = vrot.slane %v572_v3, 4 }
 0x169   :  { %690 = vrot.lane.b32.xlu1 %v572_v3, %s6789_s6  ;;  %683 = vrot.lane.b32.xlu0 %v7140_v4, %s6787_s27  ;;  %s6799_s6 = smov 58  }
 0x16d   :  { %679 = vrot.lane.b32.xlu1 %v572_v3, %s6788_s17  ;;  %672 = vrot.lane.b32.xlu0 %v7140_v4, %s6786_s23  ;;  %s6805_s17 = smov 55  }
 0x171   :  { %668 = vrot.lane.b32.xlu1 %v572_v3, %s6784_s28  ;;  %666 = vrot.lane.b32.xlu0 %v7136_v1, %s6784_s28 }
 0x175   :  { %593 = vrot.lane.b32.xlu1 %v7130_v61, %s6790_s2  ;;  %597 = vrot.lane.b32.xlu0 %v7136_v1, %s6787_s27 }
 0x179   :  { %599 = vrot.lane.b32.xlu1 %v572_v3, %s6787_s27  ;;  %585 = vrot.lane.b32.xlu0 %v7136_v1, %s6786_s23 }
 0x17d   :  { %580 = vrot.lane.b32.xlu1 %v7130_v61, %s6792_s7  ;;  %633 = vrot.lane.b32.xlu0 %v7136_v1, %s6792_s7 }
 0x181   :  { %587 = vrot.lane.b32.xlu1 %v572_v3, %s6786_s23  ;;  %621 = vrot.lane.b32.xlu0 %v7136_v1, %s6793_s30 }
 0x185   :  { %635 = vrot.lane.b32.xlu1 %v572_v3, %s6792_s7  ;;  %591 = vrot.lane.b32.xlu0 %v7140_v4, %s6790_s2 }
 0x189   :  { %623 = vrot.lane.b32.xlu1 %v572_v3, %s6793_s30  ;;  %578 = vrot.lane.b32.xlu0 %v7140_v4, %s6792_s7 }
 0x18d   :  { %629 = vrot.lane.b32.xlu1 %v7130_v61, %s6794_s3  ;;  %609 = vrot.lane.b32.xlu0 %v7136_v1, %s6795_s26 }
 0x191   :  { %611 = vrot.lane.b32.xlu1 %v572_v3, %s6795_s26  ;;  %627 = vrot.lane.b32.xlu0 %v7140_v4, %s6794_s3 }
 0x195   :  { %617 = vrot.lane.b32.xlu1 %v7130_v61, %s6796_s1  ;;  %615 = vrot.lane.b32.xlu0 %v7140_v4, %s6796_s1 }
 0x199   :  { %605 = vrot.lane.b32.xlu1 %v7130_v61, %s6797_s8  ;;  %603 = vrot.lane.b32.xlu0 %v7140_v4, %s6797_s8 }
 0x1c0   :  { %v675_v6 = vpop.permute.xlu1 %674  ;;  %v686_v7 = vpop.permute.xlu0 %685 }
 0x1d7   :  { %v678_v8 = vpop.permute.xlu0 %677  ;;  %v689_v9 = vpop.permute.xlu1 %688 }
 0x1db   :  { %v691_v11 = vpop.permute.xlu1 %690  ;;  %v684_v12 = vpop.permute.xlu0 %683 }
 0x1dc   :  { %v693_v13 = vsel %vm692_vm0, %v689_v9, %v691_v11  ;;  %v687_v14 = vsel %vm601_vm1, %v684_v12, %v686_v7 }
 0x1dd   :  { %v711_v15 = vsel %vm638_vm2, %v686_v7, %v693_v13  ;;  %v708_v16 = vsel %vm638_vm2, %v687_v14, %v689_v9 }
 0x1de   :  { %728 = vrot.lane.b32.xlu1 %v711_v15, %s6797_s8  ;;  %726 = vrot.lane.b32.xlu0 %v708_v16, %s6797_s8 }
 0x1df   :  { %v680_v17 = vpop.permute.xlu1 %679  ;;  %v673_v18 = vpop.permute.xlu0 %672 }
 0x1e0   :  { %v682_v19 = vsel %vm681_vm4, %v678_v8, %v680_v17  ;;  %v676_v20 = vsel %vm589_vm5, %v673_v18, %v675_v6  ;;  %vm1107_vm4 = vcmask 482304  }
 0x1e1   :  { %v705_v21 = vsel %vm638_vm2, %v675_v6, %v682_v19  ;;  %v702_v22 = vsel %vm638_vm2, %v676_v20, %v678_v8 }
 0x1e2   :  { %724 = vrot.lane.b32.xlu1 %v705_v21, %s6797_s8  ;;  %722 = vrot.lane.b32.xlu0 %v702_v22, %s6797_s8  ;;  %v6378_v21 = vld [vmem:[#allocation4] ss:$8 sps:$4 sm:$0xff]   ;;  %v6379_v22 = vld [vmem:[#allocation4 + $0x14] ss:$8 sps:$4 sm:$0xff]  }
 0x1e3   :  { %v669_v23 = vpop.permute.xlu1 %668  ;;  %v667_v24 = vpop.permute.xlu0 %666 }
 0x1e4   :  { %v671_v25 = vsel %vm670_vm6, %v667_v24, %v669_v23  ;;  %v696_v26 = vsel %vm638_vm2, %v7140_v4, %v667_v24  ;;  %v6388_v23 = vld [vmem:[%s8821_s18 + $0x70] ss:$8 sps:$4 sm:$0xff]   ;;  %v6393_v24 = vld [vmem:[%s8821_s18 + $0x64] ss:$8 sps:$4 sm:$0xff]  }
 0x1e5   :  { %v699_v27 = vsel %vm638_vm2, %v7130_v61, %v671_v25  ;;  %v6391_v25 = vld [vmem:[%s8821_s18 + $0x60] ss:$8 sps:$4 sm:$0xff]  }
 0x1e6   :  { %718 = vrot.lane.b32.xlu0 %v696_v26, %s6797_s8  ;;  %720 = vrot.lane.b32.xlu1 %v699_v27, %s6797_s8  ;;  %v6396_v26 = vld [vmem:[%s8821_s18 + $0x54] ss:$8 sps:$4 sm:$0xff]   ;;  %v6381_v27 = vld [vmem:[#allocation4 + $0x10] ss:$8 sps:$4 sm:$0xff]  }
 0x1e7   :  { %v594_v28 = vpop.permute.xlu1 %593  ;;  %v598_v29 = vpop.permute.xlu0 %597 }
 0x1ea   :  { %754 = vperm.xlu0 %6310, %v744_v36   ;;  %759 = vperm.xlu1 %6311, %v745_v37   ;;  %v6405_v36 = vld [vmem:[%s8821_s18 + $0x24] ss:$8 sps:$4 sm:$0xff]   ;;  %v6403_v37 = vld [vmem:[%s8821_s18 + $0x20] ss:$8 sps:$4 sm:$0xff]  }
 0x1eb   :  { %v600_v30 = vpop.permute.xlu1 %599  ;;  %v586_v31 = vpop.permute.xlu0 %585 }
 0x1ec   :  { %v602_v41 = vsel %vm601_vm1, %v598_v29, %v600_v30  ;;  %v6394_v29 = vld [vmem:[%s8821_s18 + $0x50] ss:$8 sps:$4 sm:$0xff]   ;;  %v6399_v30 = vld [vmem:[%s8821_s18 + $0x44] ss:$8 sps:$4 sm:$0xff]  }
 0x1ee   :  { %769 = vperm.xlu0 %6310, %v747_v40   ;;  %764 = vperm.xlu1 %6311, %v746_v43   ;;  %v6406_v40 = vld [vmem:[%s8821_s18 + $0x10] ss:$8 sps:$4 sm:$0xff]  }
 0x1ef   :  { %v581_v32 = vpop.permute.xlu1 %580  ;;  %v634_v33 = vpop.permute.xlu0 %633 }
 0x1f2   :  { %779 = vperm.xlu0 %6310, %v749_v47   ;;  %774 = vperm.xlu1 %6311, %v748_v50  }
 0x1f3   :  { %v588_v34 = vpop.permute.xlu1 %587  ;;  %v622_v35 = vpop.permute.xlu0 %621 }
 0x1f4   :  { %v590_v48 = vsel %vm589_vm5, %v586_v31, %v588_v34  ;;  %v6397_v31 = vld [vmem:[%s8821_s18 + $0x40] ss:$8 sps:$4 sm:$0xff]   ;;  %v6385_v34 = vld [vmem:[#allocation4 + $0x34] ss:$8 sps:$4 sm:$0xff]  }
 0x1f6   :  { %789 = vperm.xlu0 %6310, %v751_v55   ;;  %784 = vperm.xlu1 %6311, %v750_v56  }
 0x1f7   :  { %v636_v38 = vpop.permute.xlu1 %635  ;;  %v592_v39 = vpop.permute.xlu0 %591 }
 0x1f8   :  { %v596_v42 = vsel %vm595_vm7, %v592_v39, %v594_v28  ;;  %v637_v52 = vsel %vm582_vm8, %v634_v33, %v636_v38  ;;  %v6382_v28 = vld [vmem:[#allocation4 + $0x24] ss:$8 sps:$4 sm:$0xff]   ;;  %v6384_v33 = vld [vmem:[#allocation4 + $0x20] ss:$8 sps:$4 sm:$0xff]   ;;  %v6387_v38 = vld [vmem:[#allocation4 + $0x30] ss:$8 sps:$4 sm:$0xff]  }
 0x1f9   :  { %v664_v44 = vsel %vm638_vm2, %v596_v42, %v602_v41  ;;  %v660_v57 = vsel %vm638_vm2, %v637_v52, %v7136_v1  ;;  %v645_v10 = vsel %vm638_vm2, %v590_v48, %v596_v42  ;;  %v6408_v39 = vld [vmem:[%s8821_s18 + $0x14] ss:$8 sps:$4 sm:$0xff]   ;;  %v6409_v42 = vld [vmem:[%s8821_s18] ss:$8 sps:$4 sm:$0xff]   ;;  %vm2392_vm7 = vcmask 261120  }
 0x1fa   :  { %842 = vmatpush1.bf16.msra.mxu1 %v664_v44 }
 0x1fb   :  { %v624_v45 = vpop.permute.xlu1 %623  ;;  %v579_v46 = vpop.permute.xlu0 %578  ;;  %843 = vmatprep.subr.bf16.mxu1 %v6791_v5 }
 0x1fc   :  { %v583_v49 = vsel %vm582_vm8, %v579_v46, %v581_v32  ;;  %v626_v60 = vsel %vm625_vm9, %v622_v35, %v624_v45  ;;  %v6402_v32 = vld [vmem:[%s8821_s18 + $0x34] ss:$8 sps:$4 sm:$0xff]   ;;  %v6400_v35 = vld [vmem:[%s8821_s18 + $0x30] ss:$8 sps:$4 sm:$0xff]   ;;  %vm3025_vm8 = vcmask 130048   ;;  %vm4293_vm9 = vcmask 1041408  }
 0x1fd   :  { %v662_v51 = vsel %vm638_vm2, %v583_v49, %v590_v48  ;;  %v641_v11 = vsel %vm638_vm2, %v7136_v1, %v583_v49  ;;  %v6390_v1 = vld [vmem:[%s8821_s18 + $0x74] ss:$8 sps:$4 sm:$0xff]  }
 0x1fe   :  { %844 = vmatpush1.bf16.msra.mxu1 %v662_v51 }
 0x1ff   :  { %v630_v53 = vpop.permute.xlu1 %629  ;;  %v610_v54 = vpop.permute.xlu0 %609  ;;  %845 = vmatprep.subr.bf16.mxu1 %v6791_v5 }
 0x202   :  { %846 = vmatpush1.bf16.msra.mxu1 %v660_v57 }
 0x203   :  { %v612_v58 = vpop.permute.xlu1 %611  ;;  %v628_v59 = vpop.permute.xlu0 %627  ;;  %847 = vmatprep.subr.bf16.mxu1 %v6791_v5 }
 0x204   :  { %v632_v61 = vsel %vm631_vm10, %v628_v59, %v630_v53  ;;  %v614_v2 = vsel %vm613_vm11, %v610_v54, %v612_v58  ;;  %vm5302_vm10 = vcmask 7168  }
 0x205   :  { %v657_v62 = vsel %vm638_vm2, %v626_v60, %v632_v61 }
 0x206   :  { %848 = vmatpush1.bf16.msra.mxu1 %v657_v62 }
 0x207   :  { %v618_v63 = vpop.permute.xlu1 %617  ;;  %v616_v0 = vpop.permute.xlu0 %615  ;;  %849 = vmatprep.subr.bf16.mxu1 %v6791_v5 }
 0x208   :  { %v620_v3 = vsel %vm619_vm12, %v616_v0, %v618_v63 }
 0x209   :  { %v653_v4 = vsel %vm638_vm2, %v614_v2, %v620_v3 }
 0x20a   :  { %850 = vmatpush1.bf16.msra.mxu1 %v653_v4 }
 0x20b   :  { %v606_v6 = vpop.permute.xlu1 %605  ;;  %v604_v7 = vpop.permute.xlu0 %603  ;;  %851 = vmatprep.subr.bf16.mxu1 %v6791_v5 }
 0x20c   :  { %v608_v8 = vsel %vm607_vm13, %v604_v7, %v606_v6 }
 0x20d   :  { %v649_v9 = vsel %vm638_vm2, %v602_v41, %v608_v8  ;;  %v6411_v41 = vld [vmem:[%s8821_s18 + $0x4] ss:$8 sps:$4 sm:$0xff]   ;;  %s6798_s18 = smov 56  }
 0x20e   :  { %852 = vmatpush1.bf16.msra.mxu1 %v649_v9 }
 0x20f   :  { %853 = vmatprep.subr.bf16.mxu1 %v6791_v5 }
 0x212   :  { %854 = vmatpush1.bf16.msra.mxu1 %v645_v10 }
 0x213   :  { %855 = vmatprep.subr.bf16.mxu1 %v6791_v5 }
 0x216   :  { %856 = vmatpush1.bf16.msra.mxu1 %v641_v11 }
 0x217   :  { %867 = vmatprep.subr.bf16.mxu1 %v6791_v5 }
 0x250   :  { %v729_v12 = vpop.permute.xlu1 %728  ;;  %v727_v13 = vpop.permute.xlu0 %726 }
 0x251   :  { %v732_v14 = vsel %vm607_vm13, %v727_v13, %v729_v12 }
 0x252   :  { %868 = vmatpush2.bf16.msra.mxu1 %v732_v14 }
 0x253   :  { %869 = vmatprep.subr.bf16.mxu1 %v6791_v5 }
 0x254   :  { %v725_v15 = vpop.permute.xlu1 %724  ;;  %v723_v16 = vpop.permute.xlu0 %722 }
 0x255   :  { %v731_v17 = vsel %vm607_vm13, %v723_v16, %v725_v15 }
 0x256   :  { %870 = vmatpush2.bf16.msra.mxu1 %v731_v17 }
 0x257   :  { %871 = vmatprep.subr.bf16.mxu1 %v6791_v5 }
 0x258   :  { %v721_v18 = vpop.permute.xlu1 %720  ;;  %v719_v19 = vpop.permute.xlu0 %718 }
 0x259   :  { %v730_v20 = vsel %vm607_vm13, %v719_v19, %v721_v18 }
 0x25a   :  { %872 = vmatpush2.bf16.msra.mxu1 %v730_v20 }
 0x25b   :  { %1014 = vmatprep.subr.bf16.mxu1 %v6390_v1 }
 0x25d   :  { %874 = vmatmul.mubr.bf16.vlgmr.msra.gmra.mxu1 %v6378_v21 }
 0x25e   :  { %5370 = vmatprep.mubr.msk.bf16.mxu1 %vm828_vm3, %v6379_v22  ;;  %1015 = vmatpush1.bf16.msra.mxu1 %v6388_v23 }
 0x25f   :  { %1016 = vmatprep.subr.bf16.mxu1 %v6393_v24 }
 0x262   :  { %1017 = vmatpush1.bf16.msra.mxu1 %v6391_v25 }
 0x263   :  { %1018 = vmatprep.subr.bf16.mxu1 %v6396_v26 }
 0x265   :  { %882 = vmatmul.mubr.bf16.gmra.mxu1 %v6381_v27  ;;  %v755_v44 = vpop.permute.xlu0 %754  ;;  %v760_v47 = vpop.permute.xlu1 %759 }
 0x266   :  { %5371 = vmatprep.mubr.msk.bf16.mxu1 %vm828_vm3, %v6382_v28  ;;  %1019 = vmatpush1.bf16.msra.mxu1 %v6394_v29 }
 0x267   :  { %1020 = vmatprep.subr.bf16.mxu1 %v6399_v30 }
 0x269   :  { %v765_v55 = vpop.permute.xlu1 %764  ;;  %v770_v58 = vpop.permute.xlu0 %769 }
 0x26a   :  { %1021 = vmatpush1.bf16.msra.mxu1 %v6397_v31 }
 0x26b   :  { %1022 = vmatprep.subr.bf16.mxu1 %v6402_v32 }
 0x26d   :  { %890 = vmatmul.mubr.bf16.gmra.mxu1 %v6384_v33  ;;  %v775_v3 = vpop.permute.xlu1 %774  ;;  %v780_v7 = vpop.permute.xlu0 %779 }
 0x26e   :  { %5372 = vmatprep.mubr.msk.bf16.mxu1 %vm828_vm3, %v6385_v34  ;;  %1023 = vmatpush1.bf16.msra.mxu1 %v6400_v35  ;;  %vm1145_vm3 = vcmask 465920  }
 0x26f   :  { %1024 = vmatprep.subr.bf16.mxu1 %v6405_v36 }
 0x271   :  { %v785_v15 = vpop.permute.xlu1 %784  ;;  %v790_v1 = vpop.permute.xlu0 %789 }
 0x272   :  { %1025 = vmatpush1.bf16.msra.mxu1 %v6403_v37 }
 0x273   :  { %1026 = vmatprep.subr.bf16.mxu1 %v6408_v39 }
 0x275   :  { %898 = vmatmul.mubr.bf16.gmra.mxu1 %v6387_v38 }
 0x276   :  { %1046 = vmatprep.mubr.bf16.mxu1 %v6791_v5  ;;  %1027 = vmatpush1.bf16.msra.mxu1 %v6406_v40 }
 0x277   :  { %1028 = vmatprep.subr.bf16.mxu1 %v6411_v41 }
 0x27a   :  { %1029 = vmatpush1.bf16.msra.mxu1 %v6409_v42 }
 0x31d   :  { %v875_v43 = vpop.f32.mrf.mxu1 }
 0x31e   :  { %v876_v46 = vadd.f32 %v875_v43, %v755_v44 }
 0x31f   :  { %v877_v45 = vpop.f32.mrf.mxu1 }
 0x320   :  { %v906_v51 = vmax.f32 %v876_v46, 0.0 }
 0x321   :  { %v878_v48 = vpop.f32.mrf.mxu1 }
 0x322   :  { %v879_v49 = vadd.f32 %v878_v48, %v760_v47  ;;  %v6414_v48 = vld [vmem:[%s8856_s21 + $0x4] ss:$24 sps:$4 sm:$0xff]  }
 0x323   :  { %v880_v50 = vpop.f32.mrf.mxu1 }
 0x324   :  { %v907_v52 = vmax.f32 %v879_v49, 0.0 }
 0x325   :  { %v883_v53 = vpop.f32.mrf.mxu1 }
 0x326   :  { %v914_v54 = vpack.c.bf16 %v907_v52, %v906_v51  ;;  %v884_v57 = vadd.f32 %v883_v53, %v765_v55 }
 0x327   :  { %v885_v56 = vpop.f32.mrf.mxu1 }
 0x328   :  { %1047 = vmatmul.mubr.bf16.vlgmr.msra.gmra.mxu1 %v914_v54  ;;  %v908_v62 = vmax.f32 %v884_v57, 0.0 }
 0x329   :  { %v886_v59 = vpop.f32.mrf.mxu1  ;;  %1056 = vmatprep.mubr.bf16.mxu1 %v6791_v5 }
 0x32a   :  { %v887_v60 = vadd.f32 %v886_v59, %v770_v58 }
 0x32b   :  { %v888_v61 = vpop.f32.mrf.mxu1 }
 0x32c   :  { %v909_v63 = vmax.f32 %v887_v60, 0.0 }
 0x32d   :  { %v891_v0 = vpop.f32.mrf.mxu1 }
 0x32e   :  { %v915_v2 = vpack.c.bf16 %v909_v63, %v908_v62  ;;  %v892_v6 = vadd.f32 %v891_v0, %v775_v3 }
 0x32f   :  { %v893_v4 = vpop.f32.mrf.mxu1 }
 0x330   :  { %1057 = vmatmul.mubr.bf16.gmra.mxu1 %v915_v2  ;;  %v910_v11 = vmax.f32 %v892_v6, 0.0 }
 0x331   :  { %v894_v8 = vpop.f32.mrf.mxu1  ;;  %1066 = vmatprep.mubr.bf16.mxu1 %v6791_v5 }
 0x332   :  { %v895_v9 = vadd.f32 %v894_v8, %v780_v7 }
 0x333   :  { %v896_v10 = vpop.f32.mrf.mxu1 }
 0x334   :  { %v911_v12 = vmax.f32 %v895_v9, 0.0 }
 0x335   :  { %v899_v13 = vpop.f32.mrf.mxu1 }
 0x336   :  { %v916_v14 = vpack.c.bf16 %v911_v12, %v910_v11  ;;  %v900_v17 = vadd.f32 %v899_v13, %v785_v15 }
 0x337   :  { %v901_v16 = vpop.f32.mrf.mxu1 }
 0x338   :  { %1067 = vmatmul.mubr.bf16.gmra.mxu1 %v916_v14  ;;  %v912_v21 = vmax.f32 %v900_v17, 0.0 }
 0x339   :  { %v902_v18 = vpop.f32.mrf.mxu1  ;;  %1076 = vmatprep.mubr.bf16.mxu1 %v6791_v5 }
 0x33a   :  { %v903_v19 = vadd.f32 %v902_v18, %v790_v1 }
 0x33b   :  { %v904_v20 = vpop.f32.mrf.mxu1 }
 0x33c   :  { %v913_v22 = vmax.f32 %v903_v19, 0.0 }
 0x33e   :  { %v917_v23 = vpack.c.bf16 %v913_v22, %v912_v21 }
 0x340   :  { %1077 = vmatmul.mubr.bf16.gmra.mxu1 %v917_v23 }
 0x341   :  { %1545 = vmatprep.mubr.bf16.mxu1 %v6414_v48  ;;  %v1341_v48 = vld [vmem:[%s8813_s10 + $0x28] sm:$0xff] }
 0x3e8   :  { %v1048_v24 = vpop.f32.mrf.mxu1 }
 0x3ea   :  { %v1050_v25 = vpop.f32.mrf.mxu1 }
 0x3ec   :  { %v1052_v26 = vpop.f32.mrf.mxu1 }
 0x3ed   :  { %v7311_v27 = vpack.c.bf16 %v1052_v26, %v1048_v24 }
 0x3ee   :  { %v1054_v28 = vpop.f32.mrf.mxu1 }
 0x3ef   :  { %1112 = vrot.lane.b32.xlu0 %v7311_v27, %s6786_s23  ;;  %1156 = vrot.lane.b32.xlu1 %v7311_v27, %s6798_s18  ;;  %v7316_v30 = vpack.c.bf16 %v1054_v28, %v1050_v25  ;;  %v6426_v28 = vld [vmem:[%s8856_s21 + $0xc] ss:$24 sps:$4 sm:$0xff]  }
 0x3f0   :  { %v1058_v29 = vpop.f32.mrf.mxu1  ;;  %1610 = vmatprep.mubr.bf16.mxu0 %v6426_v28  ;;  %v6424_v28 = vld [vmem:[%s8856_s21 + $0x8] ss:$24 sps:$4 sm:$0xff]  }
 0x3f2   :  { %v1060_v31 = vpop.f32.mrf.mxu1 }
 0x3f3   :  { %1118 = vrot.lane.b32.xlu1 %v7311_v27, %s6799_s6  ;;  %1158 = vrot.lane.b32.xlu0 %v7316_v30, %s6798_s18 }
 0x3f4   :  { %v1062_v32 = vpop.f32.mrf.mxu1 }
 0x3f5   :  { %v7325_v35 = vpack.c.bf16 %v1062_v32, %v1058_v29 }
 0x3f6   :  { %v1064_v33 = vpop.f32.mrf.mxu1 }
 0x3f7   :  { %1150 = vrot.lane.b32.xlu1 %v7311_v27, %s6795_s26  ;;  %1120 = vrot.lane.b32.xlu0 %v7316_v30, %s6799_s6  ;;  %v7330_v38 = vpack.c.bf16 %v1064_v33, %v1060_v31 }
 0x3f8   :  { %v1068_v34 = vpop.f32.mrf.mxu1 }
 0x3fa   :  { %v1070_v36 = vpop.f32.mrf.mxu1 }
 0x3fb   :  { %1152 = vrot.lane.b32.xlu0 %v7325_v35, %s6795_s26  ;;  %1160 = vrot.lane.b32.xlu1 %v7325_v35, %s6798_s18 }
 0x3fc   :  { %v1072_v37 = vpop.f32.mrf.mxu1 }
 0x3fd   :  { %v7339_v41 = vpack.c.bf16 %v1072_v37, %v1068_v34  ;;  %v6415_v37 = vld [vmem:[%s8856_s21 + $0x34] ss:$24 sps:$4 sm:$0xff]  }
 0x3fe   :  { %v1074_v39 = vpop.f32.mrf.mxu1 }
 0x3ff   :  { %1122 = vrot.lane.b32.xlu1 %v7325_v35, %s6799_s6  ;;  %1162 = vrot.lane.b32.xlu0 %v7330_v38, %s6798_s18  ;;  %v7351_v45 = vpack.c.bf16 %v1074_v39, %v1070_v36  ;;  %v6412_v36 = vld [vmem:[%s8856_s21] ss:$24 sps:$4 sm:$0xff]   ;;  %v1337_v39 = vld [vmem:[%s8813_s10 + $0x8] sm:$0xff]  ;;  %s6810_s18 = smov 34  }
 0x400   :  { %v1078_v40 = vpop.f32.mrf.mxu1 }
 0x402   :  { %v1080_v42 = vpop.f32.mrf.mxu1 }
 0x403   :  { %1114 = vrot.lane.b32.xlu1 %v7325_v35, %s6786_s23  ;;  %1124 = vrot.lane.b32.xlu0 %v7330_v38, %s6799_s6 }
 0x404   :  { %v1082_v43 = vpop.f32.mrf.mxu1 }
 0x405   :  { %v7347_v44 = vpack.c.bf16 %v1082_v43, %v1078_v40  ;;  %v6418_v43 = vld [vmem:[%s8856_s21 + $0x64] ss:$24 sps:$4 sm:$0xff]  }
 0x406   :  { %v1084_v46 = vpop.f32.mrf.mxu1 }
 0x407   :  { %1141 = vrot.lane.b32.xlu1 %v7325_v35, %s6800_s16  ;;  %1244 = vrot.lane.b32.xlu0 %v7339_v41, %s6801_s5  ;;  %v7357_v47 = vpack.c.bf16 %v1084_v46, %v1080_v42  ;;  %v1339_v42 = vld [vmem:[%s8813_s10 + $0x18] sm:$0xff] }
 0x40b   :  { %1210 = vrot.lane.b32.xlu1 %v7339_v41, %s6786_s23  ;;  %1234 = vrot.lane.b32.xlu0 %v7339_v41, %s6802_s0 }
 0x40f   :  { %1254 = vrot.lane.b32.xlu0 %v7339_v41, %s6803_s4  ;;  %1246 = vrot.lane.b32.xlu1 %v7347_v44, %s6801_s5  ;;  %s6829_s5 = smov 111  }
 0x413   :  { %1238 = vrot.lane.b32.xlu0 %v7351_v45, %s6786_s23  ;;  %1212 = vrot.lane.b32.xlu1 %v7347_v44, %s6786_s23 }
 0x417   :  { %1236 = vrot.lane.b32.xlu1 %v7347_v44, %s6802_s0  ;;  %1240 = vrot.lane.b32.xlu0 %v7357_v47, %s6786_s23  ;;  %s8858_s0 = sld [smem:[#allocation20_spill]] }
 0x41b   :  { %1256 = vrot.lane.b32.xlu1 %v7347_v44, %s6803_s4  ;;  %1143 = vrot.lane.b32.xlu0 %v7330_v38, %s6800_s16  ;;  %s8857_s4 = sld [smem:[#allocation19_spill]] }
 0x41f   :  { %1230 = vrot.lane.b32.xlu1 %v7347_v44, %s6787_s27  ;;  %1105 = vrot.lane.b32.xlu0 %v7330_v38, %s6804_s9 }
 0x423   :  { %1103 = vrot.lane.b32.xlu1 %v7325_v35, %s6804_s9  ;;  %1248 = vrot.lane.b32.xlu0 %v7351_v45, %s6787_s27 }
 0x427   :  { %1228 = vrot.lane.b32.xlu1 %v7339_v41, %s6787_s27  ;;  %1139 = vrot.lane.b32.xlu0 %v7316_v30, %s6800_s16 }
 0x42b   :  { %1137 = vrot.lane.b32.xlu1 %v7311_v27, %s6800_s16  ;;  %1101 = vrot.lane.b32.xlu0 %v7316_v30, %s6804_s9 }
 0x42f   :  { %1099 = vrot.lane.b32.xlu1 %v7311_v27, %s6804_s9  ;;  %1131 = vrot.lane.b32.xlu0 %v7311_v27, %s6787_s27 }
 0x433   :  { %1133 = vrot.lane.b32.xlu1 %v7325_v35, %s6787_s27  ;;  %1190 = vrot.lane.b32.xlu0 %v7325_v35, %s6792_s7 }
 0x437   :  { %1220 = vrot.lane.b32.xlu1 %v7347_v44, %s6799_s6  ;;  %1250 = vrot.lane.b32.xlu0 %v7357_v47, %s6787_s27 }
 0x43b   :  { %1216 = vrot.lane.b32.xlu1 %v7339_v41, %s6799_s6  ;;  %1218 = vrot.lane.b32.xlu0 %v7351_v45, %s6799_s6 }
 0x43f   :  { %1262 = vrot.lane.b32.xlu1 %v7347_v44, %s6800_s16  ;;  %1188 = vrot.lane.b32.xlu0 %v7311_v27, %s6792_s7 }
 0x443   :  { %1222 = vrot.lane.b32.xlu0 %v7357_v47, %s6799_s6  ;;  %s6811_s6 = smov 89  }
 0x447   :  { %1264 = vrot.lane.b32.xlu0 %v7357_v47, %s6800_s16 }
 0x461   :  { %v1157_v49 = vpop.permute.xlu1 %1156  ;;  %v1113_v50 = vpop.permute.xlu0 %1112 }
 0x465   :  { %v1119_v51 = vpop.permute.xlu1 %1118  ;;  %v1159_v52 = vpop.permute.xlu0 %1158 }
 0x466   :  { %v1165_v63 = vsel %vm1164_vm14, %v1157_v49, %v1159_v52  ;;  %v1343_v52 = vld [vmem:[%s8813_s10 + $0x38] sm:$0xff] }
 0x469   :  { %v1151_v53 = vpop.permute.xlu1 %1150  ;;  %v1121_v54 = vpop.permute.xlu0 %1120 }
 0x46a   :  { %v1127_v3 = vsel %vm1126_vm15, %v1119_v51, %v1121_v54  ;;  %v6420_v51 = vld [vmem:[%s8856_s21 + $0x60] ss:$24 sps:$4 sm:$0xff]   ;;  %v1338_v54 = vld [vmem:[%s8813_s10 + $0x10] sm:$0xff] }
 0x46d   :  { %v1161_v55 = vpop.permute.xlu1 %1160  ;;  %v1153_v56 = vpop.permute.xlu0 %1152 }
 0x471   :  { %v1123_v57 = vpop.permute.xlu1 %1122  ;;  %v1163_v58 = vpop.permute.xlu0 %1162 }
 0x472   :  { %v1166_v59 = vsel %vm1164_vm14, %v1161_v55, %v1163_v58  ;;  %v1340_v55 = vld [vmem:[%s8813_s10 + $0x20] sm:$0xff]  ;;  %v1342_v58 = vld [vmem:[%s8813_s10 + $0x30] sm:$0xff] }
 0x473   :  { %5617 = vmatprep.subr.bf16.mxu1 %v1166_v59 }
 0x475   :  { %v1115_v60 = vpop.permute.xlu1 %1114  ;;  %v1125_v61 = vpop.permute.xlu0 %1124 }
 0x476   :  { %v1128_v62 = vsel %vm1126_vm15, %v1123_v57, %v1125_v61  ;;  %v6432_v57 = vld [vmem:[%s8856_s21 + $0x14] ss:$24 sps:$4 sm:$0xff]  }
 0x477   :  { %5618 = vmatpush3.bf16.msra.mxu1 %v1128_v62 }
 0x478   :  { %5619 = vmatprep.subr.bf16.mxu1 %v1165_v63 }
 0x479   :  { %v1142_v0 = vpop.permute.xlu1 %1141  ;;  %v1245_v2 = vpop.permute.xlu0 %1244 }
 0x47a   :  { %1278 = vrot.lane.b32.xlu0 %v1245_v2, %s6800_s16 }
 0x47b   :  { %5620 = vmatpush3.bf16.msra.mxu1 %v1127_v3 }
 0x47c   :  { %5621 = vmatprep.subr.bf16.mxu1 %v1153_v56  ;;  %v6423_v56 = vld [vmem:[%s8856_s21 + $0x90] ss:$24 sps:$4 sm:$0xff]  }
 0x47d   :  { %v7411_v4 = vpop.permute.xlu1 %1210  ;;  %v1235_v6 = vpop.permute.xlu0 %1234 }
 0x47e   :  { %1266 = vrot.lane.b32.xlu1 %v1235_v6, %s6800_s16 }
 0x47f   :  { %5622 = vmatpush3.bf16.msra.mxu1 %v1115_v60 }
 0x480   :  { %5623 = vmatprep.subr.bf16.mxu1 %v1151_v53  ;;  %v6421_v53 = vld [vmem:[%s8856_s21 + $0x94] ss:$24 sps:$4 sm:$0xff]  }
 0x481   :  { %v1247_v7 = vpop.permute.xlu1 %1246  ;;  %v7414_v8 = vpop.permute.xlu0 %1254 }
 0x483   :  { %5624 = vmatpush3.bf16.msra.mxu1 %v1113_v50  ;;  %v1336_v50 = vld [vmem:[%s8813_s10] sm:$0xff]  ;;  %s6813_s10 = smov 87  }
 0x485   :  { %v7416_v9 = vpop.permute.xlu1 %1212  ;;  %v1239_v10 = vpop.permute.xlu0 %1238 }
 0x486   :  { %1272 = vrot.lane.b32.xlu0 %v1239_v10, %s6800_s16  ;;  %v1242_v11 = vsel %vm589_vm5, %v7411_v4, %v1239_v10 }
 0x487   :  { %1270 = vrot.lane.b32.xlu1 %v1242_v11, %s6800_s16 }
 0x489   :  { %v1237_v12 = vpop.permute.xlu1 %1236  ;;  %v1241_v13 = vpop.permute.xlu0 %1240 }
 0x48a   :  { %1276 = vrot.lane.b32.xlu0 %v1241_v13, %s6800_s16  ;;  %v1243_v18 = vsel %vm589_vm5, %v7416_v9, %v1241_v13  ;;  %vm1183_vm5 = vcmask 449536  }
 0x48b   :  { %1280 = vrot.lane.b32.xlu1 %v1247_v7, %s6800_s16 }
 0x48d   :  { %v1257_v14 = vpop.permute.xlu1 %1256  ;;  %v1144_v15 = vpop.permute.xlu0 %1143 }
 0x48e   :  { %1181 = vrot.lane.b32.xlu0 %v7330_v38, %s6805_s17  ;;  %v1147_v16 = vsel %vm1145_vm3, %v1142_v0, %v1144_v15 }
 0x48f   :  { %1268 = vrot.lane.b32.xlu1 %v1237_v12, %s6800_s16  ;;  %5625 = vmatprep.subr.bf16.mxu1 %v1147_v16 }
 0x491   :  { %v1231_v17 = vpop.permute.xlu1 %1230  ;;  %v1106_v1 = vpop.permute.xlu0 %1105 }
 0x492   :  { %5657 = vmatprep.subr.bf16.mxu0 %v1231_v17  ;;  %1260 = vrot.lane.b32.xlu0 %v7351_v45, %s6800_s16 }
 0x493   :  { %5658 = vmatpush3.bf16.msra.mxu0 %v7347_v44  ;;  %1274 = vrot.lane.b32.xlu1 %v1243_v18, %s6800_s16 }
 0x495   :  { %v1104_v19 = vpop.permute.xlu1 %1103  ;;  %v1249_v20 = vpop.permute.xlu0 %1248 }
 0x496   :  { %v1109_v21 = vsel %vm1107_vm4, %v1104_v19, %v1106_v1  ;;  %1177 = vrot.lane.b32.xlu0 %v7316_v30, %s6805_s17 }
 0x497   :  { %1179 = vrot.lane.b32.xlu1 %v7325_v35, %s6805_s17  ;;  %5626 = vmatpush3.bf16.msra.mxu1 %v1109_v21 }
 0x499   :  { %v1229_v22 = vpop.permute.xlu1 %1228  ;;  %v1140_v23 = vpop.permute.xlu0 %1139 }
 0x49a   :  { %5659 = vmatprep.subr.bf16.mxu0 %v1229_v22  ;;  %1204 = vrot.lane.b32.xlu0 %v7357_v47, %s6804_s9  ;;  %v1252_v46 = vsel %vm601_vm1, %v1229_v22, %v1249_v20 }
 0x49b   :  { %5660 = vmatpush3.bf16.msra.mxu0 %v7339_v41  ;;  %1258 = vrot.lane.b32.xlu1 %v7339_v41, %s6800_s16 }
 0x49d   :  { %v1138_v24 = vpop.permute.xlu1 %1137  ;;  %v1102_v25 = vpop.permute.xlu0 %1101 }
 0x49e   :  { %1171 = vrot.lane.b32.xlu0 %v7325_v35, %s6793_s30  ;;  %v1146_v26 = vsel %vm1145_vm3, %v1138_v24, %v1140_v23 }
 0x49f   :  { %1175 = vrot.lane.b32.xlu1 %v7311_v27, %s6805_s17  ;;  %5627 = vmatprep.subr.bf16.mxu1 %v1146_v26  ;;  %s6808_s17 = smov 90  }
 0x4a1   :  { %v1100_v29 = vpop.permute.xlu1 %1099  ;;  %v1132_v30 = vpop.permute.xlu0 %1131 }
 0x4a2   :  { %v1108_v31 = vsel %vm1107_vm4, %v1100_v29, %v1102_v25  ;;  %1200 = vrot.lane.b32.xlu0 %v7351_v45, %s6804_s9  ;;  %v6427_v29 = vld [vmem:[%s8856_s21 + $0x3c] ss:$24 sps:$4 sm:$0xff]  }
 0x4a3   :  { %1202 = vrot.lane.b32.xlu1 %v7347_v44, %s6804_s9  ;;  %5628 = vmatpush3.bf16.msra.mxu1 %v1108_v31 }
 0x4a5   :  { %v1134_v32 = vpop.permute.xlu1 %1133  ;;  %v1191_v33 = vpop.permute.xlu0 %1190 }
 0x4a6   :  { %1169 = vrot.lane.b32.xlu0 %v7311_v27, %s6793_s30  ;;  %5629 = vmatprep.subr.bf16.mxu1 %v1134_v32 }
 0x4a7   :  { %1292 = vrot.lane.b32.xlu1 %v1257_v14, %s6800_s16  ;;  %5630 = vmatpush3.bf16.msra.mxu1 %v7325_v35 }
 0x4a8   :  { %5631 = vmatprep.subr.bf16.mxu1 %v1132_v30 }
 0x4a9   :  { %v1251_v34 = vpop.permute.xlu0 %1250  ;;  %v1221_v38 = vpop.permute.xlu1 %1220 }
 0x4aa   :  { %1288 = vrot.lane.b32.xlu0 %v1251_v34, %s6800_s16  ;;  %v1253_v40 = vsel %vm601_vm1, %v1231_v17, %v1251_v34  ;;  %vm1500_vm1 = vcmask 523264   ;;  %v6429_v34 = vld [vmem:[%s8856_s21 + $0x38] ss:$24 sps:$4 sm:$0xff]  }
 0x4ab   :  { %1198 = vrot.lane.b32.xlu1 %v7339_v41, %s6804_s9  ;;  %5632 = vmatpush3.bf16.msra.mxu1 %v7311_v27  ;;  %v6417_v41 = vld [vmem:[%s8856_s21 + $0x30] ss:$24 sps:$4 sm:$0xff]   ;;  %s6809_s9 = smov 88  }
 0x4ac   :  { %1643 = vmatprep.subr.bf16.mxu1 %v6791_v5 }
 0x4ad   :  { %v1219_v35 = vpop.permute.xlu0 %1218  ;;  %v1217_v44 = vpop.permute.xlu1 %1216 }
 0x4ae   :  { %1546 = vmatmul.mubr.bf16.vlgmr.msra.gmra.mxu1 %v6412_v36  ;;  %1284 = vrot.lane.b32.xlu0 %v1249_v20, %s6800_s16  ;;  %v1224_v49 = vsel %vm1126_vm15, %v1217_v44, %v1219_v35  ;;  %v6433_v36 = vld [vmem:[%s8856_s21 + $0x6c] ss:$24 sps:$4 sm:$0xff]   ;;  %v6441_v44 = vld [vmem:[%s8856_s21 + $0x98] ss:$24 sps:$4 sm:$0xff]  }
 0x4af   :  { %1290 = vrot.lane.b32.xlu1 %v7414_v8, %s6800_s16  ;;  %1553 = vmatprep.mubr.bf16.mxu1 %v6415_v37 }
 0x4b1   :  { %v1189_v27 = vpop.permute.xlu0 %1188  ;;  %v1263_v60 = vpop.permute.xlu1 %1262 }
 0x4b2   :  { %1351 = vperm.xlu0 %6310, %v1337_v39   ;;  %v6430_v39 = vld [vmem:[%s8856_s21 + $0x10] ss:$24 sps:$4 sm:$0xff]  }
 0x4b3   :  { %1286 = vrot.lane.b32.xlu1 %v1253_v40, %s6800_s16  ;;  %v6435_v40 = vld [vmem:[%s8856_s21 + $0x68] ss:$24 sps:$4 sm:$0xff]  }
 0x4b5   :  { %v1223_v45 = vpop.permute.xlu0 %1222 }
 0x4b6   :  { %1554 = vmatmul.mubr.bf16.gmra.mxu1 %v6417_v41  ;;  %1361 = vperm.xlu0 %6310, %v1339_v42   ;;  %v1225_v47 = vsel %vm1126_vm15, %v1221_v38, %v1223_v45  ;;  %v6439_v41 = vld [vmem:[%s8856_s21 + $0x9c] ss:$24 sps:$4 sm:$0xff]   ;;  %v6438_v42 = vld [vmem:[%s8856_s21 + $0x40] ss:$24 sps:$4 sm:$0xff]   ;;  %v6444_v45 = vld [vmem:[%s8856_s21 + $0x70] ss:$24 sps:$4 sm:$0xff]  }
 0x4b7   :  { %1282 = vrot.lane.b32.xlu1 %v1252_v46, %s6800_s16  ;;  %5661 = vmatprep.subr.bf16.mxu0 %v1225_v47  ;;  %v6445_v46 = vld [vmem:[%s8856_s21 + $0xa4] ss:$24 sps:$4 sm:$0xff]   ;;  %v6447_v47 = vld [vmem:[%s8856_s21 + $0xa0] ss:$24 sps:$4 sm:$0xff]   ;;  %s6812_s16 = smov 91  }
 0x4b8   :  { %5662 = vmatpush3.bf16.msra.mxu0 %v1191_v33  ;;  %1561 = vmatprep.mubr.bf16.mxu1 %v6418_v43  ;;  %v6442_v43 = vld [vmem:[%s8856_s21 + $0x74] ss:$24 sps:$4 sm:$0xff]  }
 0x4b9   :  { %5663 = vmatprep.subr.bf16.mxu0 %v1224_v49  ;;  %v1265_v59 = vpop.permute.xlu0 %1264  ;;  %v6449_v49 = vld [vmem:[%s8822_s19 + $0x10] sm:$0xff]  }
 0x4ba   :  { %1371 = vperm.xlu0 %6310, %v1341_v48   ;;  %v1295_v20 = vsel %vm1145_vm3, %v1263_v60, %v1265_v59  ;;  %v6448_v48 = vld [vmem:[%s8822_s19 + $0x18] sm:$0xff]  }
 0x4bb   :  { %1346 = vperm.xlu1 %6311, %v1336_v50   ;;  %v6450_v50 = vld [vmem:[%s8822_s19 + $0x8] sm:$0xff]  }
 0x4bc   :  { %5664 = vmatpush3.bf16.msra.mxu0 %v1189_v27  ;;  %v6436_v27 = vld [vmem:[%s8856_s21 + $0x44] ss:$24 sps:$4 sm:$0xff]  }
 0x4bd   :  { %5665 = vmatprep.subr.bf16.mxu0 %v7416_v9 }
 0x4be   :  { %1562 = vmatmul.mubr.bf16.gmra.mxu1 %v6420_v51  ;;  %1381 = vperm.xlu0 %6310, %v1343_v52   ;;  %v6451_v51 = vld [vmem:[%s8822_s19] sm:$0xff]   ;;  %s6806_s19 = smov 35  }
 0x4bf   :  { %1356 = vperm.xlu1 %6311, %v1338_v54   ;;  %1569 = vmatprep.mubr.bf16.mxu1 %v6421_v53 }
 0x4c3   :  { %1366 = vperm.xlu1 %6311, %v1340_v55  }
 0x4c6   :  { %1570 = vmatmul.mubr.bf16.gmra.mxu1 %v6423_v56 }
 0x4c7   :  { %1376 = vperm.xlu1 %6311, %v1342_v58   ;;  %5413 = vmatprep.mubr.msk.bf16.mxu1 %vm1500_vm1, %v6432_v57 }
 0x4ec   :  { %v1279_v61 = vpop.permute.xlu0 %1278 }
 0x4f0   :  { %v1267_v62 = vpop.permute.xlu1 %1266 }
 0x4f8   :  { %v1273_v63 = vpop.permute.xlu0 %1272 }
 0x4f9   :  { %v1271_v0 = vpop.permute.xlu1 %1270 }
 0x4fa   :  { %v1296_v13 = vsel %vm1145_vm3, %v1271_v0, %v1273_v63 }
 0x4fc   :  { %v1277_v2 = vpop.permute.xlu0 %1276 }
 0x4fd   :  { %v1281_v3 = vpop.permute.xlu1 %1280 }
 0x4fe   :  { %1644 = vmatpush1.bf16.msra.mxu1 %v1281_v3 }
 0x4ff   :  { %1645 = vmatprep.subr.bf16.mxu1 %v6791_v5 }
 0x500   :  { %v1182_v6 = vpop.permute.xlu0 %1181 }
 0x501   :  { %v1269_v7 = vpop.permute.xlu1 %1268 }
 0x502   :  { %1646 = vmatpush1.bf16.msra.mxu1 %v1279_v61 }
 0x503   :  { %1647 = vmatprep.subr.bf16.mxu1 %v6791_v5 }
 0x504   :  { %v1261_v8 = vpop.permute.xlu0 %1260 }
 0x505   :  { %v1275_v9 = vpop.permute.xlu1 %1274 }
 0x506   :  { %v1297_v10 = vsel %vm1145_vm3, %v1275_v9, %v1277_v2 }
 0x507   :  { %1648 = vmatpush1.bf16.msra.mxu1 %v1297_v10 }
 0x508   :  { %v1178_v11 = vpop.permute.xlu0 %1177  ;;  %1649 = vmatprep.subr.bf16.mxu1 %v6791_v5 }
 0x509   :  { %v1180_v12 = vpop.permute.xlu1 %1179 }
 0x50a   :  { %v1185_v14 = vsel %vm1183_vm5, %v1180_v12, %v1182_v6 }
 0x50b   :  { %5666 = vmatpush3.bf16.msra.mxu0 %v1185_v14  ;;  %1650 = vmatpush1.bf16.msra.mxu1 %v1296_v13 }
 0x50c   :  { %5667 = vmatprep.subr.bf16.mxu0 %v7411_v4  ;;  %v1205_v15 = vpop.permute.xlu0 %1204  ;;  %1651 = vmatprep.subr.bf16.mxu1 %v6791_v5 }
 0x50d   :  { %v1259_v16 = vpop.permute.xlu1 %1258 }
 0x50e   :  { %v1294_v23 = vsel %vm1145_vm3, %v1259_v16, %v1261_v8 }
 0x50f   :  { %1652 = vmatpush1.bf16.msra.mxu1 %v1269_v7 }
 0x510   :  { %1653 = vmatprep.subr.bf16.mxu1 %v6791_v5  ;;  %v1172_v17 = vpop.permute.xlu0 %1171 }
 0x511   :  { %v1176_v1 = vpop.permute.xlu1 %1175 }
 0x512   :  { %v1184_v18 = vsel %vm1183_vm5, %v1176_v1, %v1178_v11 }
 0x513   :  { %5668 = vmatpush3.bf16.msra.mxu0 %v1184_v18  ;;  %1654 = vmatpush1.bf16.msra.mxu1 %v1267_v62 }
 0x514   :  { %1655 = vmatprep.subr.bf16.mxu1 %v6791_v5  ;;  %v1201_v21 = vpop.permute.xlu0 %1200 }
 0x515   :  { %v1203_v19 = vpop.permute.xlu1 %1202 }
 0x516   :  { %v1207_v4 = vsel %vm1107_vm4, %v1203_v19, %v1205_v15 }
 0x517   :  { %5669 = vmatprep.subr.bf16.mxu0 %v1207_v4  ;;  %1656 = vmatpush1.bf16.msra.mxu1 %v1295_v20 }
 0x518   :  { %5670 = vmatpush3.bf16.msra.mxu0 %v1172_v17  ;;  %1657 = vmatprep.subr.bf16.mxu1 %v6791_v5  ;;  %v1170_v24 = vpop.permute.xlu0 %1169 }
 0x519   :  { %v1293_v22 = vpop.permute.xlu1 %1292 }
 0x51b   :  { %1658 = vmatpush1.bf16.msra.mxu1 %v1294_v23 }
 0x51c   :  { %1667 = vmatprep.subr.bf16.mxu1 %v6791_v5  ;;  %v1289_v31 = vpop.permute.xlu0 %1288 }
 0x51d   :  { %v1199_v25 = vpop.permute.xlu1 %1198 }
 0x51e   :  { %v1206_v26 = vsel %vm1107_vm4, %v1199_v25, %v1201_v21 }
 0x51f   :  { %5671 = vmatprep.subr.bf16.mxu0 %v1206_v26  ;;  %1668 = vmatpush2.bf16.msra.mxu1 %v1293_v22 }
 0x520   :  { %5672 = vmatpush3.bf16.msra.mxu0 %v1170_v24  ;;  %1669 = vmatprep.subr.bf16.mxu1 %v6791_v5  ;;  %v1285_v37 = vpop.permute.xlu0 %1284 }
 0x521   :  { %v1291_v30 = vpop.permute.xlu1 %1290  ;;  %6175 = vmatprep.subr.bf16.mxu0 %v6448_v48 }
 0x523   :  { %1611 = vmatmul.mubr.bf16.vlgmr.msra.gmra.mxu0 %v6424_v28  ;;  %1670 = vmatpush2.bf16.msra.mxu1 %v1291_v30 }
 0x524   :  { %1671 = vmatprep.subr.bf16.mxu1 %v6791_v5  ;;  %1618 = vmatprep.mubr.bf16.mxu0 %v6427_v29 }
 0x525   :  { %v1287_v32 = vpop.permute.xlu1 %1286  ;;  %6176 = vmatpush3.bf16.msra.mxu0 %v6448_v48 }
 0x526   :  { %v1299_v33 = vsel %vm1145_vm3, %v1287_v32, %v1289_v31  ;;  %6177 = vmatprep.subr.bf16.mxu0 %v6449_v49 }
 0x527   :  { %1672 = vmatpush2.bf16.msra.mxu1 %v1299_v33 }
 0x528   :  { %1673 = vmatprep.subr.bf16.mxu1 %v6791_v5 }
 0x529   :  { %v1283_v35 = vpop.permute.xlu1 %1282  ;;  %6178 = vmatpush3.bf16.msra.mxu0 %v6449_v49 }
 0x52a   :  { %v1298_v38 = vsel %vm1145_vm3, %v1283_v35, %v1285_v37  ;;  %6179 = vmatprep.subr.bf16.mxu0 %v6450_v50 }
 0x52b   :  { %1619 = vmatmul.mubr.bf16.gmra.mxu0 %v6429_v34  ;;  %1674 = vmatpush2.bf16.msra.mxu1 %v1298_v38 }
 0x52c   :  { %1626 = vmatprep.mubr.bf16.mxu0 %v6433_v36 }
 0x52d   :  { %6180 = vmatpush3.bf16.msra.mxu0 %v6450_v50  ;;  %v1352_v18 = vpop.permute.xlu0 %1351 }
 0x52e   :  { %1676 = vmatmul.mubr.bf16.vlgmr.msra.gmra.mxu1 %v6430_v39  ;;  %6181 = vmatprep.subr.bf16.mxu0 %v6451_v51 }
 0x52f   :  { %5414 = vmatprep.mubr.msk.bf16.mxu1 %vm1500_vm1, %v6436_v27 }
 0x531   :  { %6182 = vmatpush3.bf16.msra.mxu0 %v6451_v51  ;;  %v1362_v27 = vpop.permute.xlu0 %1361 }
 0x533   :  { %1627 = vmatmul.mubr.bf16.gmra.mxu0 %v6435_v40 }
 0x534   :  { %1634 = vmatprep.mubr.bf16.mxu0 %v6439_v41 }
 0x536   :  { %1684 = vmatmul.mubr.bf16.gmra.mxu1 %v6438_v42  ;;  %v1347_v14 = vpop.permute.xlu1 %1346 }
 0x537   :  { %5415 = vmatprep.mubr.msk.bf16.mxu1 %vm1500_vm1, %v6442_v43 }
 0x53a   :  { %v1357_v33 = vpop.permute.xlu1 %1356 }
 0x53b   :  { %1635 = vmatmul.mubr.bf16.gmra.mxu0 %v6441_v44 }
 0x53e   :  { %1692 = vmatmul.mubr.bf16.gmra.mxu1 %v6444_v45 }
 0x53f   :  { %5416 = vmatprep.mubr.msk.bf16.mxu1 %vm1500_vm1, %v6445_v46 }
 0x546   :  { %1700 = vmatmul.mubr.bf16.gmra.mxu1 %v6447_v47 }
 0x56e   :  { %v5633_v52 = vpop.f32.mrf.mxu1 }
 0x570   :  { %v5634_v53 = vpop.f32.mrf.mxu1 }
 0x571   :  { %v5635_v9 = vadd.f32 %v5634_v53, %v5633_v52 }
 0x572   :  { %v5636_v54 = vpop.f32.mrf.mxu1 }
 0x573   :  { %v1548_v16 = vadd.f32 %v5635_v9, %v1347_v14 }
 0x574   :  { %v5637_v55 = vpop.f32.mrf.mxu1 }
 0x575   :  { %v5638_v11 = vadd.f32 %v5637_v55, %v5636_v54  ;;  %v1367_v55 = vpop.permute.xlu1 %1366 }
 0x576   :  { %v5639_v56 = vpop.f32.mrf.mxu1 }
 0x577   :  { %v1551_v20 = vadd.f32 %v5638_v11, %v1352_v18 }
 0x578   :  { %v5640_v57 = vpop.f32.mrf.mxu1 }
 0x579   :  { %v5641_v23 = vadd.f32 %v5640_v57, %v5639_v56 }
 0x57a   :  { %v5642_v58 = vpop.f32.mrf.mxu1 }
 0x57b   :  { %v1556_v36 = vadd.f32 %v5641_v23, %v1357_v33 }
 0x57c   :  { %v5643_v59 = vpop.f32.mrf.mxu1 }
 0x57d   :  { %v5644_v29 = vadd.f32 %v5643_v59, %v5642_v58 }
 0x57e   :  { %v5645_v60 = vpop.f32.mrf.mxu1 }
 0x57f   :  { %v1559_v41 = vadd.f32 %v5644_v29, %v1362_v27 }
 0x580   :  { %v5646_v61 = vpop.f32.mrf.mxu1 }
 0x581   :  { %v5647_v46 = vadd.f32 %v5646_v61, %v5645_v60 }
 0x582   :  { %v5648_v62 = vpop.f32.mrf.mxu1 }
 0x583   :  { %v1564_v57 = vadd.f32 %v5647_v46, %v1367_v55  ;;  %v6454_v46 = vld [vmem:[%s8857_s4 + $0x4] ss:$24 sps:$4 sm:$0xff]  }
 0x584   :  { %v5649_v63 = vpop.f32.mrf.mxu1  ;;  %2201 = vmatprep.mubr.bf16.mxu1 %v6454_v46  ;;  %v6470_v46 = vld [vmem:[%s8857_s4 + $0x3c] ss:$24 sps:$4 sm:$0xff]  }
 0x585   :  { %v5650_v51 = vadd.f32 %v5649_v63, %v5648_v62 }
 0x586   :  { %v7600_v0 = vpop.f32.mrf.mxu1 }
 0x588   :  { %v7602_v3 = vpop.f32.mrf.mxu1 }
 0x589   :  { %v5653_v62 = vadd.f32 %v7602_v3, %v7600_v0 }
 0x58a   :  { %v7604_v8 = vpop.f32.mrf.mxu1 }
 0x58c   :  { %v7606_v15 = vpop.f32.mrf.mxu1 }
 0x5e3   :  { %v5673_v2 = vpop.f32.mrf.mxu0 }
 0x5e5   :  { %v5674_v6 = vpop.f32.mrf.mxu0 }
 0x5e6   :  { %v5675_v12 = vadd.f32 %v5674_v6, %v5673_v2 }
 0x5e7   :  { %v5676_v7 = vpop.f32.mrf.mxu0 }
 0x5e8   :  { %v1613_v4 = vadd.f32 %v5675_v12, %v1548_v16 }
 0x5e9   :  { %v5677_v10 = vpop.f32.mrf.mxu0 }
 0x5ea   :  { %v5678_v17 = vadd.f32 %v5677_v10, %v5676_v7  ;;  %v1372_v7 = vpop.permute.xlu0 %1371 }
 0x5eb   :  { %v5679_v13 = vpop.f32.mrf.mxu0  ;;  %v1567_v60 = vadd.f32 %v5650_v51, %v1372_v7 }
 0x5ec   :  { %v1616_v26 = vadd.f32 %v5678_v17, %v1551_v20  ;;  %v5656_v17 = vadd.f32 %v7606_v15, %v7604_v8 }
 0x5ed   :  { %v5680_v1 = vpop.f32.mrf.mxu0 }
 0x5ee   :  { %v1677_v19 = vpop.f32.mrf.mxu1  ;;  %v5681_v30 = vadd.f32 %v5680_v1, %v5679_v13 }
 0x5ef   :  { %v5682_v21 = vpop.f32.mrf.mxu0  ;;  %v1678_v24 = vadd.f32 %v1677_v19, %v1613_v4  ;;  %v1377_v19 = vpop.permute.xlu1 %1376 }
 0x5f0   :  { %v1679_v22 = vpop.f32.mrf.mxu1  ;;  %v1621_v43 = vadd.f32 %v5681_v30, %v1556_v36  ;;  %v1572_v4 = vadd.f32 %v5653_v62, %v1377_v19  ;;  %v1997_v19 = vld [vmem:[%s8814_s11 + $0x20] sm:$0xff] }
 0x5f1   :  { %v5683_v25 = vpop.f32.mrf.mxu0  ;;  %v1708_v37 = vmax.f32 %v1678_v24, 0.0  ;;  %v1382_v24 = vpop.permute.xlu0 %1381 }
 0x5f2   :  { %v1680_v28 = vpop.f32.mrf.mxu1  ;;  %v5684_v35 = vadd.f32 %v5683_v25, %v5682_v21  ;;  %v1575_v0 = vadd.f32 %v5656_v17, %v1382_v24  ;;  %v1995_v17 = vld [vmem:[%s8814_s11 + $0x10] sm:$0xff]  ;;  %v6458_v24 = vld [vmem:[%s8857_s4 + $0x64] ss:$24 sps:$4 sm:$0xff]  }
 0x5f3   :  { %v1681_v31 = vadd.f32 %v1680_v28, %v1616_v26  ;;  %v5685_v32 = vpop.f32.mrf.mxu0 }
 0x5f4   :  { %v1682_v34 = vpop.f32.mrf.mxu1  ;;  %v1624_v49 = vadd.f32 %v5684_v35, %v1559_v41 }
 0x5f5   :  { %v1709_v38 = vmax.f32 %v1681_v31, 0.0  ;;  %v5686_v39 = vpop.f32.mrf.mxu0 }
 0x5f6   :  { %v1685_v40 = vpop.f32.mrf.mxu1  ;;  %v5687_v52 = vadd.f32 %v5686_v39, %v5685_v32 }
 0x5f7   :  { %v1716_v42 = vpack.c.bf16 %v1709_v38, %v1708_v37  ;;  %v5688_v44 = vpop.f32.mrf.mxu0  ;;  %v1686_v47 = vadd.f32 %v1685_v40, %v1621_v43 }
 0x5f8   :  { %v1687_v45 = vpop.f32.mrf.mxu1  ;;  %v1629_v10 = vadd.f32 %v5687_v52, %v1564_v57 }
 0x5f9   :  { %v5689_v48 = vpop.f32.mrf.mxu0  ;;  %6183 = vmatprep.mubr.msk.bf16.mxu0 %vm1500_vm1, %v1716_v42  ;;  %v1710_v58 = vmax.f32 %v1686_v47, 0.0 }
 0x5fa   :  { %v1688_v50 = vpop.f32.mrf.mxu1  ;;  %v5690_v59 = vadd.f32 %v5689_v48, %v5688_v44 }
 0x5fb   :  { %v1689_v53 = vadd.f32 %v1688_v50, %v1624_v49  ;;  %v5691_v54 = vpop.f32.mrf.mxu0 }
 0x5fc   :  { %v1690_v56 = vpop.f32.mrf.mxu1  ;;  %v1632_v13 = vadd.f32 %v5690_v59, %v1567_v60 }
 0x5fd   :  { %v1711_v2 = vmax.f32 %v1689_v53, 0.0  ;;  %v5692_v6 = vpop.f32.mrf.mxu0 }
 0x5fe   :  { %v1693_v9 = vpop.f32.mrf.mxu1  ;;  %v5693_v1 = vadd.f32 %v5692_v6, %v5691_v54  ;;  %v6466_v6 = vld [vmem:[%s8857_s4 + $0xc] ss:$24 sps:$4 sm:$0xff]  }
 0x5ff   :  { %v1717_v61 = vpack.c.bf16 %v1711_v2, %v1710_v58  ;;  %v5694_v11 = vpop.f32.mrf.mxu0  ;;  %v1694_v63 = vadd.f32 %v1693_v9, %v1629_v10 }
 0x600   :  { %v1695_v12 = vpop.f32.mrf.mxu1  ;;  %v1637_v26 = vadd.f32 %v5693_v1, %v1572_v4  ;;  %v1996_v1 = vld [vmem:[%s8814_s11 + $0x18] sm:$0xff]  ;;  %v1998_v4 = vld [vmem:[%s8814_s11 + $0x28] sm:$0xff] }
 0x601   :  { %6184 = vmatmul.mubr.msk.bf16.vlgmr.msra.gmra.mxu0 %vm1500_vm1, %v1717_v61  ;;  %v5695_v14 = vpop.f32.mrf.mxu0  ;;  %v1712_v21 = vmax.f32 %v1694_v63, 0.0  ;;  %v1993_v63 = vld [vmem:[%s8814_s11] sm:$0xff] }
 0x602   :  { %v1696_v16 = vpop.f32.mrf.mxu1  ;;  %v5696_v22 = vadd.f32 %v5695_v14, %v5694_v11  ;;  %v1994_v14 = vld [vmem:[%s8814_s11 + $0x8] sm:$0xff] }
 0x603   :  { %v1697_v18 = vadd.f32 %v1696_v16, %v1632_v13 }
 0x604   :  { %v1698_v20 = vpop.f32.mrf.mxu1  ;;  %v1640_v30 = vadd.f32 %v5696_v22, %v1575_v0  ;;  %v2000_v22 = vld [vmem:[%s8814_s11 + $0x38] sm:$0xff]  ;;  %v6461_v0 = vld [vmem:[%s8857_s4 + $0x94] ss:$24 sps:$4 sm:$0xff]  }
 0x605   :  { %v1713_v23 = vmax.f32 %v1697_v18, 0.0  ;;  %v6452_v18 = vld [vmem:[%s8857_s4] ss:$24 sps:$4 sm:$0xff]   ;;  %v6455_v20 = vld [vmem:[%s8857_s4 + $0x34] ss:$24 sps:$4 sm:$0xff]  }
 0x606   :  { %v1701_v25 = vpop.f32.mrf.mxu1 }
 0x607   :  { %v1718_v3 = vpack.c.bf16 %v1713_v23, %v1712_v21  ;;  %v1702_v29 = vadd.f32 %v1701_v25, %v1637_v26  ;;  %v1999_v21 = vld [vmem:[%s8814_s11 + $0x30] sm:$0xff]  ;;  %v6460_v25 = vld [vmem:[%s8857_s4 + $0x60] ss:$24 sps:$4 sm:$0xff]   ;;  %s6819_s11 = smov 105  }
 0x608   :  { %v1703_v28 = vpop.f32.mrf.mxu1  ;;  %v6457_v23 = vld [vmem:[%s8857_s4 + $0x30] ss:$24 sps:$4 sm:$0xff]   ;;  %v6469_v26 = vld [vmem:[%s8857_s4 + $0x14] ss:$24 sps:$4 sm:$0xff]  }
 0x609   :  { %6187 = vmatprep.mubr.msk.bf16.mxu0 %vm1500_vm1, %v1718_v3  ;;  %v1714_v32 = vmax.f32 %v1702_v29, 0.0  ;;  %v6463_v3 = vld [vmem:[%s8857_s4 + $0x90] ss:$24 sps:$4 sm:$0xff]  }
 0x60a   :  { %v1704_v31 = vpop.f32.mrf.mxu1 }
 0x60b   :  { %v1705_v8 = vadd.f32 %v1704_v31, %v1640_v30 }
 0x60c   :  { %v1706_v15 = vpop.f32.mrf.mxu1 }
 0x60d   :  { %v1715_v33 = vmax.f32 %v1705_v8, 0.0 }
 0x60f   :  { %v1719_v34 = vpack.c.bf16 %v1715_v33, %v1714_v32 }
 0x611   :  { %6188 = vmatmul.mubr.msk.bf16.gmra.mxu0 %vm1500_vm1, %v1719_v34 }
 0x612   :  { %2266 = vmatprep.mubr.bf16.mxu0 %v6466_v6  ;;  %v6488_v6 = vld [vmem:[%s8823_s20 + $0x8] sm:$0xff]  }
 0x6c1   :  { %v6185_v36 = vpop.f32.mrf.mxu0 }
 0x6c3   :  { %v1798_v37 = vpop.f32.mrf.mxu0 }
 0x6c5   :  { %v6186_v35 = vpop.f32.mrf.mxu0 }
 0x6c6   :  { %v7626_v44 = vpack.c.bf16 %v6186_v35, %v6185_v36 }
 0x6c7   :  { %v1801_v38 = vpop.f32.mrf.mxu0 }
 0x6c8   :  { %v7632_v45 = vpack.c.bf16 %v1801_v38, %v1798_v37 }
 0x6d1   :  { %v6189_v39 = vpop.f32.mrf.mxu0 }
 0x6d3   :  { %v1814_v27 = vpop.f32.mrf.mxu0 }
 0x6d5   :  { %v6190_v40 = vpop.f32.mrf.mxu0 }
 0x6d6   :  { %v7616_v41 = vpack.c.bf16 %v6190_v40, %v6189_v39 }
 0x6d7   :  { %v1817_v42 = vpop.f32.mrf.mxu0 }
 0x6d8   :  { %v7618_v43 = vpack.c.bf16 %v1817_v42, %v1814_v27  ;;  %1927 = vrot.lane.b32.xlu1 %v7616_v41, %s6806_s19 }
 0x6da   :  { %1925 = vrot.lane.b32.xlu0 %v7618_v43, %s6806_s19  ;;  %s6823_s19 = smov 12  }
 0x6dc   :  { %1905 = vrot.lane.b32.xlu1 %v7616_v41, %s6786_s23 }
 0x6de   :  { %1903 = vrot.lane.b32.xlu0 %v7618_v43, %s6786_s23 }
 0x6e0   :  { %1923 = vrot.lane.b32.xlu1 %v7616_v41, %s6807_s25 }
 0x6e2   :  { %1849 = vrot.lane.b32.xlu0 %v7626_v44, %s6808_s17 }
 0x6e4   :  { %1873 = vrot.lane.b32.xlu1 %v7626_v44, %s6809_s9 }
 0x6e6   :  { %1921 = vrot.lane.b32.xlu0 %v7618_v43, %s6807_s25  ;;  %s6816_s25 = smov 106  }
 0x6e8   :  { %1871 = vrot.lane.b32.xlu1 %v7632_v45, %s6809_s9  ;;  %s6818_s9 = smov 18  }
 0x6ea   :  { %1847 = vrot.lane.b32.xlu0 %v7632_v45, %s6808_s17 }
 0x6ec   :  { %1931 = vrot.lane.b32.xlu1 %v7616_v41, %s6810_s18 }
 0x6ee   :  { %1867 = vrot.lane.b32.xlu0 %v7626_v44, %s6795_s26 }
 0x6f0   :  { %1843 = vrot.lane.b32.xlu1 %v7626_v44, %s6786_s23 }
 0x6f2   :  { %1841 = vrot.lane.b32.xlu0 %v7632_v45, %s6786_s23 }
 0x6f4   :  { %1865 = vrot.lane.b32.xlu1 %v7632_v45, %s6795_s26 }
 0x6f6   :  { %1929 = vrot.lane.b32.xlu0 %v7618_v43, %s6810_s18  ;;  %s6820_s18 = smov 107  }
 0x6f8   :  { %1917 = vrot.lane.b32.xlu1 %v7616_v41, %s6787_s27 }
 0x6fa   :  { %1861 = vrot.lane.b32.xlu0 %v7626_v44, %s6811_s6 }
 0x6fc   :  { %1837 = vrot.lane.b32.xlu1 %v7626_v44, %s6812_s16 }
 0x6fe   :  { %1915 = vrot.lane.b32.xlu0 %v7618_v43, %s6787_s27 }
 0x700   :  { %1859 = vrot.lane.b32.xlu1 %v7632_v45, %s6811_s6 }
 0x702   :  { %1835 = vrot.lane.b32.xlu0 %v7632_v45, %s6812_s16 }
 0x704   :  { %1855 = vrot.lane.b32.xlu1 %v7626_v44, %s6787_s27 }
 0x706   :  { %1853 = vrot.lane.b32.xlu0 %v7632_v45, %s6787_s27 }
 0x74a   :  { %v1928_v47 = vpop.permute.xlu1 %1927 }
 0x74b   :  { %1947 = vrot.lane.b32.xlu1 %v1928_v47, %s6811_s6 }
 0x74c   :  { %v1926_v48 = vpop.permute.xlu0 %1925 }
 0x74d   :  { %1945 = vrot.lane.b32.xlu0 %v1926_v48, %s6811_s6 }
 0x74e   :  { %v7669_v49 = vpop.permute.xlu1 %1905 }
 0x74f   :  { %1943 = vrot.lane.b32.xlu1 %v7669_v49, %s6811_s6 }
 0x750   :  { %v7673_v50 = vpop.permute.xlu0 %1903 }
 0x751   :  { %1911 = vrot.lane.b32.xlu0 %v7616_v41, %s6808_s17 }
 0x752   :  { %v1924_v51 = vpop.permute.xlu1 %1923 }
 0x753   :  { %1939 = vrot.lane.b32.xlu1 %v1924_v51, %s6811_s6  ;;  %v6472_v51 = vld [vmem:[%s8857_s4 + $0x38] ss:$24 sps:$4 sm:$0xff]  }
 0x754   :  { %v1850_v52 = vpop.permute.xlu0 %1849 }
 0x755   :  { %1941 = vrot.lane.b32.xlu0 %v7673_v50, %s6811_s6 }
 0x756   :  { %v1874_v53 = vpop.permute.xlu1 %1873 }
 0x757   :  { %1891 = vrot.lane.b32.xlu1 %v7626_v44, %s6792_s7  ;;  %5705 = vmatprep.subr.bf16.mxu1 %v1874_v53  ;;  %v6475_v53 = vld [vmem:[%s8857_s4 + $0x40] ss:$24 sps:$4 sm:$0xff]  }
 0x758   :  { %5706 = vmatpush3.bf16.msra.mxu1 %v1850_v52  ;;  %v1922_v54 = vpop.permute.xlu0 %1921  ;;  %v6476_v52 = vld [vmem:[%s8857_s4 + $0x6c] ss:$24 sps:$4 sm:$0xff]  }
 0x759   :  { %1889 = vrot.lane.b32.xlu0 %v7632_v45, %s6792_s7 }
 0x75a   :  { %v1872_v55 = vpop.permute.xlu1 %1871 }
 0x75b   :  { %1909 = vrot.lane.b32.xlu1 %v7618_v43, %s6808_s17  ;;  %5707 = vmatprep.subr.bf16.mxu1 %v1872_v55  ;;  %v6478_v55 = vld [vmem:[%s8857_s4 + $0x68] ss:$24 sps:$4 sm:$0xff]   ;;  %s6817_s17 = smov 104  }
 0x75c   :  { %v1848_v56 = vpop.permute.xlu0 %1847 }
 0x75d   :  { %1937 = vrot.lane.b32.xlu0 %v1922_v54, %s6811_s6  ;;  %5708 = vmatpush3.bf16.msra.mxu1 %v1848_v56  ;;  %v6479_v54 = vld [vmem:[%s8857_s4 + $0x74] ss:$24 sps:$4 sm:$0xff]  }
 0x75e   :  { %v1932_v57 = vpop.permute.xlu1 %1931  ;;  %v6482_v56 = vld [vmem:[%s8857_s4 + $0x9c] ss:$24 sps:$4 sm:$0xff]  }
 0x75f   :  { %1935 = vrot.lane.b32.xlu1 %v7616_v41, %s6811_s6 }
 0x760   :  { %v1868_v58 = vpop.permute.xlu0 %1867 }
 0x761   :  { %1885 = vrot.lane.b32.xlu0 %v7626_v44, %s6813_s10  ;;  %5709 = vmatprep.subr.bf16.mxu1 %v1868_v58  ;;  %v6485_v58 = vld [vmem:[%s8857_s4 + $0xa4] ss:$24 sps:$4 sm:$0xff]  }
 0x762   :  { %v1844_v59 = vpop.permute.xlu1 %1843 }
 0x763   :  { %1933 = vrot.lane.b32.xlu1 %v7618_v43, %s6811_s6  ;;  %5710 = vmatpush3.bf16.msra.mxu1 %v1844_v59  ;;  %v6484_v59 = vld [vmem:[%s8857_s4 + $0x98] ss:$24 sps:$4 sm:$0xff]  }
 0x764   :  { %v1842_v2 = vpop.permute.xlu0 %1841 }
 0x765   :  { %1883 = vrot.lane.b32.xlu0 %v7632_v45, %s6813_s10 }
 0x766   :  { %v1866_v7 = vpop.permute.xlu1 %1865 }
 0x767   :  { %1955 = vrot.lane.b32.xlu1 %v1932_v57, %s6811_s6  ;;  %5711 = vmatprep.subr.bf16.mxu1 %v1866_v7  ;;  %v6481_v57 = vld [vmem:[%s8857_s4 + $0x70] ss:$24 sps:$4 sm:$0xff]   ;;  %v6489_v7 = vld [vmem:[%s8823_s20] sm:$0xff]   ;;  %s6814_s20 = smov 19  }
 0x768   :  { %5712 = vmatpush3.bf16.msra.mxu1 %v1842_v2  ;;  %v1930_v9 = vpop.permute.xlu0 %1929  ;;  %v6487_v2 = vld [vmem:[%s8857_s4 + $0xa0] ss:$24 sps:$4 sm:$0xff]  }
 0x769   :  { %1899 = vrot.lane.b32.xlu0 %v7616_v41, %s6812_s16 }
 0x76a   :  { %v1918_v60 = vpop.permute.xlu1 %1917 }
 0x76b   :  { %5745 = vmatprep.subr.bf16.mxu0 %v1918_v60  ;;  %1879 = vrot.lane.b32.xlu1 %v7626_v44, %s6793_s30 }
 0x76c   :  { %5746 = vmatpush3.bf16.msra.mxu0 %v7616_v41  ;;  %v1862_v61 = vpop.permute.xlu0 %1861 }
 0x76d   :  { %1953 = vrot.lane.b32.xlu0 %v1930_v9, %s6811_s6  ;;  %5713 = vmatprep.subr.bf16.mxu1 %v1862_v61 }
 0x76e   :  { %v1838_v10 = vpop.permute.xlu1 %1837 }
 0x76f   :  { %1897 = vrot.lane.b32.xlu1 %v7618_v43, %s6812_s16  ;;  %5714 = vmatpush3.bf16.msra.mxu1 %v1838_v10  ;;  %s8859_s16 = sld [smem:[#allocation21_spill]] }
 0x770   :  { %v1916_v11 = vpop.permute.xlu0 %1915 }
 0x771   :  { %1877 = vrot.lane.b32.xlu0 %v7632_v45, %s6793_s30  ;;  %5747 = vmatprep.subr.bf16.mxu0 %v1916_v11 }
 0x772   :  { %v1860_v12 = vpop.permute.xlu1 %1859  ;;  %5748 = vmatpush3.bf16.msra.mxu0 %v7618_v43 }
 0x773   :  { %1951 = vrot.lane.b32.xlu1 %v1918_v60, %s6811_s6  ;;  %5715 = vmatprep.subr.bf16.mxu1 %v1860_v12 }
 0x774   :  { %v1836_v62 = vpop.permute.xlu0 %1835 }
 0x775   :  { %1949 = vrot.lane.b32.xlu0 %v1916_v11, %s6811_s6  ;;  %5716 = vmatpush3.bf16.msra.mxu1 %v1836_v62  ;;  %s6821_s6 = smov 103  }
 0x776   :  { %v1856_v13 = vpop.permute.xlu1 %1855 }
 0x777   :  { %2003 = vperm.xlu1 %6311, %v1993_v63   ;;  %5717 = vmatprep.subr.bf16.mxu1 %v1856_v13 }
 0x778   :  { %v1854_v16 = vpop.permute.xlu0 %1853 }
 0x779   :  { %2008 = vperm.xlu0 %6310, %v1994_v14   ;;  %5718 = vmatpush3.bf16.msra.mxu1 %v7626_v44 }
 0x77a   :  { %5719 = vmatprep.subr.bf16.mxu1 %v1854_v16 }
 0x77b   :  { %2013 = vperm.xlu1 %6311, %v1995_v17  }
 0x77d   :  { %2018 = vperm.xlu0 %6310, %v1996_v1   ;;  %5720 = vmatpush3.bf16.msra.mxu1 %v7632_v45  ;;  %v6464_v45 = vld [vmem:[%s8857_s4 + $0x8] ss:$24 sps:$4 sm:$0xff]  }
 0x77e   :  { %2299 = vmatprep.subr.bf16.mxu1 %v6791_v5 }
 0x77f   :  { %2023 = vperm.xlu1 %6311, %v1997_v19  }
 0x780   :  { %2202 = vmatmul.mubr.bf16.vlgmr.msra.gmra.mxu1 %v6452_v18 }
 0x781   :  { %2028 = vperm.xlu0 %6310, %v1998_v4   ;;  %2209 = vmatprep.mubr.bf16.mxu1 %v6455_v20 }
 0x783   :  { %2033 = vperm.xlu1 %6311, %v1999_v21  }
 0x785   :  { %2038 = vperm.xlu0 %6310, %v2000_v22  }
 0x788   :  { %2210 = vmatmul.mubr.bf16.gmra.mxu1 %v6457_v23 }
 0x789   :  { %2217 = vmatprep.mubr.bf16.mxu1 %v6458_v24 }
 0x790   :  { %2218 = vmatmul.mubr.bf16.gmra.mxu1 %v6460_v25 }
 0x791   :  { %2225 = vmatprep.mubr.bf16.mxu1 %v6461_v0 }
 0x798   :  { %2226 = vmatmul.mubr.bf16.gmra.mxu1 %v6463_v3 }
 0x799   :  { %5449 = vmatprep.mubr.msk.bf16.mxu1 %vm1500_vm1, %v6469_v26 }
 0x7bd   :  { %v1948_v28 = vpop.permute.xlu1 %1947 }
 0x7be   :  { %2300 = vmatpush1.bf16.msra.mxu1 %v1948_v28 }
 0x7bf   :  { %v1946_v29 = vpop.permute.xlu0 %1945  ;;  %2301 = vmatprep.subr.bf16.mxu1 %v6791_v5 }
 0x7c1   :  { %v1944_v30 = vpop.permute.xlu1 %1943 }
 0x7c2   :  { %2302 = vmatpush1.bf16.msra.mxu1 %v1946_v29 }
 0x7c3   :  { %v1912_v31 = vpop.permute.xlu0 %1911  ;;  %2303 = vmatprep.subr.bf16.mxu1 %v6791_v5 }
 0x7c4   :  { %5749 = vmatprep.subr.bf16.mxu0 %v1912_v31 }
 0x7c5   :  { %v1940_v8 = vpop.permute.xlu1 %1939 }
 0x7c6   :  { %2304 = vmatpush1.bf16.msra.mxu1 %v1944_v30 }
 0x7c7   :  { %v1942_v15 = vpop.permute.xlu0 %1941  ;;  %2305 = vmatprep.subr.bf16.mxu1 %v6791_v5 }
 0x7c9   :  { %v1892_v32 = vpop.permute.xlu1 %1891 }
 0x7ca   :  { %5750 = vmatpush3.bf16.msra.mxu0 %v1892_v32  ;;  %2306 = vmatpush1.bf16.msra.mxu1 %v1942_v15 }
 0x7cb   :  { %v1890_v33 = vpop.permute.xlu0 %1889  ;;  %2307 = vmatprep.subr.bf16.mxu1 %v6791_v5 }
 0x7cd   :  { %v1910_v34 = vpop.permute.xlu1 %1909 }
 0x7ce   :  { %5751 = vmatprep.subr.bf16.mxu0 %v1910_v34  ;;  %2308 = vmatpush1.bf16.msra.mxu1 %v1940_v8 }
 0x7cf   :  { %5752 = vmatpush3.bf16.msra.mxu0 %v1890_v33  ;;  %v1938_v36 = vpop.permute.xlu0 %1937  ;;  %2309 = vmatprep.subr.bf16.mxu1 %v6791_v5 }
 0x7d0   :  { %5753 = vmatprep.subr.bf16.mxu0 %v7669_v49  ;;  %v6467_v49 = vld [vmem:[%s8857_s4 + $0x10] ss:$24 sps:$4 sm:$0xff]  }
 0x7d1   :  { %v1936_v37 = vpop.permute.xlu1 %1935 }
 0x7d2   :  { %2310 = vmatpush1.bf16.msra.mxu1 %v1938_v36 }
 0x7d3   :  { %v1886_v35 = vpop.permute.xlu0 %1885  ;;  %2311 = vmatprep.subr.bf16.mxu1 %v6791_v5 }
 0x7d4   :  { %5754 = vmatpush3.bf16.msra.mxu0 %v1886_v35 }
 0x7d5   :  { %v1934_v38 = vpop.permute.xlu1 %1933  ;;  %5755 = vmatprep.subr.bf16.mxu0 %v7673_v50  ;;  %v6473_v50 = vld [vmem:[%s8857_s4 + $0x44] ss:$24 sps:$4 sm:$0xff]   ;;  %s6815_s4 = smov 20  }
 0x7d6   :  { %2312 = vmatpush1.bf16.msra.mxu1 %v1936_v37 }
 0x7d7   :  { %v1884_v39 = vpop.permute.xlu0 %1883  ;;  %2313 = vmatprep.subr.bf16.mxu1 %v6791_v5 }
 0x7d8   :  { %5756 = vmatpush3.bf16.msra.mxu0 %v1884_v39 }
 0x7d9   :  { %v1956_v27 = vpop.permute.xlu1 %1955 }
 0x7da   :  { %2314 = vmatpush1.bf16.msra.mxu1 %v1934_v38 }
 0x7db   :  { %v1900_v40 = vpop.permute.xlu0 %1899  ;;  %2323 = vmatprep.subr.bf16.mxu1 %v6791_v5 }
 0x7dc   :  { %5757 = vmatprep.subr.bf16.mxu0 %v1900_v40 }
 0x7dd   :  { %v1880_v41 = vpop.permute.xlu1 %1879 }
 0x7de   :  { %5758 = vmatpush3.bf16.msra.mxu0 %v1880_v41  ;;  %2324 = vmatpush2.bf16.msra.mxu1 %v1956_v27 }
 0x7df   :  { %v1954_v42 = vpop.permute.xlu0 %1953  ;;  %2325 = vmatprep.subr.bf16.mxu1 %v6791_v5 }
 0x7e1   :  { %v1898_v43 = vpop.permute.xlu1 %1897 }
 0x7e2   :  { %5759 = vmatprep.subr.bf16.mxu0 %v1898_v43  ;;  %2326 = vmatpush2.bf16.msra.mxu1 %v1954_v42 }
 0x7e3   :  { %v1878_v44 = vpop.permute.xlu0 %1877  ;;  %2327 = vmatprep.subr.bf16.mxu1 %v6791_v5 }
 0x7e4   :  { %5760 = vmatpush3.bf16.msra.mxu0 %v1878_v44 }
 0x7e5   :  { %v1952_v47 = vpop.permute.xlu1 %1951  ;;  %6191 = vmatprep.subr.bf16.mxu0 %v6488_v6 }
 0x7e6   :  { %2328 = vmatpush2.bf16.msra.mxu1 %v1952_v47 }
 0x7e7   :  { %2267 = vmatmul.mubr.bf16.vlgmr.msra.gmra.mxu0 %v6464_v45  ;;  %2329 = vmatprep.subr.bf16.mxu1 %v6791_v5  ;;  %v1950_v48 = vpop.permute.xlu0 %1949 }
 0x7e8   :  { %2274 = vmatprep.mubr.bf16.mxu0 %v6470_v46  ;;  %6192 = vmatpush3.bf16.msra.mxu0 %v6488_v6 }
 0x7e9   :  { %6193 = vmatprep.subr.bf16.mxu0 %v6489_v7 }
 0x7ea   :  { %2330 = vmatpush2.bf16.msra.mxu1 %v1950_v48 }
 0x7ec   :  { %6194 = vmatpush3.bf16.msra.mxu0 %v6489_v7 }
 0x7ed   :  { %2332 = vmatmul.mubr.bf16.vlgmr.msra.gmra.mxu1 %v6467_v49 }
 0x7ee   :  { %5450 = vmatprep.mubr.msk.bf16.mxu1 %vm1500_vm1, %v6473_v50 }
 0x7ef   :  { %2275 = vmatmul.mubr.bf16.gmra.mxu0 %v6472_v51 }
 0x7f0   :  { %2282 = vmatprep.mubr.bf16.mxu0 %v6476_v52 }
 0x7f2   :  { %v2004_v21 = vpop.permute.xlu1 %2003 }
 0x7f4   :  { %v2009_v26 = vpop.permute.xlu0 %2008 }
 0x7f5   :  { %2340 = vmatmul.mubr.bf16.gmra.mxu1 %v6475_v53 }
 0x7f6   :  { %5451 = vmatprep.mubr.msk.bf16.mxu1 %vm1500_vm1, %v6479_v54  ;;  %v2014_v34 = vpop.permute.xlu1 %2013 }
 0x7f7   :  { %2283 = vmatmul.mubr.bf16.gmra.mxu0 %v6478_v55 }
 0x7f8   :  { %2290 = vmatprep.mubr.bf16.mxu0 %v6482_v56  ;;  %v2019_v44 = vpop.permute.xlu0 %2018 }
 0x7fa   :  { %v2024_v56 = vpop.permute.xlu1 %2023 }
 0x7fd   :  { %2348 = vmatmul.mubr.bf16.gmra.mxu1 %v6481_v57 }
 0x7fe   :  { %5452 = vmatprep.mubr.msk.bf16.mxu1 %vm1500_vm1, %v6485_v58 }
 0x7ff   :  { %2291 = vmatmul.mubr.bf16.gmra.mxu0 %v6484_v59 }
 0x805   :  { %2356 = vmatmul.mubr.bf16.gmra.mxu1 %v6487_v2 }
 0x840   :  { %v5721_v9 = vpop.f32.mrf.mxu1 }
 0x842   :  { %v5722_v60 = vpop.f32.mrf.mxu1 }
 0x843   :  { %v5723_v19 = vadd.f32 %v5722_v60, %v5721_v9 }
 0x844   :  { %v5724_v61 = vpop.f32.mrf.mxu1 }
 0x845   :  { %v2204_v23 = vadd.f32 %v5723_v19, %v2004_v21 }
 0x846   :  { %v5725_v10 = vpop.f32.mrf.mxu1 }
 0x847   :  { %v5726_v24 = vadd.f32 %v5725_v10, %v5724_v61 }
 0x848   :  { %v5727_v11 = vpop.f32.mrf.mxu1 }
 0x849   :  { %v2207_v31 = vadd.f32 %v5726_v24, %v2009_v26 }
 0x84a   :  { %v5728_v12 = vpop.f32.mrf.mxu1 }
 0x84b   :  { %v5729_v8 = vadd.f32 %v5728_v12, %v5727_v11  ;;  %v2029_v11 = vpop.permute.xlu0 %2028 }
 0x84c   :  { %v5730_v62 = vpop.f32.mrf.mxu1 }
 0x84d   :  { %v2212_v39 = vadd.f32 %v5729_v8, %v2014_v34 }
 0x84e   :  { %v5731_v63 = vpop.f32.mrf.mxu1 }
 0x84f   :  { %v5732_v27 = vadd.f32 %v5731_v63, %v5730_v62 }
 0x850   :  { %v5733_v13 = vpop.f32.mrf.mxu1 }
 0x851   :  { %v2215_v50 = vadd.f32 %v5732_v27, %v2019_v44 }
 0x852   :  { %v5734_v14 = vpop.f32.mrf.mxu1 }
 0x853   :  { %v5735_v51 = vadd.f32 %v5734_v14, %v5733_v13 }
 0x854   :  { %v5736_v16 = vpop.f32.mrf.mxu1 }
 0x855   :  { %v2220_v6 = vadd.f32 %v5735_v51, %v2024_v56 }
 0x856   :  { %v5737_v17 = vpop.f32.mrf.mxu1 }
 0x857   :  { %v5738_v7 = vadd.f32 %v5737_v17, %v5736_v16 }
 0x858   :  { %v7826_v1 = vpop.f32.mrf.mxu1 }
 0x859   :  { %v2223_v19 = vadd.f32 %v5738_v7, %v2029_v11 }
 0x85a   :  { %v7828_v18 = vpop.f32.mrf.mxu1 }
 0x85c   :  { %v7830_v20 = vpop.f32.mrf.mxu1 }
 0x85e   :  { %v7832_v0 = vpop.f32.mrf.mxu1 }
 0x8a7   :  { %v5761_v4 = vpop.f32.mrf.mxu0 }
 0x8a9   :  { %v5762_v22 = vpop.f32.mrf.mxu0 }
 0x8aa   :  { %v5763_v25 = vadd.f32 %v5762_v22, %v5761_v4  ;;  %v5741_v4 = vadd.f32 %v7828_v18, %v7826_v1  ;;  %v2039_v1 = vpop.permute.xlu0 %2038 }
 0x8ab   :  { %v5764_v3 = vpop.f32.mrf.mxu0 }
 0x8ac   :  { %v2269_v28 = vadd.f32 %v5763_v25, %v2204_v23  ;;  %v2034_v25 = vpop.permute.xlu1 %2033 }
 0x8ad   :  { %v5765_v29 = vpop.f32.mrf.mxu0  ;;  %v2333_v30 = vpop.f32.mrf.mxu1 }
 0x8ae   :  { %v5766_v15 = vadd.f32 %v5765_v29, %v5764_v3  ;;  %v2334_v36 = vadd.f32 %v2333_v30, %v2269_v28  ;;  %v2228_v28 = vadd.f32 %v5741_v4, %v2034_v25  ;;  %v5744_v29 = vadd.f32 %v7832_v0, %v7830_v20 }
 0x8af   :  { %v5767_v32 = vpop.f32.mrf.mxu0  ;;  %v2335_v33 = vpop.f32.mrf.mxu1 }
 0x8b0   :  { %v2272_v37 = vadd.f32 %v5766_v15, %v2207_v31  ;;  %v2364_v45 = vmax.f32 %v2334_v36, 0.0 }
 0x8b1   :  { %v5768_v35 = vpop.f32.mrf.mxu0  ;;  %v2336_v38 = vpop.f32.mrf.mxu1 }
 0x8b2   :  { %v5769_v40 = vadd.f32 %v5768_v35, %v5767_v32  ;;  %v2337_v41 = vadd.f32 %v2336_v38, %v2272_v37  ;;  %v2231_v37 = vadd.f32 %v5744_v29, %v2039_v1  ;;  %v2636_v29 = vld [vmem:[%s8815_s12 + $0x10] sm:$0xff]  ;;  %v2639_v1 = vld [vmem:[%s8815_s12 + $0x28] sm:$0xff] }
 0x8b3   :  { %v5770_v42 = vpop.f32.mrf.mxu0  ;;  %v2338_v43 = vpop.f32.mrf.mxu1 }
 0x8b4   :  { %v2365_v46 = vmax.f32 %v2337_v41, 0.0  ;;  %v2277_v47 = vadd.f32 %v5769_v40, %v2212_v39 }
 0x8b5   :  { %v5771_v48 = vpop.f32.mrf.mxu0  ;;  %v2341_v49 = vpop.f32.mrf.mxu1 }
 0x8b6   :  { %v2372_v52 = vpack.c.bf16 %v2365_v46, %v2364_v45  ;;  %v5772_v53 = vadd.f32 %v5771_v48, %v5770_v42  ;;  %v2342_v57 = vadd.f32 %v2341_v49, %v2277_v47 }
 0x8b7   :  { %v5773_v54 = vpop.f32.mrf.mxu0  ;;  %v2343_v55 = vpop.f32.mrf.mxu1 }
 0x8b8   :  { %6195 = vmatprep.mubr.msk.bf16.mxu0 %vm2392_vm7, %v2372_v52  ;;  %v2280_v58 = vadd.f32 %v5772_v53, %v2215_v50  ;;  %v2366_v12 = vmax.f32 %v2342_v57, 0.0  ;;  %v6492_v57 = vld [vmem:[%s8858_s0 + $0x4] ss:$24 sps:$4 sm:$0xff]  }
 0x8b9   :  { %v5774_v59 = vpop.f32.mrf.mxu0  ;;  %v2344_v2 = vpop.f32.mrf.mxu1 }
 0x8ba   :  { %v5775_v9 = vadd.f32 %v5774_v59, %v5773_v54  ;;  %v2345_v60 = vadd.f32 %v2344_v2, %v2280_v58 }
 0x8bb   :  { %v5776_v61 = vpop.f32.mrf.mxu0  ;;  %v2346_v10 = vpop.f32.mrf.mxu1 }
 0x8bc   :  { %v2367_v62 = vmax.f32 %v2345_v60, 0.0  ;;  %v2285_v63 = vadd.f32 %v5775_v9, %v2220_v6 }
 0x8bd   :  { %v5777_v13 = vpop.f32.mrf.mxu0  ;;  %v2349_v14 = vpop.f32.mrf.mxu1 }
 0x8be   :  { %v2373_v21 = vpack.c.bf16 %v2367_v62, %v2366_v12  ;;  %v5778_v22 = vadd.f32 %v5777_v13, %v5776_v61  ;;  %v2350_v16 = vadd.f32 %v2349_v14, %v2285_v63  ;;  %v6504_v14 = vld [vmem:[%s8858_s0 + $0xc] ss:$24 sps:$4 sm:$0xff]  }
 0x8bf   :  { %v5779_v23 = vpop.f32.mrf.mxu0  ;;  %v2351_v24 = vpop.f32.mrf.mxu1  ;;  %2907 = vmatprep.mubr.bf16.mxu1 %v6504_v14  ;;  %v6526_v14 = vld [vmem:[#allocation9] sm:$0xff]  }
 0x8c0   :  { %6196 = vmatmul.mubr.msk.bf16.vlgmr.msra.gmra.mxu0 %vm2392_vm7, %v2373_v21  ;;  %v2288_v17 = vadd.f32 %v5778_v22, %v2223_v19  ;;  %v2368_v18 = vmax.f32 %v2350_v16, 0.0 }
 0x8c1   :  { %v5780_v3 = vpop.f32.mrf.mxu0  ;;  %v2352_v26 = vpop.f32.mrf.mxu1 }
 0x8c2   :  { %v5781_v30 = vadd.f32 %v5780_v3, %v5779_v23  ;;  %v2353_v31 = vadd.f32 %v2352_v26, %v2288_v17  ;;  %v2634_v17 = vld [vmem:[%s8815_s12] sm:$0xff]  ;;  %v2635_v26 = vld [vmem:[%s8815_s12 + $0x8] sm:$0xff] }
 0x8c3   :  { %v5782_v8 = vpop.f32.mrf.mxu0  ;;  %v2354_v15 = vpop.f32.mrf.mxu1 }
 0x8c4   :  { %v2369_v32 = vmax.f32 %v2353_v31, 0.0  ;;  %v2293_v33 = vadd.f32 %v5781_v30, %v2228_v28  ;;  %v2637_v30 = vld [vmem:[%s8815_s12 + $0x18] sm:$0xff]  ;;  %v6493_v15 = vld [vmem:[%s8858_s0 + $0x34] ss:$24 sps:$4 sm:$0xff]  }
 0x8c5   :  { %v5783_v34 = vpop.f32.mrf.mxu0  ;;  %v2357_v36 = vpop.f32.mrf.mxu1  ;;  %v6490_v31 = vld [vmem:[%s8858_s0] ss:$24 sps:$4 sm:$0xff]  }
 0x8c6   :  { %v2374_v35 = vpack.c.bf16 %v2369_v32, %v2368_v18  ;;  %v5784_v38 = vadd.f32 %v5783_v34, %v5782_v8  ;;  %v2358_v27 = vadd.f32 %v2357_v36, %v2293_v33  ;;  %v2638_v8 = vld [vmem:[%s8815_s12 + $0x20] sm:$0xff]  ;;  %v2640_v18 = vld [vmem:[%s8815_s12 + $0x30] sm:$0xff]  ;;  %v2641_v32 = vld [vmem:[%s8815_s12 + $0x38] sm:$0xff] }
 0x8c7   :  { %v2359_v39 = vpop.f32.mrf.mxu1  ;;  %v6495_v33 = vld [vmem:[%s8858_s0 + $0x30] ss:$24 sps:$4 sm:$0xff]   ;;  %v6496_v34 = vld [vmem:[%s8858_s0 + $0x64] ss:$24 sps:$4 sm:$0xff]   ;;  %v6498_v36 = vld [vmem:[%s8858_s0 + $0x60] ss:$24 sps:$4 sm:$0xff]  }
 0x8c8   :  { %6199 = vmatprep.mubr.msk.bf16.mxu0 %vm2392_vm7, %v2374_v35  ;;  %v2296_v40 = vadd.f32 %v5784_v38, %v2231_v37  ;;  %v2370_v42 = vmax.f32 %v2358_v27, 0.0  ;;  %v6499_v37 = vld [vmem:[%s8858_s0 + $0x94] ss:$24 sps:$4 sm:$0xff]   ;;  %v6501_v35 = vld [vmem:[%s8858_s0 + $0x90] ss:$24 sps:$4 sm:$0xff]  }
 0x8c9   :  { %v2360_v41 = vpop.f32.mrf.mxu1  ;;  %v6507_v38 = vld [vmem:[%s8858_s0 + $0x14] ss:$24 sps:$4 sm:$0xff]  }
 0x8ca   :  { %v2361_v20 = vadd.f32 %v2360_v41, %v2296_v40 }
 0x8cb   :  { %v2362_v0 = vpop.f32.mrf.mxu1 }
 0x8cc   :  { %v2371_v43 = vmax.f32 %v2361_v20, 0.0 }
 0x8ce   :  { %v2375_v44 = vpack.c.bf16 %v2371_v43, %v2370_v42 }
 0x8d0   :  { %6200 = vmatmul.mubr.msk.bf16.gmra.mxu0 %vm2392_vm7, %v2375_v44 }
 0x8d1   :  { %2842 = vmatprep.mubr.bf16.mxu0 %v6492_v57  ;;  %v6508_v57 = vld [vmem:[%s8858_s0 + $0x3c] ss:$24 sps:$4 sm:$0xff]  }
 0x980   :  { %v6197_v45 = vpop.f32.mrf.mxu0 }
 0x982   :  { %v2439_v46 = vpop.f32.mrf.mxu0 }
 0x984   :  { %v6198_v47 = vpop.f32.mrf.mxu0 }
 0x985   :  { %v7852_v55 = vpack.c.bf16 %v6198_v47, %v6197_v45 }
 0x986   :  { %v2442_v48 = vpop.f32.mrf.mxu0 }
 0x987   :  { %v7858_v56 = vpack.c.bf16 %v2442_v48, %v2439_v46 }
 0x990   :  { %v6201_v49 = vpop.f32.mrf.mxu0 }
 0x992   :  { %v2455_v50 = vpop.f32.mrf.mxu0 }
 0x994   :  { %v6202_v51 = vpop.f32.mrf.mxu0 }
 0x995   :  { %v7842_v52 = vpack.c.bf16 %v6202_v51, %v6201_v49 }
 0x996   :  { %v2458_v53 = vpop.f32.mrf.mxu0 }
 0x997   :  { %v7844_v54 = vpack.c.bf16 %v2458_v53, %v2455_v50  ;;  %2568 = vrot.lane.b32.xlu1 %v7842_v52, %s6814_s20 }
 0x999   :  { %2566 = vrot.lane.b32.xlu0 %v7844_v54, %s6814_s20  ;;  %s6824_s20 = smov 114  }
 0x99b   :  { %2546 = vrot.lane.b32.xlu1 %v7842_v52, %s6786_s23 }
 0x99d   :  { %2544 = vrot.lane.b32.xlu0 %v7844_v54, %s6786_s23 }
 0x99f   :  { %2564 = vrot.lane.b32.xlu1 %v7842_v52, %s6815_s4 }
 0x9a1   :  { %2490 = vrot.lane.b32.xlu0 %v7852_v55, %s6816_s25 }
 0x9a3   :  { %2514 = vrot.lane.b32.xlu1 %v7852_v55, %s6817_s17 }
 0x9a5   :  { %2562 = vrot.lane.b32.xlu0 %v7844_v54, %s6815_s4  ;;  %s6825_s4 = smov 112  }
 0x9a7   :  { %2512 = vrot.lane.b32.xlu1 %v7858_v56, %s6817_s17  ;;  %s6827_s17 = smov 113  }
 0x9a9   :  { %2488 = vrot.lane.b32.xlu0 %v7858_v56, %s6816_s25 }
 0x9ab   :  { %2572 = vrot.lane.b32.xlu1 %v7842_v52, %s6818_s9 }
 0x9ad   :  { %2508 = vrot.lane.b32.xlu0 %v7852_v55, %s6795_s26 }
 0x9af   :  { %2484 = vrot.lane.b32.xlu1 %v7852_v55, %s6786_s23 }
 0x9b1   :  { %2482 = vrot.lane.b32.xlu0 %v7858_v56, %s6786_s23 }
 0x9b3   :  { %2506 = vrot.lane.b32.xlu1 %v7858_v56, %s6795_s26 }
 0x9b5   :  { %2570 = vrot.lane.b32.xlu0 %v7844_v54, %s6818_s9  ;;  %s6828_s9 = smov 115  }
 0x9b7   :  { %2558 = vrot.lane.b32.xlu1 %v7842_v52, %s6787_s27 }
 0x9b9   :  { %2502 = vrot.lane.b32.xlu0 %v7852_v55, %s6819_s11 }
 0x9bb   :  { %2478 = vrot.lane.b32.xlu1 %v7852_v55, %s6820_s18 }
 0x9bd   :  { %2556 = vrot.lane.b32.xlu0 %v7844_v54, %s6787_s27 }
 0x9bf   :  { %2500 = vrot.lane.b32.xlu1 %v7858_v56, %s6819_s11 }
 0x9c1   :  { %2476 = vrot.lane.b32.xlu0 %v7858_v56, %s6820_s18 }
 0x9c3   :  { %2496 = vrot.lane.b32.xlu1 %v7852_v55, %s6787_s27 }
 0x9c5   :  { %2494 = vrot.lane.b32.xlu0 %v7858_v56, %s6787_s27 }
 0xa09   :  { %v2569_v58 = vpop.permute.xlu1 %2568 }
 0xa0a   :  { %2588 = vrot.lane.b32.xlu1 %v2569_v58, %s6819_s11 }
 0xa0b   :  { %v2567_v59 = vpop.permute.xlu0 %2566 }
 0xa0c   :  { %2586 = vrot.lane.b32.xlu0 %v2567_v59, %s6819_s11 }
 0xa0d   :  { %v7895_v2 = vpop.permute.xlu1 %2546 }
 0xa0e   :  { %2584 = vrot.lane.b32.xlu1 %v7895_v2, %s6819_s11 }
 0xa0f   :  { %v7899_v6 = vpop.permute.xlu0 %2544 }
 0xa10   :  { %2552 = vrot.lane.b32.xlu0 %v7842_v52, %s6816_s25 }
 0xa11   :  { %v2565_v7 = vpop.permute.xlu1 %2564 }
 0xa12   :  { %2580 = vrot.lane.b32.xlu1 %v2565_v7, %s6819_s11  ;;  %v6510_v7 = vld [vmem:[%s8858_s0 + $0x38] ss:$24 sps:$4 sm:$0xff]  }
 0xa13   :  { %v2491_v9 = vpop.permute.xlu0 %2490 }
 0xa14   :  { %2582 = vrot.lane.b32.xlu0 %v7899_v6, %s6819_s11 }
 0xa15   :  { %v2515_v60 = vpop.permute.xlu1 %2514 }
 0xa16   :  { %2532 = vrot.lane.b32.xlu1 %v7852_v55, %s6792_s7  ;;  %5791 = vmatprep.subr.bf16.mxu0 %v2515_v60  ;;  %v6513_v60 = vld [vmem:[%s8858_s0 + $0x40] ss:$24 sps:$4 sm:$0xff]  }
 0xa17   :  { %5792 = vmatpush3.bf16.msra.mxu0 %v2491_v9  ;;  %v2563_v61 = vpop.permute.xlu0 %2562  ;;  %v6514_v9 = vld [vmem:[%s8858_s0 + $0x6c] ss:$24 sps:$4 sm:$0xff]  }
 0xa18   :  { %2530 = vrot.lane.b32.xlu0 %v7858_v56, %s6792_s7 }
 0xa19   :  { %v2513_v10 = vpop.permute.xlu1 %2512 }
 0xa1a   :  { %2550 = vrot.lane.b32.xlu1 %v7844_v54, %s6816_s25  ;;  %5793 = vmatprep.subr.bf16.mxu0 %v2513_v10  ;;  %v6516_v10 = vld [vmem:[%s8858_s0 + $0x68] ss:$24 sps:$4 sm:$0xff]   ;;  %s6826_s25 = smov 10  }
 0xa1b   :  { %v2489_v11 = vpop.permute.xlu0 %2488 }
 0xa1c   :  { %2578 = vrot.lane.b32.xlu0 %v2563_v61, %s6819_s11  ;;  %5794 = vmatpush3.bf16.msra.mxu0 %v2489_v11  ;;  %v6517_v61 = vld [vmem:[%s8858_s0 + $0x74] ss:$24 sps:$4 sm:$0xff]  }
 0xa1d   :  { %v2573_v12 = vpop.permute.xlu1 %2572  ;;  %v6522_v11 = vld [vmem:[%s8858_s0 + $0x9c] ss:$24 sps:$4 sm:$0xff]  }
 0xa1e   :  { %2576 = vrot.lane.b32.xlu1 %v7842_v52, %s6819_s11 }
 0xa1f   :  { %v2509_v62 = vpop.permute.xlu0 %2508 }
 0xa20   :  { %2526 = vrot.lane.b32.xlu0 %v7852_v55, %s6821_s6  ;;  %5795 = vmatprep.subr.bf16.mxu0 %v2509_v62  ;;  %v6523_v62 = vld [vmem:[%s8858_s0 + $0xa4] ss:$24 sps:$4 sm:$0xff]  }
 0xa21   :  { %v2485_v63 = vpop.permute.xlu1 %2484 }
 0xa22   :  { %2574 = vrot.lane.b32.xlu1 %v7844_v54, %s6819_s11  ;;  %5796 = vmatpush3.bf16.msra.mxu0 %v2485_v63  ;;  %v6520_v63 = vld [vmem:[%s8858_s0 + $0x98] ss:$24 sps:$4 sm:$0xff]  }
 0xa23   :  { %v2483_v13 = vpop.permute.xlu0 %2482 }
 0xa24   :  { %2524 = vrot.lane.b32.xlu0 %v7858_v56, %s6821_s6 }
 0xa25   :  { %v2507_v19 = vpop.permute.xlu1 %2506 }
 0xa26   :  { %2596 = vrot.lane.b32.xlu1 %v2573_v12, %s6819_s11  ;;  %5797 = vmatprep.subr.bf16.mxu0 %v2507_v19  ;;  %v6519_v12 = vld [vmem:[%s8858_s0 + $0x70] ss:$24 sps:$4 sm:$0xff]  }
 0xa27   :  { %5798 = vmatpush3.bf16.msra.mxu0 %v2483_v13  ;;  %v2571_v4 = vpop.permute.xlu0 %2570  ;;  %v6525_v13 = vld [vmem:[%s8858_s0 + $0xa0] ss:$24 sps:$4 sm:$0xff]  }
 0xa28   :  { %2540 = vrot.lane.b32.xlu0 %v7842_v52, %s6820_s18 }
 0xa29   :  { %v2559_v21 = vpop.permute.xlu1 %2558 }
 0xa2a   :  { %5831 = vmatprep.subr.bf16.mxu1 %v2559_v21  ;;  %2520 = vrot.lane.b32.xlu1 %v7852_v55, %s6793_s30 }
 0xa2b   :  { %5832 = vmatpush3.bf16.msra.mxu1 %v7842_v52  ;;  %v2503_v22 = vpop.permute.xlu0 %2502 }
 0xa2c   :  { %2594 = vrot.lane.b32.xlu0 %v2571_v4, %s6819_s11  ;;  %5799 = vmatprep.subr.bf16.mxu0 %v2503_v22 }
 0xa2d   :  { %v2479_v23 = vpop.permute.xlu1 %2478 }
 0xa2e   :  { %2538 = vrot.lane.b32.xlu1 %v7844_v54, %s6820_s18  ;;  %5800 = vmatpush3.bf16.msra.mxu0 %v2479_v23  ;;  %s8861_s18 = sld [smem:[#allocation22_spill]] }
 0xa2f   :  { %v2557_v24 = vpop.permute.xlu0 %2556 }
 0xa30   :  { %2518 = vrot.lane.b32.xlu0 %v7858_v56, %s6793_s30  ;;  %5833 = vmatprep.subr.bf16.mxu1 %v2557_v24 }
 0xa31   :  { %v2501_v25 = vpop.permute.xlu1 %2500  ;;  %5834 = vmatpush3.bf16.msra.mxu1 %v7844_v54 }
 0xa32   :  { %2592 = vrot.lane.b32.xlu1 %v2559_v21, %s6819_s11  ;;  %5801 = vmatprep.subr.bf16.mxu0 %v2501_v25 }
 0xa33   :  { %v2477_v16 = vpop.permute.xlu0 %2476 }
 0xa34   :  { %2590 = vrot.lane.b32.xlu0 %v2557_v24, %s6819_s11  ;;  %5802 = vmatpush3.bf16.msra.mxu0 %v2477_v16 }
 0xa35   :  { %v2497_v3 = vpop.permute.xlu1 %2496 }
 0xa36   :  { %2644 = vperm.xlu1 %6311, %v2634_v17   ;;  %5803 = vmatprep.subr.bf16.mxu0 %v2497_v3 }
 0xa37   :  { %v2495_v28 = vpop.permute.xlu0 %2494 }
 0xa38   :  { %2649 = vperm.xlu0 %6310, %v2635_v26   ;;  %5804 = vmatpush3.bf16.msra.mxu0 %v7852_v55 }
 0xa39   :  { %5805 = vmatprep.subr.bf16.mxu0 %v2495_v28 }
 0xa3a   :  { %2654 = vperm.xlu1 %6311, %v2636_v29  }
 0xa3c   :  { %2659 = vperm.xlu0 %6310, %v2637_v30   ;;  %5806 = vmatpush3.bf16.msra.mxu0 %v7858_v56  ;;  %v6502_v56 = vld [vmem:[%s8858_s0 + $0x8] ss:$24 sps:$4 sm:$0xff]  }
 0xa3d   :  { %2940 = vmatprep.subr.bf16.mxu0 %v6791_v5 }
 0xa3e   :  { %2664 = vperm.xlu1 %6311, %v2638_v8  }
 0xa3f   :  { %2843 = vmatmul.mubr.bf16.vlgmr.msra.gmra.mxu0 %v6490_v31 }
 0xa40   :  { %2669 = vperm.xlu0 %6310, %v2639_v1   ;;  %2850 = vmatprep.mubr.bf16.mxu0 %v6493_v15 }
 0xa42   :  { %2674 = vperm.xlu1 %6311, %v2640_v18  }
 0xa44   :  { %2679 = vperm.xlu0 %6310, %v2641_v32  }
 0xa47   :  { %2851 = vmatmul.mubr.bf16.gmra.mxu0 %v6495_v33 }
 0xa48   :  { %2858 = vmatprep.mubr.bf16.mxu0 %v6496_v34 }
 0xa4f   :  { %2859 = vmatmul.mubr.bf16.gmra.mxu0 %v6498_v36 }
 0xa50   :  { %2866 = vmatprep.mubr.bf16.mxu0 %v6499_v37 }
 0xa57   :  { %2867 = vmatmul.mubr.bf16.gmra.mxu0 %v6501_v35 }
 0xa58   :  { %5483 = vmatprep.mubr.msk.bf16.mxu0 %vm1500_vm1, %v6507_v38 }
 0xa7c   :  { %v2589_v39 = vpop.permute.xlu1 %2588 }
 0xa7d   :  { %2941 = vmatpush1.bf16.msra.mxu0 %v2589_v39 }
 0xa7e   :  { %v2587_v27 = vpop.permute.xlu0 %2586  ;;  %2942 = vmatprep.subr.bf16.mxu0 %v6791_v5 }
 0xa80   :  { %v2585_v40 = vpop.permute.xlu1 %2584 }
 0xa81   :  { %2943 = vmatpush1.bf16.msra.mxu0 %v2587_v27 }
 0xa82   :  { %v2553_v41 = vpop.permute.xlu0 %2552  ;;  %2944 = vmatprep.subr.bf16.mxu0 %v6791_v5 }
 0xa83   :  { %5835 = vmatprep.subr.bf16.mxu1 %v2553_v41 }
 0xa84   :  { %v2581_v20 = vpop.permute.xlu1 %2580 }
 0xa85   :  { %2945 = vmatpush1.bf16.msra.mxu0 %v2585_v40 }
 0xa86   :  { %v2583_v0 = vpop.permute.xlu0 %2582  ;;  %2946 = vmatprep.subr.bf16.mxu0 %v6791_v5 }
 0xa88   :  { %v2533_v42 = vpop.permute.xlu1 %2532 }
 0xa89   :  { %5836 = vmatpush3.bf16.msra.mxu1 %v2533_v42  ;;  %2947 = vmatpush1.bf16.msra.mxu0 %v2583_v0 }
 0xa8a   :  { %v2531_v43 = vpop.permute.xlu0 %2530  ;;  %2948 = vmatprep.subr.bf16.mxu0 %v6791_v5 }
 0xa8c   :  { %v2551_v44 = vpop.permute.xlu1 %2550 }
 0xa8d   :  { %5837 = vmatprep.subr.bf16.mxu1 %v2551_v44  ;;  %2949 = vmatpush1.bf16.msra.mxu0 %v2581_v20 }
 0xa8e   :  { %5838 = vmatpush3.bf16.msra.mxu1 %v2531_v43  ;;  %v2579_v45 = vpop.permute.xlu0 %2578  ;;  %2950 = vmatprep.subr.bf16.mxu0 %v6791_v5 }
 0xa8f   :  { %5839 = vmatprep.subr.bf16.mxu1 %v7895_v2  ;;  %v6505_v2 = vld [vmem:[%s8858_s0 + $0x10] ss:$24 sps:$4 sm:$0xff]  }
 0xa90   :  { %v2577_v46 = vpop.permute.xlu1 %2576 }
 0xa91   :  { %2951 = vmatpush1.bf16.msra.mxu0 %v2579_v45 }
 0xa92   :  { %v2527_v47 = vpop.permute.xlu0 %2526  ;;  %2952 = vmatprep.subr.bf16.mxu0 %v6791_v5 }
 0xa93   :  { %5840 = vmatpush3.bf16.msra.mxu1 %v2527_v47 }
 0xa94   :  { %v2575_v48 = vpop.permute.xlu1 %2574  ;;  %5841 = vmatprep.subr.bf16.mxu1 %v7899_v6  ;;  %v6511_v6 = vld [vmem:[%s8858_s0 + $0x44] ss:$24 sps:$4 sm:$0xff]   ;;  %s6822_s0 = smov 11  }
 0xa95   :  { %2953 = vmatpush1.bf16.msra.mxu0 %v2577_v46 }
 0xa96   :  { %v2525_v49 = vpop.permute.xlu0 %2524  ;;  %2954 = vmatprep.subr.bf16.mxu0 %v6791_v5 }
 0xa97   :  { %5842 = vmatpush3.bf16.msra.mxu1 %v2525_v49 }
 0xa98   :  { %v2597_v50 = vpop.permute.xlu1 %2596 }
 0xa99   :  { %2955 = vmatpush1.bf16.msra.mxu0 %v2575_v48 }
 0xa9a   :  { %v2541_v51 = vpop.permute.xlu0 %2540  ;;  %2964 = vmatprep.subr.bf16.mxu0 %v6791_v5 }
 0xa9b   :  { %5843 = vmatprep.subr.bf16.mxu1 %v2541_v51 }
 0xa9c   :  { %v2521_v52 = vpop.permute.xlu1 %2520 }
 0xa9d   :  { %5844 = vmatpush3.bf16.msra.mxu1 %v2521_v52  ;;  %2965 = vmatpush2.bf16.msra.mxu0 %v2597_v50 }
 0xa9e   :  { %v2595_v53 = vpop.permute.xlu0 %2594  ;;  %2966 = vmatprep.subr.bf16.mxu0 %v6791_v5 }
 0xaa0   :  { %v2539_v54 = vpop.permute.xlu1 %2538 }
 0xaa1   :  { %5845 = vmatprep.subr.bf16.mxu1 %v2539_v54  ;;  %2967 = vmatpush2.bf16.msra.mxu0 %v2595_v53 }
 0xaa2   :  { %v2519_v55 = vpop.permute.xlu0 %2518  ;;  %2968 = vmatprep.subr.bf16.mxu0 %v6791_v5 }
 0xaa3   :  { %5846 = vmatpush3.bf16.msra.mxu1 %v2519_v55 }
 0xaa4   :  { %v2593_v58 = vpop.permute.xlu1 %2592  ;;  %6203 = vmatprep.subr.bf16.mxu1 %v6526_v14 }
 0xaa5   :  { %2969 = vmatpush2.bf16.msra.mxu0 %v2593_v58 }
 0xaa6   :  { %2908 = vmatmul.mubr.bf16.vlgmr.msra.gmra.mxu1 %v6502_v56  ;;  %2970 = vmatprep.subr.bf16.mxu0 %v6791_v5  ;;  %v2591_v59 = vpop.permute.xlu0 %2590 }
 0xaa7   :  { %2915 = vmatprep.mubr.bf16.mxu1 %v6508_v57  ;;  %6204 = vmatpush3.bf16.msra.mxu1 %v6526_v14 }
 0xaa9   :  { %2971 = vmatpush2.bf16.msra.mxu0 %v2591_v59 }
 0xaac   :  { %2973 = vmatmul.mubr.bf16.vlgmr.msra.gmra.mxu0 %v6505_v2 }
 0xaad   :  { %5484 = vmatprep.mubr.msk.bf16.mxu0 %vm1500_vm1, %v6511_v6 }
 0xaae   :  { %2916 = vmatmul.mubr.bf16.gmra.mxu1 %v6510_v7 }
 0xaaf   :  { %2923 = vmatprep.mubr.bf16.mxu1 %v6514_v9 }
 0xab1   :  { %v2645_v1 = vpop.permute.xlu1 %2644 }
 0xab3   :  { %v2650_v35 = vpop.permute.xlu0 %2649 }
 0xab4   :  { %2981 = vmatmul.mubr.bf16.gmra.mxu0 %v6513_v60 }
 0xab5   :  { %5485 = vmatprep.mubr.msk.bf16.mxu0 %vm1500_vm1, %v6517_v61  ;;  %v2655_v43 = vpop.permute.xlu1 %2654 }
 0xab6   :  { %2924 = vmatmul.mubr.bf16.gmra.mxu1 %v6516_v10 }
 0xab7   :  { %2931 = vmatprep.mubr.bf16.mxu1 %v6522_v11  ;;  %v2660_v54 = vpop.permute.xlu0 %2659 }
 0xab9   :  { %v2665_v10 = vpop.permute.xlu1 %2664 }
 0xabc   :  { %2989 = vmatmul.mubr.bf16.gmra.mxu0 %v6519_v12 }
 0xabd   :  { %5486 = vmatprep.mubr.msk.bf16.mxu0 %vm1500_vm1, %v6523_v62 }
 0xabe   :  { %2932 = vmatmul.mubr.bf16.gmra.mxu1 %v6520_v63 }
 0xac4   :  { %2997 = vmatmul.mubr.bf16.gmra.mxu0 %v6525_v13 }
 0xaff   :  { %v5807_v19 = vpop.f32.mrf.mxu0 }
 0xb01   :  { %v5808_v4 = vpop.f32.mrf.mxu0 }
 0xb02   :  { %v5809_v31 = vadd.f32 %v5808_v4, %v5807_v19 }
 0xb03   :  { %v5810_v21 = vpop.f32.mrf.mxu0 }
 0xb04   :  { %v2845_v32 = vadd.f32 %v5809_v31, %v2645_v1 }
 0xb05   :  { %v5811_v22 = vpop.f32.mrf.mxu0 }
 0xb06   :  { %v5812_v33 = vadd.f32 %v5811_v22, %v5810_v21 }
 0xb07   :  { %v5813_v23 = vpop.f32.mrf.mxu0 }
 0xb08   :  { %v2848_v40 = vadd.f32 %v5812_v33, %v2650_v35 }
 0xb09   :  { %v5814_v24 = vpop.f32.mrf.mxu0 }
 0xb0a   :  { %v5815_v41 = vadd.f32 %v5814_v24, %v5813_v23  ;;  %v2670_v23 = vpop.permute.xlu0 %2669 }
 0xb0b   :  { %v5816_v25 = vpop.f32.mrf.mxu0 }
 0xb0c   :  { %v2853_v48 = vadd.f32 %v5815_v41, %v2655_v43 }
 0xb0d   :  { %v5817_v16 = vpop.f32.mrf.mxu0 }
 0xb0e   :  { %v5818_v49 = vadd.f32 %v5817_v16, %v5816_v25 }
 0xb0f   :  { %v5819_v17 = vpop.f32.mrf.mxu0 }
 0xb10   :  { %v2856_v2 = vadd.f32 %v5818_v49, %v2660_v54 }
 0xb11   :  { %v5820_v3 = vpop.f32.mrf.mxu0 }
 0xb12   :  { %v5821_v6 = vadd.f32 %v5820_v3, %v5819_v17 }
 0xb13   :  { %v5822_v26 = vpop.f32.mrf.mxu0 }
 0xb14   :  { %v2861_v13 = vadd.f32 %v5821_v6, %v2665_v10 }
 0xb15   :  { %v5823_v28 = vpop.f32.mrf.mxu0 }
 0xb16   :  { %v5824_v14 = vadd.f32 %v5823_v28, %v5822_v26 }
 0xb17   :  { %v8046_v29 = vpop.f32.mrf.mxu0 }
 0xb18   :  { %v2864_v31 = vadd.f32 %v5824_v14, %v2670_v23 }
 0xb19   :  { %v8048_v30 = vpop.f32.mrf.mxu0 }
 0xb1b   :  { %v8050_v8 = vpop.f32.mrf.mxu0 }
 0xb1d   :  { %v8052_v36 = vpop.f32.mrf.mxu0 }
 0xb66   :  { %v5847_v15 = vpop.f32.mrf.mxu1 }
 0xb68   :  { %v5848_v18 = vpop.f32.mrf.mxu1 }
 0xb69   :  { %v5849_v34 = vadd.f32 %v5848_v18, %v5847_v15  ;;  %v5827_v15 = vadd.f32 %v8048_v30, %v8046_v29  ;;  %v2680_v29 = vpop.permute.xlu0 %2679 }
 0xb6a   :  { %v5850_v37 = vpop.f32.mrf.mxu1 }
 0xb6b   :  { %v2910_v38 = vadd.f32 %v5849_v34, %v2845_v32  ;;  %v2675_v34 = vpop.permute.xlu1 %2674 }
 0xb6c   :  { %v5851_v39 = vpop.f32.mrf.mxu1  ;;  %v2974_v27 = vpop.f32.mrf.mxu0 }
 0xb6d   :  { %v5852_v20 = vadd.f32 %v5851_v39, %v5850_v37  ;;  %v2975_v44 = vadd.f32 %v2974_v27, %v2910_v38  ;;  %v2869_v38 = vadd.f32 %v5827_v15, %v2675_v34  ;;  %v5830_v39 = vadd.f32 %v8052_v36, %v8050_v8 }
 0xb6e   :  { %v5853_v0 = vpop.f32.mrf.mxu1  ;;  %v2976_v42 = vpop.f32.mrf.mxu0 }
 0xb6f   :  { %v2913_v45 = vadd.f32 %v5852_v20, %v2848_v40  ;;  %v3005_v55 = vmax.f32 %v2975_v44, 0.0 }
 0xb70   :  { %v5854_v46 = vpop.f32.mrf.mxu1  ;;  %v2977_v47 = vpop.f32.mrf.mxu0 }
 0xb71   :  { %v5855_v50 = vadd.f32 %v5854_v46, %v5853_v0  ;;  %v2978_v51 = vadd.f32 %v2977_v47, %v2913_v45  ;;  %v2872_v45 = vadd.f32 %v5830_v39, %v2680_v29  ;;  %v3269_v39 = vld [vmem:[%s8816_s13 + $0x10] sm:$0xff]  ;;  %v3272_v29 = vld [vmem:[%s8816_s13 + $0x28] sm:$0xff] }
 0xb72   :  { %v5856_v52 = vpop.f32.mrf.mxu1  ;;  %v2979_v53 = vpop.f32.mrf.mxu0 }
 0xb73   :  { %v3006_v56 = vmax.f32 %v2978_v51, 0.0  ;;  %v2918_v57 = vadd.f32 %v5855_v50, %v2853_v48 }
 0xb74   :  { %v5857_v58 = vpop.f32.mrf.mxu1  ;;  %v2982_v59 = vpop.f32.mrf.mxu0 }
 0xb75   :  { %v3013_v7 = vpack.c.bf16 %v3006_v56, %v3005_v55  ;;  %v5858_v9 = vadd.f32 %v5857_v58, %v5856_v52  ;;  %v2983_v11 = vadd.f32 %v2982_v59, %v2918_v57 }
 0xb76   :  { %v5859_v60 = vpop.f32.mrf.mxu1  ;;  %v2984_v61 = vpop.f32.mrf.mxu0 }
 0xb77   :  { %6205 = vmatprep.mubr.msk.bf16.mxu1 %vm3025_vm8, %v3013_v7  ;;  %v2921_v12 = vadd.f32 %v5858_v9, %v2856_v2  ;;  %v3007_v24 = vmax.f32 %v2983_v11, 0.0  ;;  %v6529_v11 = vld [vmem:[%s8859_s16 + $0x4] ss:$24 sps:$4 sm:$0xff]  }
 0xb78   :  { %v5860_v62 = vpop.f32.mrf.mxu1  ;;  %v2985_v63 = vpop.f32.mrf.mxu0 }
 0xb79   :  { %v5861_v19 = vadd.f32 %v5860_v62, %v5859_v60  ;;  %v2986_v4 = vadd.f32 %v2985_v63, %v2921_v12 }
 0xb7a   :  { %v5862_v21 = vpop.f32.mrf.mxu1  ;;  %v2987_v22 = vpop.f32.mrf.mxu0 }
 0xb7b   :  { %v3008_v25 = vmax.f32 %v2986_v4, 0.0  ;;  %v2926_v16 = vadd.f32 %v5861_v19, %v2861_v13 }
 0xb7c   :  { %v5863_v17 = vpop.f32.mrf.mxu1  ;;  %v2990_v3 = vpop.f32.mrf.mxu0 }
 0xb7d   :  { %v3014_v1 = vpack.c.bf16 %v3008_v25, %v3007_v24  ;;  %v5864_v18 = vadd.f32 %v5863_v17, %v5862_v21  ;;  %v2991_v26 = vadd.f32 %v2990_v3, %v2926_v16  ;;  %v6541_v3 = vld [vmem:[%s8859_s16 + $0xc] ss:$24 sps:$4 sm:$0xff]  }
 0xb7e   :  { %v5865_v32 = vpop.f32.mrf.mxu1  ;;  %v2992_v33 = vpop.f32.mrf.mxu0  ;;  %3540 = vmatprep.mubr.bf16.mxu0 %v6541_v3  ;;  %v3650_v3 = vld [vmem:[%s8825_s22] sm:$0xf]  ;;  %s6830_s22 = smov 7  }
 0xb7f   :  { %6206 = vmatmul.mubr.msk.bf16.vlgmr.msra.gmra.mxu1 %vm3025_vm8, %v3014_v1  ;;  %v2929_v28 = vadd.f32 %v5864_v18, %v2864_v31  ;;  %v3009_v30 = vmax.f32 %v2991_v26, 0.0 }
 0xb80   :  { %v5866_v37 = vpop.f32.mrf.mxu1  ;;  %v2993_v35 = vpop.f32.mrf.mxu0 }
 0xb81   :  { %v5867_v27 = vadd.f32 %v5866_v37, %v5865_v32  ;;  %v2994_v40 = vadd.f32 %v2993_v35, %v2929_v28  ;;  %v3267_v28 = vld [vmem:[%s8816_s13] sm:$0xff]  ;;  %v3268_v35 = vld [vmem:[%s8816_s13 + $0x8] sm:$0xff] }
 0xb82   :  { %v5868_v41 = vpop.f32.mrf.mxu1  ;;  %v2995_v20 = vpop.f32.mrf.mxu0 }
 0xb83   :  { %v3010_v0 = vmax.f32 %v2994_v40, 0.0  ;;  %v2934_v42 = vadd.f32 %v5867_v27, %v2869_v38  ;;  %v3270_v27 = vld [vmem:[%s8816_s13 + $0x18] sm:$0xff]  ;;  %v6532_v20 = vld [vmem:[%s8859_s16 + $0x34] ss:$24 sps:$4 sm:$0xff]  }
 0xb84   :  { %v5869_v43 = vpop.f32.mrf.mxu1  ;;  %v2998_v44 = vpop.f32.mrf.mxu0  ;;  %v6527_v40 = vld [vmem:[%s8859_s16] ss:$24 sps:$4 sm:$0xff]  }
 0xb85   :  { %v3015_v46 = vpack.c.bf16 %v3010_v0, %v3009_v30  ;;  %v5870_v47 = vadd.f32 %v5869_v43, %v5868_v41  ;;  %v2999_v49 = vadd.f32 %v2998_v44, %v2934_v42  ;;  %v3271_v41 = vld [vmem:[%s8816_s13 + $0x20] sm:$0xff]  ;;  %v3273_v30 = vld [vmem:[%s8816_s13 + $0x30] sm:$0xff]  ;;  %v3274_v0 = vld [vmem:[%s8816_s13 + $0x38] sm:$0xff] }
 0xb86   :  { %v3000_v48 = vpop.f32.mrf.mxu0  ;;  %v6530_v42 = vld [vmem:[%s8859_s16 + $0x30] ss:$24 sps:$4 sm:$0xff]   ;;  %v6535_v43 = vld [vmem:[%s8859_s16 + $0x64] ss:$24 sps:$4 sm:$0xff]   ;;  %v6533_v44 = vld [vmem:[%s8859_s16 + $0x60] ss:$24 sps:$4 sm:$0xff]  }
 0xb87   :  { %6209 = vmatprep.mubr.msk.bf16.mxu1 %vm3025_vm8, %v3015_v46  ;;  %v2937_v50 = vadd.f32 %v5870_v47, %v2872_v45  ;;  %v3011_v52 = vmax.f32 %v2999_v49, 0.0  ;;  %v6538_v45 = vld [vmem:[%s8859_s16 + $0x94] ss:$24 sps:$4 sm:$0xff]   ;;  %v6536_v46 = vld [vmem:[%s8859_s16 + $0x90] ss:$24 sps:$4 sm:$0xff]  }
 0xb88   :  { %v3001_v51 = vpop.f32.mrf.mxu0  ;;  %v6544_v47 = vld [vmem:[%s8859_s16 + $0x14] ss:$24 sps:$4 sm:$0xff]  }
 0xb89   :  { %v3002_v8 = vadd.f32 %v3001_v51, %v2937_v50 }
 0xb8a   :  { %v3003_v36 = vpop.f32.mrf.mxu0 }
 0xb8b   :  { %v3012_v53 = vmax.f32 %v3002_v8, 0.0 }
 0xb8d   :  { %v3016_v54 = vpack.c.bf16 %v3012_v53, %v3011_v52 }
 0xb8f   :  { %6210 = vmatmul.mubr.msk.bf16.gmra.mxu1 %vm3025_vm8, %v3016_v54 }
 0xb90   :  { %3475 = vmatprep.mubr.bf16.mxu1 %v6529_v11  ;;  %v6545_v11 = vld [vmem:[%s8859_s16 + $0x3c] ss:$24 sps:$4 sm:$0xff]  }
 0xc3f   :  { %v6207_v55 = vpop.f32.mrf.mxu1 }
 0xc41   :  { %v3072_v56 = vpop.f32.mrf.mxu1 }
 0xc43   :  { %v6208_v57 = vpop.f32.mrf.mxu1 }
 0xc44   :  { %v8072_v61 = vpack.c.bf16 %v6208_v57, %v6207_v55 }
 0xc45   :  { %v3075_v58 = vpop.f32.mrf.mxu1 }
 0xc46   :  { %v8078_v10 = vpack.c.bf16 %v3075_v58, %v3072_v56 }
 0xc4f   :  { %v6211_v59 = vpop.f32.mrf.mxu1 }
 0xc51   :  { %v3088_v2 = vpop.f32.mrf.mxu1 }
 0xc53   :  { %v6212_v6 = vpop.f32.mrf.mxu1 }
 0xc54   :  { %v8062_v7 = vpack.c.bf16 %v6212_v6, %v6211_v59 }
 0xc55   :  { %v3091_v9 = vpop.f32.mrf.mxu1 }
 0xc56   :  { %v8064_v60 = vpack.c.bf16 %v3091_v9, %v3088_v2  ;;  %3201 = vrot.lane.b32.xlu1 %v8062_v7, %s6822_s0 }
 0xc58   :  { %3199 = vrot.lane.b32.xlu0 %v8064_v60, %s6822_s0  ;;  %s6831_s0 = smov 118  }
 0xc5a   :  { %3179 = vrot.lane.b32.xlu1 %v8062_v7, %s6786_s23 }
 0xc5c   :  { %3177 = vrot.lane.b32.xlu0 %v8064_v60, %s6786_s23 }
 0xc5e   :  { %3197 = vrot.lane.b32.xlu1 %v8062_v7, %s6823_s19 }
 0xc60   :  { %3123 = vrot.lane.b32.xlu0 %v8072_v61, %s6824_s20 }
 0xc62   :  { %3147 = vrot.lane.b32.xlu1 %v8072_v61, %s6825_s4 }
 0xc64   :  { %3195 = vrot.lane.b32.xlu0 %v8064_v60, %s6823_s19  ;;  %s6832_s19 = smov 116  }
 0xc66   :  { %3145 = vrot.lane.b32.xlu1 %v8078_v10, %s6825_s4  ;;  %s6834_s4 = smov 117  }
 0xc68   :  { %3121 = vrot.lane.b32.xlu0 %v8078_v10, %s6824_s20 }
 0xc6a   :  { %3205 = vrot.lane.b32.xlu1 %v8062_v7, %s6826_s25 }
 0xc6c   :  { %3141 = vrot.lane.b32.xlu0 %v8072_v61, %s6795_s26 }
 0xc6e   :  { %3117 = vrot.lane.b32.xlu1 %v8072_v61, %s6786_s23 }
 0xc70   :  { %3115 = vrot.lane.b32.xlu0 %v8078_v10, %s6786_s23 }
 0xc72   :  { %3139 = vrot.lane.b32.xlu1 %v8078_v10, %s6795_s26 }
 0xc74   :  { %3203 = vrot.lane.b32.xlu0 %v8064_v60, %s6826_s25 }
 0xc76   :  { %3191 = vrot.lane.b32.xlu1 %v8062_v7, %s6787_s27 }
 0xc78   :  { %3135 = vrot.lane.b32.xlu0 %v8072_v61, %s6827_s17 }
 0xc7a   :  { %3111 = vrot.lane.b32.xlu1 %v8072_v61, %s6828_s9 }
 0xc7c   :  { %3189 = vrot.lane.b32.xlu0 %v8064_v60, %s6787_s27 }
 0xc7e   :  { %3133 = vrot.lane.b32.xlu1 %v8078_v10, %s6827_s17 }
 0xc80   :  { %3109 = vrot.lane.b32.xlu0 %v8078_v10, %s6828_s9 }
 0xc82   :  { %3129 = vrot.lane.b32.xlu1 %v8072_v61, %s6787_s27 }
 0xc84   :  { %3127 = vrot.lane.b32.xlu0 %v8078_v10, %s6787_s27 }
 0xcc8   :  { %v3202_v12 = vpop.permute.xlu1 %3201 }
 0xcc9   :  { %3221 = vrot.lane.b32.xlu1 %v3202_v12, %s6827_s17 }
 0xcca   :  { %v3200_v62 = vpop.permute.xlu0 %3199 }
 0xccb   :  { %3219 = vrot.lane.b32.xlu0 %v3200_v62, %s6827_s17 }
 0xccc   :  { %v8115_v63 = vpop.permute.xlu1 %3179 }
 0xccd   :  { %3217 = vrot.lane.b32.xlu1 %v8115_v63, %s6827_s17 }
 0xcce   :  { %v8119_v13 = vpop.permute.xlu0 %3177 }
 0xccf   :  { %3185 = vrot.lane.b32.xlu0 %v8062_v7, %s6824_s20 }
 0xcd0   :  { %v3198_v14 = vpop.permute.xlu1 %3197 }
 0xcd1   :  { %3213 = vrot.lane.b32.xlu1 %v3198_v14, %s6827_s17  ;;  %v6547_v14 = vld [vmem:[%s8859_s16 + $0x38] ss:$24 sps:$4 sm:$0xff]  }
 0xcd2   :  { %v3124_v19 = vpop.permute.xlu0 %3123 }
 0xcd3   :  { %3215 = vrot.lane.b32.xlu0 %v8119_v13, %s6827_s17 }
 0xcd4   :  { %v3148_v4 = vpop.permute.xlu1 %3147 }
 0xcd5   :  { %3165 = vrot.lane.b32.xlu1 %v8072_v61, %s6792_s7  ;;  %5876 = vmatprep.subr.bf16.mxu1 %v3148_v4  ;;  %v6550_v4 = vld [vmem:[%s8859_s16 + $0x40] ss:$24 sps:$4 sm:$0xff]  }
 0xcd6   :  { %5877 = vmatpush3.bf16.msra.mxu1 %v3124_v19  ;;  %v3196_v21 = vpop.permute.xlu0 %3195  ;;  %v6551_v19 = vld [vmem:[%s8859_s16 + $0x6c] ss:$24 sps:$4 sm:$0xff]  }
 0xcd7   :  { %3163 = vrot.lane.b32.xlu0 %v8078_v10, %s6792_s7 }
 0xcd8   :  { %v3146_v22 = vpop.permute.xlu1 %3145 }
 0xcd9   :  { %3183 = vrot.lane.b32.xlu1 %v8064_v60, %s6824_s20  ;;  %5878 = vmatprep.subr.bf16.mxu1 %v3146_v22  ;;  %v6553_v22 = vld [vmem:[%s8859_s16 + $0x68] ss:$24 sps:$4 sm:$0xff]   ;;  %s6833_s20 = smov 6  }
 0xcda   :  { %v3122_v23 = vpop.permute.xlu0 %3121 }
 0xcdb   :  { %3211 = vrot.lane.b32.xlu0 %v3196_v21, %s6827_s17  ;;  %5879 = vmatpush3.bf16.msra.mxu1 %v3122_v23  ;;  %v6554_v21 = vld [vmem:[%s8859_s16 + $0x74] ss:$24 sps:$4 sm:$0xff]  }
 0xcdc   :  { %v3206_v24 = vpop.permute.xlu1 %3205  ;;  %v6557_v23 = vld [vmem:[%s8859_s16 + $0x9c] ss:$24 sps:$4 sm:$0xff]  }
 0xcdd   :  { %3209 = vrot.lane.b32.xlu1 %v8062_v7, %s6827_s17 }
 0xcde   :  { %v3142_v25 = vpop.permute.xlu0 %3141 }
 0xcdf   :  { %3159 = vrot.lane.b32.xlu0 %v8072_v61, %s6829_s5  ;;  %5880 = vmatprep.subr.bf16.mxu1 %v3142_v25  ;;  %v6560_v25 = vld [vmem:[%s8859_s16 + $0xa4] ss:$24 sps:$4 sm:$0xff]  }
 0xce0   :  { %v3118_v16 = vpop.permute.xlu1 %3117 }
 0xce1   :  { %3207 = vrot.lane.b32.xlu1 %v8064_v60, %s6827_s17  ;;  %5881 = vmatpush3.bf16.msra.mxu1 %v3118_v16  ;;  %v6559_v16 = vld [vmem:[%s8859_s16 + $0x98] ss:$24 sps:$4 sm:$0xff]  }
 0xce2   :  { %v3116_v17 = vpop.permute.xlu0 %3115 }
 0xce3   :  { %3157 = vrot.lane.b32.xlu0 %v8078_v10, %s6829_s5 }
 0xce4   :  { %v3140_v31 = vpop.permute.xlu1 %3139 }
 0xce5   :  { %3229 = vrot.lane.b32.xlu1 %v3206_v24, %s6827_s17  ;;  %5882 = vmatprep.subr.bf16.mxu1 %v3140_v31  ;;  %v6556_v24 = vld [vmem:[%s8859_s16 + $0x70] ss:$24 sps:$4 sm:$0xff]   ;;  %v3665_v31 = vsel %vm638_vm2, %v3650_v3, 0 }
 0xce6   :  { %5883 = vmatpush3.bf16.msra.mxu1 %v3116_v17  ;;  %v3204_v15 = vpop.permute.xlu0 %3203  ;;  %v6562_v17 = vld [vmem:[%s8859_s16 + $0xa0] ss:$24 sps:$4 sm:$0xff]  }
 0xce7   :  { %3173 = vrot.lane.b32.xlu0 %v8062_v7, %s6828_s9 }
 0xce8   :  { %v3192_v1 = vpop.permute.xlu1 %3191 }
 0xce9   :  { %5916 = vmatprep.subr.bf16.mxu0 %v3192_v1  ;;  %3153 = vrot.lane.b32.xlu1 %v8072_v61, %s6793_s30 }
 0xcea   :  { %5917 = vmatpush3.bf16.msra.mxu0 %v8062_v7  ;;  %v3136_v18 = vpop.permute.xlu0 %3135 }
 0xceb   :  { %3227 = vrot.lane.b32.xlu0 %v3204_v15, %s6827_s17  ;;  %5884 = vmatprep.subr.bf16.mxu1 %v3136_v18 }
 0xcec   :  { %v3112_v32 = vpop.permute.xlu1 %3111 }
 0xced   :  { %3171 = vrot.lane.b32.xlu1 %v8064_v60, %s6828_s9  ;;  %5885 = vmatpush3.bf16.msra.mxu1 %v3112_v32 }
 0xcee   :  { %v3190_v33 = vpop.permute.xlu0 %3189 }
 0xcef   :  { %3151 = vrot.lane.b32.xlu0 %v8078_v10, %s6793_s30  ;;  %5918 = vmatprep.subr.bf16.mxu0 %v3190_v33 }
 0xcf0   :  { %v3134_v34 = vpop.permute.xlu1 %3133  ;;  %5919 = vmatpush3.bf16.msra.mxu0 %v8064_v60 }
 0xcf1   :  { %3225 = vrot.lane.b32.xlu1 %v3192_v1, %s6827_s17  ;;  %5886 = vmatprep.subr.bf16.mxu1 %v3134_v34 }
 0xcf2   :  { %v3110_v26 = vpop.permute.xlu0 %3109 }
 0xcf3   :  { %3223 = vrot.lane.b32.xlu0 %v3190_v33, %s6827_s17  ;;  %5887 = vmatpush3.bf16.msra.mxu1 %v3110_v26 }
 0xcf4   :  { %v3130_v37 = vpop.permute.xlu1 %3129 }
 0xcf5   :  { %3277 = vperm.xlu1 %6311, %v3267_v28   ;;  %5888 = vmatprep.subr.bf16.mxu1 %v3130_v37 }
 0xcf6   :  { %v3128_v38 = vpop.permute.xlu0 %3127 }
 0xcf7   :  { %3282 = vperm.xlu0 %6310, %v3268_v35   ;;  %5889 = vmatpush3.bf16.msra.mxu1 %v8072_v61 }
 0xcf8   :  { %5890 = vmatprep.subr.bf16.mxu1 %v3128_v38 }
 0xcf9   :  { %3287 = vperm.xlu1 %6311, %v3269_v39  }
 0xcfb   :  { %3292 = vperm.xlu0 %6310, %v3270_v27   ;;  %5891 = vmatpush3.bf16.msra.mxu1 %v8078_v10  ;;  %v6539_v10 = vld [vmem:[%s8859_s16 + $0x8] ss:$24 sps:$4 sm:$0xff]  }
 0xcfc   :  { %3573 = vmatprep.subr.bf16.mxu1 %v6791_v5 }
 0xcfd   :  { %3297 = vperm.xlu1 %6311, %v3271_v41  }
 0xcfe   :  { %3476 = vmatmul.mubr.bf16.vlgmr.msra.gmra.mxu1 %v6527_v40 }
 0xcff   :  { %3302 = vperm.xlu0 %6310, %v3272_v29   ;;  %3483 = vmatprep.mubr.bf16.mxu1 %v6532_v20 }
 0xd01   :  { %3307 = vperm.xlu1 %6311, %v3273_v30  }
 0xd03   :  { %3312 = vperm.xlu0 %6310, %v3274_v0  }
 0xd06   :  { %3484 = vmatmul.mubr.bf16.gmra.mxu1 %v6530_v42 }
 0xd07   :  { %3491 = vmatprep.mubr.bf16.mxu1 %v6535_v43 }
 0xd0e   :  { %3492 = vmatmul.mubr.bf16.gmra.mxu1 %v6533_v44 }
 0xd0f   :  { %3499 = vmatprep.mubr.bf16.mxu1 %v6538_v45 }
 0xd16   :  { %3500 = vmatmul.mubr.bf16.gmra.mxu1 %v6536_v46 }
 0xd17   :  { %5516 = vmatprep.mubr.msk.bf16.mxu1 %vm1500_vm1, %v6544_v47 }
 0xd3b   :  { %v3222_v48 = vpop.permute.xlu1 %3221 }
 0xd3c   :  { %3574 = vmatpush1.bf16.msra.mxu1 %v3222_v48 }
 0xd3d   :  { %v3220_v49 = vpop.permute.xlu0 %3219  ;;  %3575 = vmatprep.subr.bf16.mxu1 %v6791_v5 }
 0xd3f   :  { %v3218_v50 = vpop.permute.xlu1 %3217 }
 0xd40   :  { %3576 = vmatpush1.bf16.msra.mxu1 %v3220_v49 }
 0xd41   :  { %v3186_v51 = vpop.permute.xlu0 %3185  ;;  %3577 = vmatprep.subr.bf16.mxu1 %v6791_v5 }
 0xd42   :  { %5920 = vmatprep.subr.bf16.mxu0 %v3186_v51 }
 0xd43   :  { %v3214_v8 = vpop.permute.xlu1 %3213 }
 0xd44   :  { %3578 = vmatpush1.bf16.msra.mxu1 %v3218_v50 }
 0xd45   :  { %v3216_v36 = vpop.permute.xlu0 %3215  ;;  %3579 = vmatprep.subr.bf16.mxu1 %v6791_v5 }
 0xd47   :  { %v3166_v52 = vpop.permute.xlu1 %3165 }
 0xd48   :  { %5921 = vmatpush3.bf16.msra.mxu0 %v3166_v52  ;;  %3580 = vmatpush1.bf16.msra.mxu1 %v3216_v36 }
 0xd49   :  { %v3164_v53 = vpop.permute.xlu0 %3163  ;;  %3581 = vmatprep.subr.bf16.mxu1 %v6791_v5 }
 0xd4b   :  { %v3184_v54 = vpop.permute.xlu1 %3183 }
 0xd4c   :  { %5922 = vmatprep.subr.bf16.mxu0 %v3184_v54  ;;  %3582 = vmatpush1.bf16.msra.mxu1 %v3214_v8 }
 0xd4d   :  { %5923 = vmatpush3.bf16.msra.mxu0 %v3164_v53  ;;  %v3212_v55 = vpop.permute.xlu0 %3211  ;;  %3583 = vmatprep.subr.bf16.mxu1 %v6791_v5 }
 0xd4e   :  { %5924 = vmatprep.subr.bf16.mxu0 %v8115_v63  ;;  %v6542_v63 = vld [vmem:[%s8859_s16 + $0x10] ss:$24 sps:$4 sm:$0xff]  }
 0xd4f   :  { %v3210_v56 = vpop.permute.xlu1 %3209 }
 0xd50   :  { %3584 = vmatpush1.bf16.msra.mxu1 %v3212_v55 }
 0xd51   :  { %v3160_v57 = vpop.permute.xlu0 %3159  ;;  %3585 = vmatprep.subr.bf16.mxu1 %v6791_v5 }
 0xd52   :  { %5925 = vmatpush3.bf16.msra.mxu0 %v3160_v57 }
 0xd53   :  { %v3208_v58 = vpop.permute.xlu1 %3207  ;;  %5926 = vmatprep.subr.bf16.mxu0 %v8119_v13  ;;  %v6548_v13 = vld [vmem:[%s8859_s16 + $0x44] ss:$24 sps:$4 sm:$0xff]   ;;  %s8860_s16 = smov 8  }
 0xd54   :  { %3586 = vmatpush1.bf16.msra.mxu1 %v3210_v56 }
 0xd55   :  { %v3158_v59 = vpop.permute.xlu0 %3157  ;;  %3587 = vmatprep.subr.bf16.mxu1 %v6791_v5 }
 0xd56   :  { %5927 = vmatpush3.bf16.msra.mxu0 %v3158_v59 }
 0xd57   :  { %v3230_v2 = vpop.permute.xlu1 %3229 }
 0xd58   :  { %3588 = vmatpush1.bf16.msra.mxu1 %v3208_v58 }
 0xd59   :  { %v3174_v6 = vpop.permute.xlu0 %3173  ;;  %3597 = vmatprep.subr.bf16.mxu1 %v6791_v5 }
 0xd5a   :  { %5928 = vmatprep.subr.bf16.mxu0 %v3174_v6 }
 0xd5b   :  { %v3154_v7 = vpop.permute.xlu1 %3153 }
 0xd5c   :  { %5929 = vmatpush3.bf16.msra.mxu0 %v3154_v7  ;;  %3598 = vmatpush2.bf16.msra.mxu1 %v3230_v2 }
 0xd5d   :  { %v3228_v9 = vpop.permute.xlu0 %3227  ;;  %3599 = vmatprep.subr.bf16.mxu1 %v6791_v5 }
 0xd5f   :  { %v3172_v60 = vpop.permute.xlu1 %3171 }
 0xd60   :  { %5930 = vmatprep.subr.bf16.mxu0 %v3172_v60  ;;  %3600 = vmatpush2.bf16.msra.mxu1 %v3228_v9 }
 0xd61   :  { %v3152_v61 = vpop.permute.xlu0 %3151  ;;  %3601 = vmatprep.subr.bf16.mxu1 %v6791_v5 }
 0xd62   :  { %5931 = vmatpush3.bf16.msra.mxu0 %v3152_v61 }
 0xd63   :  { %v3226_v12 = vpop.permute.xlu1 %3225  ;;  %6243 = vmatprep.subr.msk.bf16.mxu0 %vm638_vm2, %v3650_v3  ;;  %vm3651_vm2 = vcmask 64512  }
 0xd64   :  { %3602 = vmatpush2.bf16.msra.mxu1 %v3226_v12 }
 0xd65   :  { %3541 = vmatmul.mubr.bf16.vlgmr.msra.gmra.mxu0 %v6539_v10  ;;  %3603 = vmatprep.subr.bf16.mxu1 %v6791_v5  ;;  %v3224_v62 = vpop.permute.xlu0 %3223 }
 0xd66   :  { %3548 = vmatprep.mubr.bf16.mxu0 %v6545_v11  ;;  %6214 = vmatpush3.bf16.msra.mxu0 %v3665_v31 }
 0xd68   :  { %3604 = vmatpush2.bf16.msra.mxu1 %v3224_v62 }
 0xd6b   :  { %3606 = vmatmul.mubr.bf16.vlgmr.msra.gmra.mxu1 %v6542_v63 }
 0xd6c   :  { %5517 = vmatprep.mubr.msk.bf16.mxu1 %vm1500_vm1, %v6548_v13 }
 0xd6d   :  { %3549 = vmatmul.mubr.bf16.gmra.mxu0 %v6547_v14 }
 0xd6e   :  { %3556 = vmatprep.mubr.bf16.mxu0 %v6551_v19 }
 0xd70   :  { %v3278_v30 = vpop.permute.xlu1 %3277 }
 0xd72   :  { %v3283_v47 = vpop.permute.xlu0 %3282 }
 0xd73   :  { %3614 = vmatmul.mubr.bf16.gmra.mxu1 %v6550_v4 }
 0xd74   :  { %5518 = vmatprep.mubr.msk.bf16.mxu1 %vm1500_vm1, %v6554_v21  ;;  %v3288_v54 = vpop.permute.xlu1 %3287 }
 0xd75   :  { %3557 = vmatmul.mubr.bf16.gmra.mxu0 %v6553_v22 }
 0xd76   :  { %3564 = vmatprep.mubr.bf16.mxu0 %v6557_v23  ;;  %v3293_v61 = vpop.permute.xlu0 %3292 }
 0xd78   :  { %v3298_v23 = vpop.permute.xlu1 %3297 }
 0xd7b   :  { %3622 = vmatmul.mubr.bf16.gmra.mxu1 %v6556_v24 }
 0xd7c   :  { %5519 = vmatprep.mubr.msk.bf16.mxu1 %vm1500_vm1, %v6560_v25 }
 0xd7d   :  { %3565 = vmatmul.mubr.bf16.gmra.mxu0 %v6559_v16 }
 0xd83   :  { %3630 = vmatmul.mubr.bf16.gmra.mxu1 %v6562_v17 }
 0xdbe   :  { %v5892_v15 = vpop.f32.mrf.mxu1 }
 0xdc0   :  { %v5893_v1 = vpop.f32.mrf.mxu1 }
 0xdc1   :  { %v5894_v41 = vadd.f32 %v5893_v1, %v5892_v15 }
 0xdc2   :  { %v5895_v18 = vpop.f32.mrf.mxu1 }
 0xdc3   :  { %v3478_v42 = vadd.f32 %v5894_v41, %v3278_v30 }
 0xdc4   :  { %v5896_v32 = vpop.f32.mrf.mxu1 }
 0xdc5   :  { %v5897_v43 = vadd.f32 %v5896_v32, %v5895_v18 }
 0xdc6   :  { %v5898_v33 = vpop.f32.mrf.mxu1 }
 0xdc7   :  { %v3481_v51 = vadd.f32 %v5897_v43, %v3283_v47 }
 0xdc8   :  { %v5899_v34 = vpop.f32.mrf.mxu1 }
 0xdc9   :  { %v5900_v8 = vadd.f32 %v5899_v34, %v5898_v33  ;;  %v3303_v33 = vpop.permute.xlu0 %3302 }
 0xdca   :  { %v5901_v26 = vpop.f32.mrf.mxu1 }
 0xdcb   :  { %v3486_v59 = vadd.f32 %v5900_v8, %v3288_v54 }
 0xdcc   :  { %v5902_v28 = vpop.f32.mrf.mxu1 }
 0xdcd   :  { %v5903_v2 = vadd.f32 %v5902_v28, %v5901_v26 }
 0xdce   :  { %v5904_v37 = vpop.f32.mrf.mxu1 }
 0xdcf   :  { %v3489_v13 = vadd.f32 %v5903_v2, %v3293_v61 }
 0xdd0   :  { %v5905_v35 = vpop.f32.mrf.mxu1 }
 0xdd1   :  { %v5906_v14 = vadd.f32 %v5905_v35, %v5904_v37 }
 0xdd2   :  { %v5907_v38 = vpop.f32.mrf.mxu1 }
 0xdd3   :  { %v3494_v3 = vadd.f32 %v5906_v14, %v3298_v23 }
 0xdd4   :  { %v5908_v39 = vpop.f32.mrf.mxu1 }
 0xdd5   :  { %v5909_v31 = vadd.f32 %v5908_v39, %v5907_v38 }
 0xdd6   :  { %v8271_v27 = vpop.f32.mrf.mxu1 }
 0xdd7   :  { %v3497_v41 = vadd.f32 %v5909_v31, %v3303_v33 }
 0xdd8   :  { %v8273_v40 = vpop.f32.mrf.mxu1 }
 0xdda   :  { %v8275_v20 = vpop.f32.mrf.mxu1 }
 0xddc   :  { %v8277_v45 = vpop.f32.mrf.mxu1 }
 0xe25   :  { %v5932_v29 = vpop.f32.mrf.mxu0 }
 0xe27   :  { %v5933_v0 = vpop.f32.mrf.mxu0 }
 0xe28   :  { %v5934_v44 = vadd.f32 %v5933_v0, %v5932_v29  ;;  %v5912_v29 = vadd.f32 %v8273_v40, %v8271_v27  ;;  %v3313_v27 = vpop.permute.xlu0 %3312 }
 0xe29   :  { %v5935_v46 = vpop.f32.mrf.mxu0 }
 0xe2a   :  { %v3543_v48 = vadd.f32 %v5934_v44, %v3478_v42  ;;  %v3308_v44 = vpop.permute.xlu1 %3307 }
 0xe2b   :  { %v5936_v49 = vpop.f32.mrf.mxu0  ;;  %v3607_v50 = vpop.f32.mrf.mxu1 }
 0xe2c   :  { %v5937_v36 = vadd.f32 %v5936_v49, %v5935_v46  ;;  %v3608_v55 = vadd.f32 %v3607_v50, %v3543_v48  ;;  %v3502_v48 = vadd.f32 %v5912_v29, %v3308_v44  ;;  %v5915_v49 = vadd.f32 %v8277_v45, %v8275_v20 }
 0xe2d   :  { %v5938_v52 = vpop.f32.mrf.mxu0  ;;  %v3609_v53 = vpop.f32.mrf.mxu1 }
 0xe2e   :  { %v3546_v56 = vadd.f32 %v5937_v36, %v3481_v51  ;;  %v3638_v10 = vmax.f32 %v3608_v55, 0.0 }
 0xe2f   :  { %v5939_v57 = vpop.f32.mrf.mxu0  ;;  %v3610_v58 = vpop.f32.mrf.mxu1 }
 0xe30   :  { %v5940_v6 = vadd.f32 %v5939_v57, %v5938_v52  ;;  %v3611_v7 = vadd.f32 %v3610_v58, %v3546_v56  ;;  %v3505_v56 = vadd.f32 %v5915_v49, %v3313_v27  ;;  %v3898_v49 = vld [vmem:[%s8817_s14 + $0x10] sm:$0xff]  ;;  %v3901_v27 = vld [vmem:[%s8817_s14 + $0x28] sm:$0xff] }
 0xe31   :  { %v5941_v9 = vpop.f32.mrf.mxu0  ;;  %v3612_v60 = vpop.f32.mrf.mxu1 }
 0xe32   :  { %v3639_v11 = vmax.f32 %v3611_v7, 0.0  ;;  %v3551_v12 = vadd.f32 %v5940_v6, %v3486_v59 }
 0xe33   :  { %v5942_v62 = vpop.f32.mrf.mxu0  ;;  %v3615_v63 = vpop.f32.mrf.mxu1 }
 0xe34   :  { %v3646_v19 = vpack.c.bf16 %v3639_v11, %v3638_v10  ;;  %v5943_v4 = vadd.f32 %v5942_v62, %v5941_v9  ;;  %v3616_v24 = vadd.f32 %v3615_v63, %v3551_v12 }
 0xe35   :  { %v5944_v21 = vpop.f32.mrf.mxu0  ;;  %v3617_v22 = vpop.f32.mrf.mxu1 }
 0xe36   :  { %6215 = vmatprep.mubr.msk.bf16.mxu0 %vm3651_vm2, %v3646_v19  ;;  %v3554_v25 = vadd.f32 %v5943_v4, %v3489_v13  ;;  %v3640_v34 = vmax.f32 %v3616_v24, 0.0  ;;  %v6565_v24 = vld [vmem:[%s8861_s18 + $0x4] ss:$24 sps:$4 sm:$0xff]  }
 0xe37   :  { %v5945_v16 = vpop.f32.mrf.mxu0  ;;  %v3618_v17 = vpop.f32.mrf.mxu1 }
 0xe38   :  { %v5946_v15 = vadd.f32 %v5945_v16, %v5944_v21  ;;  %v3619_v1 = vadd.f32 %v3618_v17, %v3554_v25 }
 0xe39   :  { %v5947_v18 = vpop.f32.mrf.mxu0  ;;  %v3620_v32 = vpop.f32.mrf.mxu1 }
 0xe3a   :  { %v3641_v26 = vmax.f32 %v3619_v1, 0.0  ;;  %v3559_v28 = vadd.f32 %v5946_v15, %v3494_v3 }
 0xe3b   :  { %v5948_v37 = vpop.f32.mrf.mxu0  ;;  %v3623_v35 = vpop.f32.mrf.mxu1 }
 0xe3c   :  { %v3647_v30 = vpack.c.bf16 %v3641_v26, %v3640_v34  ;;  %v5949_v0 = vadd.f32 %v5948_v37, %v5947_v18  ;;  %v3624_v38 = vadd.f32 %v3623_v35, %v3559_v28  ;;  %v6577_v35 = vld [vmem:[%s8861_s18 + $0xc] ss:$24 sps:$4 sm:$0xff]  }
 0xe3d   :  { %v5950_v42 = vpop.f32.mrf.mxu0  ;;  %v3625_v43 = vpop.f32.mrf.mxu1  ;;  %4169 = vmatprep.mubr.bf16.mxu1 %v6577_v35  ;;  %v4279_v35 = vld [vmem:[#allocation10] sm:$0x3] }
 0xe3e   :  { %6216 = vmatmul.mubr.msk.bf16.vlgmr.msra.gmra.mxu0 %vm3651_vm2, %v3647_v30  ;;  %v3562_v39 = vadd.f32 %v5949_v0, %v3497_v41  ;;  %v3642_v40 = vmax.f32 %v3624_v38, 0.0 }
 0xe3f   :  { %v5951_v46 = vpop.f32.mrf.mxu0  ;;  %v3626_v47 = vpop.f32.mrf.mxu1 }
 0xe40   :  { %v5952_v50 = vadd.f32 %v5951_v46, %v5950_v42  ;;  %v3627_v51 = vadd.f32 %v3626_v47, %v3562_v39  ;;  %v3896_v39 = vld [vmem:[%s8817_s14] sm:$0xff]  ;;  %v3897_v47 = vld [vmem:[%s8817_s14 + $0x8] sm:$0xff] }
 0xe41   :  { %v5953_v8 = vpop.f32.mrf.mxu0  ;;  %v3628_v36 = vpop.f32.mrf.mxu1 }
 0xe42   :  { %v3643_v52 = vmax.f32 %v3627_v51, 0.0  ;;  %v3567_v53 = vadd.f32 %v5952_v50, %v3502_v48  ;;  %v3899_v50 = vld [vmem:[%s8817_s14 + $0x18] sm:$0xff]  ;;  %v6568_v36 = vld [vmem:[%s8861_s18 + $0x34] ss:$24 sps:$4 sm:$0xff]  }
 0xe43   :  { %v5954_v54 = vpop.f32.mrf.mxu0  ;;  %v3631_v55 = vpop.f32.mrf.mxu1  ;;  %v6563_v51 = vld [vmem:[%s8861_s18] ss:$24 sps:$4 sm:$0xff]  }
 0xe44   :  { %v3648_v57 = vpack.c.bf16 %v3643_v52, %v3642_v40  ;;  %v5955_v58 = vadd.f32 %v5954_v54, %v5953_v8  ;;  %v3632_v2 = vadd.f32 %v3631_v55, %v3567_v53  ;;  %v3900_v8 = vld [vmem:[%s8817_s14 + $0x20] sm:$0xff]  ;;  %v3902_v40 = vld [vmem:[%s8817_s14 + $0x30] sm:$0xff]  ;;  %v3903_v52 = vld [vmem:[%s8817_s14 + $0x38] sm:$0xff] }
 0xe45   :  { %v3633_v59 = vpop.f32.mrf.mxu1  ;;  %v6566_v53 = vld [vmem:[%s8861_s18 + $0x30] ss:$24 sps:$4 sm:$0xff]   ;;  %v6571_v54 = vld [vmem:[%s8861_s18 + $0x64] ss:$24 sps:$4 sm:$0xff]   ;;  %v6569_v55 = vld [vmem:[%s8861_s18 + $0x60] ss:$24 sps:$4 sm:$0xff]  }
 0xe46   :  { %6219 = vmatprep.mubr.msk.bf16.mxu0 %vm3651_vm2, %v3648_v57  ;;  %v3570_v6 = vadd.f32 %v5955_v58, %v3505_v56  ;;  %v3644_v9 = vmax.f32 %v3632_v2, 0.0  ;;  %v6574_v56 = vld [vmem:[%s8861_s18 + $0x94] ss:$24 sps:$4 sm:$0xff]   ;;  %v6572_v57 = vld [vmem:[%s8861_s18 + $0x90] ss:$24 sps:$4 sm:$0xff]  }
 0xe47   :  { %v3634_v7 = vpop.f32.mrf.mxu1  ;;  %v6580_v58 = vld [vmem:[%s8861_s18 + $0x14] ss:$24 sps:$4 sm:$0xff]  }
 0xe48   :  { %v3635_v20 = vadd.f32 %v3634_v7, %v3570_v6 }
 0xe49   :  { %v3636_v45 = vpop.f32.mrf.mxu1 }
 0xe4a   :  { %v3645_v60 = vmax.f32 %v3635_v20, 0.0 }
 0xe4c   :  { %v3649_v61 = vpack.c.bf16 %v3645_v60, %v3644_v9 }
 0xe4e   :  { %6220 = vmatmul.mubr.msk.bf16.gmra.mxu0 %vm3651_vm2, %v3649_v61 }
 0xe4f   :  { %4104 = vmatprep.mubr.bf16.mxu0 %v6565_v24  ;;  %v6583_v24 = vld [vmem:[%s8861_s18 + $0x3c] ss:$24 sps:$4 sm:$0xff]  }
 0xefe   :  { %v6217_v10 = vpop.f32.mrf.mxu0 }
 0xf00   :  { %v3701_v11 = vpop.f32.mrf.mxu0 }
 0xf02   :  { %v6218_v12 = vpop.f32.mrf.mxu0 }
 0xf03   :  { %v8297_v22 = vpack.c.bf16 %v6218_v12, %v6217_v10 }
 0xf04   :  { %v3704_v62 = vpop.f32.mrf.mxu0 }
 0xf05   :  { %v8304_v23 = vpack.c.bf16 %v3704_v62, %v3701_v11 }
 0xf0e   :  { %v6221_v63 = vpop.f32.mrf.mxu0 }
 0xf10   :  { %v3717_v13 = vpop.f32.mrf.mxu0 }
 0xf12   :  { %v6222_v14 = vpop.f32.mrf.mxu0 }
 0xf13   :  { %v8287_v19 = vpack.c.bf16 %v6222_v14, %v6221_v63 }
 0xf14   :  { %v3720_v4 = vpop.f32.mrf.mxu0 }
 0xf15   :  { %v8289_v21 = vpack.c.bf16 %v3720_v4, %v3717_v13  ;;  %3830 = vrot.lane.b32.xlu1 %v8287_v19, %s6830_s22 }
 0xf17   :  { %3828 = vrot.lane.b32.xlu0 %v8289_v21, %s6830_s22 }
 0xf19   :  { %3808 = vrot.lane.b32.xlu1 %v8287_v19, %s6786_s23 }
 0xf1b   :  { %3806 = vrot.lane.b32.xlu0 %v8289_v21, %s6786_s23 }
 0xf1d   :  { %3826 = vrot.lane.b32.xlu1 %v8287_v19, %s8860_s16 }
 0xf1f   :  { %3752 = vrot.lane.b32.xlu0 %v8297_v22, %s6831_s0 }
 0xf21   :  { %3776 = vrot.lane.b32.xlu1 %v8297_v22, %s6832_s19 }
 0xf23   :  { %3824 = vrot.lane.b32.xlu0 %v8289_v21, %s8860_s16 }
 0xf25   :  { %3774 = vrot.lane.b32.xlu1 %v8304_v23, %s6832_s19 }
 0xf27   :  { %3750 = vrot.lane.b32.xlu0 %v8304_v23, %s6831_s0 }
 0xf29   :  { %3834 = vrot.lane.b32.xlu1 %v8287_v19, %s6833_s20 }
 0xf2b   :  { %3770 = vrot.lane.b32.xlu0 %v8297_v22, %s6795_s26 }
 0xf2d   :  { %3746 = vrot.lane.b32.xlu1 %v8297_v22, %s6786_s23 }
 0xf2f   :  { %3744 = vrot.lane.b32.xlu0 %v8304_v23, %s6786_s23 }
 0xf31   :  { %3768 = vrot.lane.b32.xlu1 %v8304_v23, %s6795_s26 }
 0xf33   :  { %3832 = vrot.lane.b32.xlu0 %v8289_v21, %s6833_s20 }
 0xf35   :  { %3820 = vrot.lane.b32.xlu1 %v8287_v19, %s6787_s27 }
 0xf37   :  { %3764 = vrot.lane.b32.xlu0 %v8297_v22, %s6834_s4 }
 0xf39   :  { %3740 = vrot.lane.b32.xlu1 %v8297_v22, %s6794_s3 }
 0xf3b   :  { %3818 = vrot.lane.b32.xlu0 %v8289_v21, %s6787_s27 }
 0xf3d   :  { %3762 = vrot.lane.b32.xlu1 %v8304_v23, %s6834_s4 }
 0xf3f   :  { %3738 = vrot.lane.b32.xlu0 %v8304_v23, %s6794_s3 }
 0xf41   :  { %3758 = vrot.lane.b32.xlu1 %v8297_v22, %s6787_s27 }
 0xf43   :  { %3756 = vrot.lane.b32.xlu0 %v8304_v23, %s6787_s27 }
 0xf87   :  { %v3831_v25 = vpop.permute.xlu1 %3830 }
 0xf88   :  { %3850 = vrot.lane.b32.xlu1 %v3831_v25, %s6834_s4 }
 0xf89   :  { %v3829_v16 = vpop.permute.xlu0 %3828 }
 0xf8a   :  { %3848 = vrot.lane.b32.xlu0 %v3829_v16, %s6834_s4 }
 0xf8b   :  { %v8344_v17 = vpop.permute.xlu1 %3808 }
 0xf8c   :  { %3846 = vrot.lane.b32.xlu1 %v8344_v17, %s6834_s4 }
 0xf8d   :  { %v8348_v3 = vpop.permute.xlu0 %3806 }
 0xf8e   :  { %3814 = vrot.lane.b32.xlu0 %v8287_v19, %s6831_s0 }
 0xf8f   :  { %v3827_v31 = vpop.permute.xlu1 %3826 }
 0xf90   :  { %3842 = vrot.lane.b32.xlu1 %v3827_v31, %s6834_s4  ;;  %v6581_v31 = vld [vmem:[%s8861_s18 + $0x38] ss:$24 sps:$4 sm:$0xff]  }
 0xf91   :  { %v3753_v15 = vpop.permute.xlu0 %3752 }
 0xf92   :  { %3844 = vrot.lane.b32.xlu0 %v8348_v3, %s6834_s4 }
 0xf93   :  { %v3777_v1 = vpop.permute.xlu1 %3776 }
 0xf94   :  { %3794 = vrot.lane.b32.xlu1 %v8297_v22, %s6792_s7  ;;  %5961 = vmatprep.subr.bf16.mxu0 %v3777_v1  ;;  %v6586_v1 = vld [vmem:[%s8861_s18 + $0x40] ss:$24 sps:$4 sm:$0xff]  }
 0xf95   :  { %5962 = vmatpush3.bf16.msra.mxu0 %v3753_v15  ;;  %v3825_v18 = vpop.permute.xlu0 %3824  ;;  %v6589_v15 = vld [vmem:[%s8861_s18 + $0x6c] ss:$24 sps:$4 sm:$0xff]  }
 0xf96   :  { %3792 = vrot.lane.b32.xlu0 %v8304_v23, %s6792_s7 }
 0xf97   :  { %v3775_v32 = vpop.permute.xlu1 %3774 }
 0xf98   :  { %3812 = vrot.lane.b32.xlu1 %v8289_v21, %s6831_s0  ;;  %5963 = vmatprep.subr.bf16.mxu0 %v3775_v32  ;;  %v6587_v32 = vld [vmem:[%s8861_s18 + $0x68] ss:$24 sps:$4 sm:$0xff]  }
 0xf99   :  { %v3751_v33 = vpop.permute.xlu0 %3750 }
 0xf9a   :  { %3840 = vrot.lane.b32.xlu0 %v3825_v18, %s6834_s4  ;;  %5964 = vmatpush3.bf16.msra.mxu0 %v3751_v33  ;;  %v6590_v18 = vld [vmem:[%s8861_s18 + $0x74] ss:$24 sps:$4 sm:$0xff]  }
 0xf9b   :  { %v3835_v34 = vpop.permute.xlu1 %3834  ;;  %v6595_v33 = vld [vmem:[%s8861_s18 + $0x9c] ss:$24 sps:$4 sm:$0xff]  }
 0xf9c   :  { %3838 = vrot.lane.b32.xlu1 %v8287_v19, %s6834_s4 }
 0xf9d   :  { %v3771_v26 = vpop.permute.xlu0 %3770 }
 0xf9e   :  { %3788 = vrot.lane.b32.xlu0 %v8297_v22, %s6828_s9  ;;  %5965 = vmatprep.subr.bf16.mxu0 %v3771_v26  ;;  %v6596_v26 = vld [vmem:[%s8861_s18 + $0xa4] ss:$24 sps:$4 sm:$0xff]  }
 0xf9f   :  { %v3747_v28 = vpop.permute.xlu1 %3746 }
 0xfa0   :  { %3836 = vrot.lane.b32.xlu1 %v8289_v21, %s6834_s4  ;;  %5966 = vmatpush3.bf16.msra.mxu0 %v3747_v28  ;;  %v6593_v28 = vld [vmem:[%s8861_s18 + $0x98] ss:$24 sps:$4 sm:$0xff]  }
 0xfa1   :  { %v3745_v37 = vpop.permute.xlu0 %3744 }
 0xfa2   :  { %3786 = vrot.lane.b32.xlu0 %v8304_v23, %s6828_s9 }
 0xfa3   :  { %v3769_v41 = vpop.permute.xlu1 %3768 }
 0xfa4   :  { %3858 = vrot.lane.b32.xlu1 %v3835_v34, %s6834_s4  ;;  %5967 = vmatprep.subr.bf16.mxu0 %v3769_v41  ;;  %v6592_v34 = vld [vmem:[%s8861_s18 + $0x70] ss:$24 sps:$4 sm:$0xff]   ;;  %v4295_v41 = vsel %vm4293_vm9, %v4279_v35, 0 }
 0xfa5   :  { %5968 = vmatpush3.bf16.msra.mxu0 %v3745_v37  ;;  %v3833_v29 = vpop.permute.xlu0 %3832  ;;  %v6598_v37 = vld [vmem:[%s8861_s18 + $0xa0] ss:$24 sps:$4 sm:$0xff]  }
 0xfa6   :  { %3802 = vrot.lane.b32.xlu0 %v8287_v19, %s6794_s3 }
 0xfa7   :  { %v3821_v30 = vpop.permute.xlu1 %3820 }
 0xfa8   :  { %6001 = vmatprep.subr.bf16.mxu1 %v3821_v30  ;;  %3782 = vrot.lane.b32.xlu1 %v8297_v22, %s6793_s30 }
 0xfa9   :  { %6002 = vmatpush3.bf16.msra.mxu1 %v8287_v19  ;;  %v3765_v0 = vpop.permute.xlu0 %3764 }
 0xfaa   :  { %3856 = vrot.lane.b32.xlu0 %v3833_v29, %s6834_s4  ;;  %5969 = vmatprep.subr.bf16.mxu0 %v3765_v0 }
 0xfab   :  { %v3741_v42 = vpop.permute.xlu1 %3740 }
 0xfac   :  { %3800 = vrot.lane.b32.xlu1 %v8289_v21, %s6794_s3  ;;  %5970 = vmatpush3.bf16.msra.mxu0 %v3741_v42 }
 0xfad   :  { %v3819_v43 = vpop.permute.xlu0 %3818 }
 0xfae   :  { %3780 = vrot.lane.b32.xlu0 %v8304_v23, %s6793_s30  ;;  %6003 = vmatprep.subr.bf16.mxu1 %v3819_v43 }
 0xfaf   :  { %v3763_v44 = vpop.permute.xlu1 %3762  ;;  %6004 = vmatpush3.bf16.msra.mxu1 %v8289_v21 }
 0xfb0   :  { %3854 = vrot.lane.b32.xlu1 %v3821_v30, %s6834_s4  ;;  %5971 = vmatprep.subr.bf16.mxu0 %v3763_v44 }
 0xfb1   :  { %v3739_v38 = vpop.permute.xlu0 %3738 }
 0xfb2   :  { %3852 = vrot.lane.b32.xlu0 %v3819_v43, %s6834_s4  ;;  %5972 = vmatpush3.bf16.msra.mxu0 %v3739_v38 }
 0xfb3   :  { %v3759_v46 = vpop.permute.xlu1 %3758 }
 0xfb4   :  { %3906 = vperm.xlu1 %6311, %v3896_v39   ;;  %5973 = vmatprep.subr.bf16.mxu0 %v3759_v46 }
 0xfb5   :  { %v3757_v48 = vpop.permute.xlu0 %3756 }
 0xfb6   :  { %3911 = vperm.xlu0 %6310, %v3897_v47   ;;  %5974 = vmatpush3.bf16.msra.mxu0 %v8297_v22 }
 0xfb7   :  { %5975 = vmatprep.subr.bf16.mxu0 %v3757_v48 }
 0xfb8   :  { %3916 = vperm.xlu1 %6311, %v3898_v49  }
 0xfba   :  { %3921 = vperm.xlu0 %6310, %v3899_v50   ;;  %5976 = vmatpush3.bf16.msra.mxu0 %v8304_v23  ;;  %v6575_v23 = vld [vmem:[%s8861_s18 + $0x8] ss:$24 sps:$4 sm:$0xff]  }
 0xfbb   :  { %4202 = vmatprep.subr.bf16.mxu0 %v6791_v5 }
 0xfbc   :  { %3926 = vperm.xlu1 %6311, %v3900_v8  }
 0xfbd   :  { %4105 = vmatmul.mubr.bf16.vlgmr.msra.gmra.mxu0 %v6563_v51 }
 0xfbe   :  { %3931 = vperm.xlu0 %6310, %v3901_v27   ;;  %4112 = vmatprep.mubr.bf16.mxu0 %v6568_v36 }
 0xfc0   :  { %3936 = vperm.xlu1 %6311, %v3902_v40  }
 0xfc2   :  { %3941 = vperm.xlu0 %6310, %v3903_v52  }
 0xfc5   :  { %4113 = vmatmul.mubr.bf16.gmra.mxu0 %v6566_v53 }
 0xfc6   :  { %4120 = vmatprep.mubr.bf16.mxu0 %v6571_v54 }
 0xfcd   :  { %4121 = vmatmul.mubr.bf16.gmra.mxu0 %v6569_v55 }
 0xfce   :  { %4128 = vmatprep.mubr.bf16.mxu0 %v6574_v56 }
 0xfd5   :  { %4129 = vmatmul.mubr.bf16.gmra.mxu0 %v6572_v57 }
 0xfd6   :  { %5548 = vmatprep.mubr.msk.bf16.mxu0 %vm1500_vm1, %v6580_v58 }
 0xffa   :  { %v3851_v59 = vpop.permute.xlu1 %3850 }
 0xffb   :  { %4203 = vmatpush1.bf16.msra.mxu0 %v3851_v59 }
 0xffc   :  { %v3849_v2 = vpop.permute.xlu0 %3848  ;;  %4204 = vmatprep.subr.bf16.mxu0 %v6791_v5 }
 0xffe   :  { %v3847_v6 = vpop.permute.xlu1 %3846 }
 0xfff   :  { %4205 = vmatpush1.bf16.msra.mxu0 %v3849_v2 }
0x1000   :  { %v3815_v7 = vpop.permute.xlu0 %3814  ;;  %4206 = vmatprep.subr.bf16.mxu0 %v6791_v5 }
0x1001   :  { %6005 = vmatprep.subr.bf16.mxu1 %v3815_v7 }
0x1002   :  { %v3843_v20 = vpop.permute.xlu1 %3842 }
0x1003   :  { %4207 = vmatpush1.bf16.msra.mxu0 %v3847_v6 }
0x1004   :  { %v3845_v45 = vpop.permute.xlu0 %3844  ;;  %4208 = vmatprep.subr.bf16.mxu0 %v6791_v5 }
0x1006   :  { %v3795_v9 = vpop.permute.xlu1 %3794 }
0x1007   :  { %6006 = vmatpush3.bf16.msra.mxu1 %v3795_v9  ;;  %4209 = vmatpush1.bf16.msra.mxu0 %v3845_v45 }
0x1008   :  { %v3793_v60 = vpop.permute.xlu0 %3792  ;;  %4210 = vmatprep.subr.bf16.mxu0 %v6791_v5 }
0x100a   :  { %v3813_v61 = vpop.permute.xlu1 %3812 }
0x100b   :  { %6007 = vmatprep.subr.bf16.mxu1 %v3813_v61  ;;  %4211 = vmatpush1.bf16.msra.mxu0 %v3843_v20 }
0x100c   :  { %6008 = vmatpush3.bf16.msra.mxu1 %v3793_v60  ;;  %v3841_v10 = vpop.permute.xlu0 %3840  ;;  %4212 = vmatprep.subr.bf16.mxu0 %v6791_v5 }
0x100d   :  { %6009 = vmatprep.subr.bf16.mxu1 %v8344_v17  ;;  %v6578_v17 = vld [vmem:[%s8861_s18 + $0x10] ss:$24 sps:$4 sm:$0xff]  }
0x100e   :  { %v3839_v11 = vpop.permute.xlu1 %3838 }
0x100f   :  { %4213 = vmatpush1.bf16.msra.mxu0 %v3841_v10 }
0x1010   :  { %v3789_v12 = vpop.permute.xlu0 %3788  ;;  %4214 = vmatprep.subr.bf16.mxu0 %v6791_v5 }
0x1011   :  { %6010 = vmatpush3.bf16.msra.mxu1 %v3789_v12 }
0x1012   :  { %v3837_v62 = vpop.permute.xlu1 %3836  ;;  %6011 = vmatprep.subr.bf16.mxu1 %v8348_v3  ;;  %v6584_v3 = vld [vmem:[%s8861_s18 + $0x44] ss:$24 sps:$4 sm:$0xff]   ;;  %s6835_s18 = smov 5  }
0x1013   :  { %4215 = vmatpush1.bf16.msra.mxu0 %v3839_v11 }
0x1014   :  { %v3787_v63 = vpop.permute.xlu0 %3786  ;;  %4216 = vmatprep.subr.bf16.mxu0 %v6791_v5 }
0x1015   :  { %6012 = vmatpush3.bf16.msra.mxu1 %v3787_v63 }
0x1016   :  { %v3859_v13 = vpop.permute.xlu1 %3858 }
0x1017   :  { %4217 = vmatpush1.bf16.msra.mxu0 %v3837_v62 }
0x1018   :  { %v3803_v14 = vpop.permute.xlu0 %3802  ;;  %4226 = vmatprep.subr.bf16.mxu0 %v6791_v5 }
0x1019   :  { %6013 = vmatprep.subr.bf16.mxu1 %v3803_v14 }
0x101a   :  { %v3783_v19 = vpop.permute.xlu1 %3782 }
0x101b   :  { %6014 = vmatpush3.bf16.msra.mxu1 %v3783_v19  ;;  %4227 = vmatpush2.bf16.msra.mxu0 %v3859_v13 }
0x101c   :  { %v3857_v4 = vpop.permute.xlu0 %3856  ;;  %4228 = vmatprep.subr.bf16.mxu0 %v6791_v5 }
0x101e   :  { %v3801_v21 = vpop.permute.xlu1 %3800 }
0x101f   :  { %6015 = vmatprep.subr.bf16.mxu1 %v3801_v21  ;;  %4229 = vmatpush2.bf16.msra.mxu0 %v3857_v4 }
0x1020   :  { %v3781_v22 = vpop.permute.xlu0 %3780  ;;  %4230 = vmatprep.subr.bf16.mxu0 %v6791_v5 }
0x1021   :  { %6016 = vmatpush3.bf16.msra.mxu1 %v3781_v22 }
0x1022   :  { %v3855_v25 = vpop.permute.xlu1 %3854  ;;  %6244 = vmatprep.subr.msk.bf16.mxu1 %vm4293_vm9, %v4279_v35 }
0x1023   :  { %4231 = vmatpush2.bf16.msra.mxu0 %v3855_v25 }
0x1024   :  { %4170 = vmatmul.mubr.bf16.vlgmr.msra.gmra.mxu1 %v6575_v23  ;;  %4232 = vmatprep.subr.bf16.mxu0 %v6791_v5  ;;  %v3853_v16 = vpop.permute.xlu0 %3852 }
0x1025   :  { %4177 = vmatprep.mubr.bf16.mxu1 %v6583_v24  ;;  %6224 = vmatpush3.bf16.msra.mxu1 %v4295_v41 }
0x1027   :  { %4233 = vmatpush2.bf16.msra.mxu0 %v3853_v16 }
0x102a   :  { %4235 = vmatmul.mubr.bf16.vlgmr.msra.gmra.mxu0 %v6578_v17 }
0x102b   :  { %5549 = vmatprep.mubr.msk.bf16.mxu0 %vm1500_vm1, %v6584_v3 }
0x102c   :  { %4178 = vmatmul.mubr.bf16.gmra.mxu1 %v6581_v31 }
0x102d   :  { %4185 = vmatprep.mubr.bf16.mxu1 %v6589_v15 }
0x102f   :  { %v3907_v40 = vpop.permute.xlu1 %3906 }
0x1031   :  { %v3912_v58 = vpop.permute.xlu0 %3911 }
0x1032   :  { %4243 = vmatmul.mubr.bf16.gmra.mxu0 %v6586_v1 }
0x1033   :  { %5550 = vmatprep.mubr.msk.bf16.mxu0 %vm1500_vm1, %v6590_v18  ;;  %v3917_v61 = vpop.permute.xlu1 %3916 }
0x1034   :  { %4186 = vmatmul.mubr.bf16.gmra.mxu1 %v6587_v32 }
0x1035   :  { %4193 = vmatprep.mubr.bf16.mxu1 %v6595_v33  ;;  %v3922_v22 = vpop.permute.xlu0 %3921 }
0x1037   :  { %v3927_v33 = vpop.permute.xlu1 %3926 }
0x103a   :  { %4251 = vmatmul.mubr.bf16.gmra.mxu0 %v6592_v34 }
0x103b   :  { %5551 = vmatprep.mubr.msk.bf16.mxu0 %vm1500_vm1, %v6596_v26 }
0x103c   :  { %4194 = vmatmul.mubr.bf16.gmra.mxu1 %v6593_v28 }
0x1042   :  { %4259 = vmatmul.mubr.bf16.gmra.mxu0 %v6598_v37 }
0x107d   :  { %v5977_v29 = vpop.f32.mrf.mxu0 }
0x107f   :  { %v5978_v30 = vpop.f32.mrf.mxu0 }
0x1080   :  { %v5979_v8 = vadd.f32 %v5978_v30, %v5977_v29 }
0x1081   :  { %v5980_v0 = vpop.f32.mrf.mxu0 }
0x1082   :  { %v4107_v53 = vadd.f32 %v5979_v8, %v3907_v40 }
0x1083   :  { %v5981_v42 = vpop.f32.mrf.mxu0 }
0x1084   :  { %v5982_v54 = vadd.f32 %v5981_v42, %v5980_v0 }
0x1085   :  { %v5983_v43 = vpop.f32.mrf.mxu0 }
0x1086   :  { %v4110_v7 = vadd.f32 %v5982_v54, %v3912_v58 }
0x1087   :  { %v5984_v44 = vpop.f32.mrf.mxu0 }
0x1088   :  { %v5985_v20 = vadd.f32 %v5984_v44, %v5983_v43  ;;  %v3932_v43 = vpop.permute.xlu0 %3931 }
0x1089   :  { %v5986_v38 = vpop.f32.mrf.mxu0 }
0x108a   :  { %v4115_v63 = vadd.f32 %v5985_v20, %v3917_v61 }
0x108b   :  { %v5987_v39 = vpop.f32.mrf.mxu0 }
0x108c   :  { %v5988_v13 = vadd.f32 %v5987_v39, %v5986_v38 }
0x108d   :  { %v5989_v46 = vpop.f32.mrf.mxu0 }
0x108e   :  { %v4118_v3 = vadd.f32 %v5988_v13, %v3922_v22 }
0x108f   :  { %v5990_v47 = vpop.f32.mrf.mxu0 }
0x1090   :  { %v5991_v31 = vadd.f32 %v5990_v47, %v5989_v46 }
0x1091   :  { %v5992_v48 = vpop.f32.mrf.mxu0 }
0x1092   :  { %v4123_v35 = vadd.f32 %v5991_v31, %v3927_v33 }
0x1093   :  { %v5993_v49 = vpop.f32.mrf.mxu0 }
0x1094   :  { %v5994_v41 = vadd.f32 %v5993_v49, %v5992_v48 }
0x1095   :  { %v8497_v50 = vpop.f32.mrf.mxu0 }
0x1096   :  { %v4126_v8 = vadd.f32 %v5994_v41, %v3932_v43 }
0x1097   :  { %v5996_v51 = vpop.f32.mrf.mxu0 }
0x1099   :  { %v8499_v36 = vpop.f32.mrf.mxu0 }
0x109b   :  { %v8501_v56 = vpop.f32.mrf.mxu0 }
0x10e4   :  { %v6017_v27 = vpop.f32.mrf.mxu1 }
0x10e6   :  { %v6018_v52 = vpop.f32.mrf.mxu1 }
0x10e7   :  { %v6019_v55 = vadd.f32 %v6018_v52, %v6017_v27  ;;  %v5997_v27 = vadd.f32 %v5996_v51, %v8497_v50  ;;  %v3942_v50 = vpop.permute.xlu0 %3941 }
0x10e8   :  { %v6020_v57 = vpop.f32.mrf.mxu1 }
0x10e9   :  { %v4172_v59 = vadd.f32 %v6019_v55, %v4107_v53  ;;  %v3937_v55 = vpop.permute.xlu1 %3936 }
0x10ea   :  { %v6021_v2 = vpop.f32.mrf.mxu1  ;;  %v4236_v6 = vpop.f32.mrf.mxu0 }
0x10eb   :  { %v6022_v45 = vadd.f32 %v6021_v2, %v6020_v57  ;;  %v4237_v10 = vadd.f32 %v4236_v6, %v4172_v59  ;;  %v4131_v59 = vadd.f32 %v5997_v27, %v3937_v55  ;;  %v6000_v2 = vadd.f32 %v8501_v56, %v8499_v36 }
0x10ec   :  { %v6023_v9 = vpop.f32.mrf.mxu1  ;;  %v4238_v60 = vpop.f32.mrf.mxu0 }
0x10ed   :  { %v4175_v11 = vadd.f32 %v6022_v45, %v4110_v7  ;;  %v4267_v23 = vmax.f32 %v4237_v10, 0.0 }
0x10ee   :  { %v6024_v12 = vpop.f32.mrf.mxu1  ;;  %v4239_v62 = vpop.f32.mrf.mxu0 }
0x10ef   :  { %v6025_v14 = vadd.f32 %v6024_v12, %v6023_v9  ;;  %v4240_v19 = vadd.f32 %v4239_v62, %v4175_v11  ;;  %v4134_v11 = vadd.f32 %v6000_v2, %v3942_v50  ;;  %v4528_v2 = vld [vmem:[%s8818_s15 + $0x10] sm:$0xff]  ;;  %v4531_v50 = vld [vmem:[%s8818_s15 + $0x28] sm:$0xff] }
0x10f0   :  { %v6026_v4 = vpop.f32.mrf.mxu1  ;;  %v4241_v21 = vpop.f32.mrf.mxu0 }
0x10f1   :  { %v4268_v24 = vmax.f32 %v4240_v19, 0.0  ;;  %v4180_v25 = vadd.f32 %v6025_v14, %v4115_v63 }
0x10f2   :  { %v6027_v16 = vpop.f32.mrf.mxu1  ;;  %v4244_v17 = vpop.f32.mrf.mxu0 }
0x10f3   :  { %v4275_v15 = vpack.c.bf16 %v4268_v24, %v4267_v23  ;;  %v6028_v1 = vadd.f32 %v6027_v16, %v6026_v4  ;;  %v4245_v34 = vadd.f32 %v4244_v17, %v4180_v25 }
0x10f4   :  { %v6029_v18 = vpop.f32.mrf.mxu1  ;;  %v4246_v32 = vpop.f32.mrf.mxu0 }
0x10f5   :  { %6225 = vmatprep.mubr.msk.bf16.mxu1 %vm670_vm6, %v4275_v15  ;;  %v4183_v26 = vadd.f32 %v6028_v1, %v4118_v3  ;;  %v4269_v44 = vmax.f32 %v4245_v34, 0.0  ;;  %v6601_v34 = vld [vmem:[#allocation6 + $0x4] ss:$24 sps:$4 sm:$0xff]  }
0x10f6   :  { %v6030_v28 = vpop.f32.mrf.mxu1  ;;  %v4247_v37 = vpop.f32.mrf.mxu0 }
0x10f7   :  { %v6031_v29 = vadd.f32 %v6030_v28, %v6029_v18  ;;  %v4248_v30 = vadd.f32 %v4247_v37, %v4183_v26 }
0x10f8   :  { %v6032_v0 = vpop.f32.mrf.mxu1  ;;  %v4249_v42 = vpop.f32.mrf.mxu0 }
0x10f9   :  { %v4270_v38 = vmax.f32 %v4248_v30, 0.0  ;;  %v4188_v39 = vadd.f32 %v6031_v29, %v4123_v35 }
0x10fa   :  { %v6033_v46 = vpop.f32.mrf.mxu1  ;;  %v4252_v47 = vpop.f32.mrf.mxu0 }
0x10fb   :  { %v4276_v40 = vpack.c.bf16 %v4270_v38, %v4269_v44  ;;  %v6034_v52 = vadd.f32 %v6033_v46, %v6032_v0  ;;  %v4253_v57 = vadd.f32 %v4252_v47, %v4188_v39  ;;  %v6613_v47 = vld [vmem:[#allocation6 + $0xc] ss:$24 sps:$4 sm:$0xff]  }
0x10fc   :  { %v6035_v53 = vpop.f32.mrf.mxu1  ;;  %v4254_v54 = vpop.f32.mrf.mxu0  ;;  %4799 = vmatprep.mubr.bf16.mxu0 %v6613_v47  ;;  %v4909_v47 = vld [vmem:[%s8827_s24] sm:$0x1] }
0x10fd   :  { %6226 = vmatmul.mubr.msk.bf16.vlgmr.msra.gmra.mxu1 %vm670_vm6, %v4276_v40  ;;  %v4191_v48 = vadd.f32 %v6034_v52, %v4126_v8  ;;  %v4271_v51 = vmax.f32 %v4253_v57, 0.0 }
0x10fe   :  { %v6036_v49 = vpop.f32.mrf.mxu1  ;;  %v4255_v58 = vpop.f32.mrf.mxu0 }
0x10ff   :  { %v6037_v6 = vadd.f32 %v6036_v49, %v6035_v53  ;;  %v4256_v7 = vadd.f32 %v4255_v58, %v4191_v48  ;;  %v4526_v48 = vld [vmem:[%s8818_s15] sm:$0xff]  ;;  %v4527_v58 = vld [vmem:[%s8818_s15 + $0x8] sm:$0xff] }
0x1100   :  { %v6038_v20 = vpop.f32.mrf.mxu1  ;;  %v4257_v45 = vpop.f32.mrf.mxu0 }
0x1101   :  { %v4272_v9 = vmax.f32 %v4256_v7, 0.0  ;;  %v4196_v60 = vadd.f32 %v6037_v6, %v4131_v59  ;;  %v4529_v6 = vld [vmem:[%s8818_s15 + $0x18] sm:$0xff]  ;;  %v6604_v45 = vld [vmem:[#allocation6 + $0x34] ss:$24 sps:$4 sm:$0xff]  }
0x1102   :  { %v6039_v61 = vpop.f32.mrf.mxu1  ;;  %v4260_v10 = vpop.f32.mrf.mxu0  ;;  %v6599_v7 = vld [vmem:[#allocation6] ss:$24 sps:$4 sm:$0xff]  }
0x1103   :  { %v4277_v12 = vpack.c.bf16 %v4272_v9, %v4271_v51  ;;  %v6040_v62 = vadd.f32 %v6039_v61, %v6038_v20  ;;  %v4261_v13 = vadd.f32 %v4260_v10, %v4196_v60  ;;  %v4530_v20 = vld [vmem:[%s8818_s15 + $0x20] sm:$0xff]  ;;  %v4532_v51 = vld [vmem:[%s8818_s15 + $0x30] sm:$0xff]  ;;  %v4533_v9 = vld [vmem:[%s8818_s15 + $0x38] sm:$0xff] }
0x1104   :  { %v4262_v63 = vpop.f32.mrf.mxu0  ;;  %v6602_v60 = vld [vmem:[#allocation6 + $0x30] ss:$24 sps:$4 sm:$0xff]   ;;  %v6607_v61 = vld [vmem:[#allocation6 + $0x64] ss:$24 sps:$4 sm:$0xff]   ;;  %v6605_v10 = vld [vmem:[#allocation6 + $0x60] ss:$24 sps:$4 sm:$0xff]  }
0x1105   :  { %6229 = vmatprep.mubr.msk.bf16.mxu1 %vm670_vm6, %v4277_v12  ;;  %v4199_v14 = vadd.f32 %v6040_v62, %v4134_v11  ;;  %v4273_v4 = vmax.f32 %v4261_v13, 0.0  ;;  %v6610_v11 = vld [vmem:[#allocation6 + $0x94] ss:$24 sps:$4 sm:$0xff]   ;;  %v6608_v12 = vld [vmem:[#allocation6 + $0x90] ss:$24 sps:$4 sm:$0xff]  }
0x1106   :  { %v4263_v19 = vpop.f32.mrf.mxu0  ;;  %v6616_v62 = vld [vmem:[#allocation6 + $0x14] ss:$24 sps:$4 sm:$0xff]  }
0x1107   :  { %v4264_v36 = vadd.f32 %v4263_v19, %v4199_v14 }
0x1108   :  { %v4265_v56 = vpop.f32.mrf.mxu0 }
0x1109   :  { %v4274_v21 = vmax.f32 %v4264_v36, 0.0 }
0x110b   :  { %v4278_v22 = vpack.c.bf16 %v4274_v21, %v4273_v4 }
0x110d   :  { %6230 = vmatmul.mubr.msk.bf16.gmra.mxu1 %vm670_vm6, %v4278_v22  ;;  %vm4923_vm6 = vcmask 1040384  }
0x110e   :  { %4734 = vmatprep.mubr.bf16.mxu1 %v6601_v34  ;;  %v6619_v34 = vld [vmem:[#allocation6 + $0x3c] ss:$24 sps:$4 sm:$0xff]  }
0x11bd   :  { %v6227_v23 = vpop.f32.mrf.mxu1 }
0x11bf   :  { %v4331_v24 = vpop.f32.mrf.mxu1 }
0x11c1   :  { %v6228_v25 = vpop.f32.mrf.mxu1 }
0x11c2   :  { %v8520_v32 = vpack.c.bf16 %v6228_v25, %v6227_v23 }
0x11c3   :  { %v4334_v16 = vpop.f32.mrf.mxu1 }
0x11c4   :  { %v8528_v33 = vpack.c.bf16 %v4334_v16, %v4331_v24 }
0x11cd   :  { %v6231_v17 = vpop.f32.mrf.mxu1 }
0x11cf   :  { %v4347_v3 = vpop.f32.mrf.mxu1 }
0x11d1   :  { %v6232_v31 = vpop.f32.mrf.mxu1 }
0x11d2   :  { %v8510_v15 = vpack.c.bf16 %v6232_v31, %v6231_v17 }
0x11d3   :  { %v4350_v1 = vpop.f32.mrf.mxu1 }
0x11d4   :  { %v8512_v18 = vpack.c.bf16 %v4350_v1, %v4347_v3  ;;  %4460 = vrot.lane.b32.xlu1 %v8510_v15, %s6835_s18 }
0x11d6   :  { %4458 = vrot.lane.b32.xlu0 %v8512_v18, %s6835_s18 }
0x11d8   :  { %4438 = vrot.lane.b32.xlu1 %v8510_v15, %s6786_s23 }
0x11da   :  { %4436 = vrot.lane.b32.xlu0 %v8512_v18, %s6786_s23 }
0x11dc   :  { %4456 = vrot.lane.b32.xlu1 %v8510_v15, %s6833_s20 }
0x11de   :  { %4382 = vrot.lane.b32.xlu0 %v8520_v32, %s6796_s1 }
0x11e0   :  { %4406 = vrot.lane.b32.xlu1 %v8520_v32, %s6831_s0 }
0x11e2   :  { %4454 = vrot.lane.b32.xlu0 %v8512_v18, %s6833_s20 }
0x11e4   :  { %4404 = vrot.lane.b32.xlu1 %v8528_v33, %s6831_s0 }
0x11e6   :  { %4380 = vrot.lane.b32.xlu0 %v8528_v33, %s6796_s1 }
0x11e8   :  { %4464 = vrot.lane.b32.xlu1 %v8510_v15, %s6784_s28 }
0x11ea   :  { %4400 = vrot.lane.b32.xlu0 %v8520_v32, %s6795_s26 }
0x11ec   :  { %4376 = vrot.lane.b32.xlu1 %v8520_v32, %s6786_s23 }
0x11ee   :  { %4374 = vrot.lane.b32.xlu0 %v8528_v33, %s6786_s23 }
0x11f0   :  { %4398 = vrot.lane.b32.xlu1 %v8528_v33, %s6795_s26 }
0x11f2   :  { %4462 = vrot.lane.b32.xlu0 %v8512_v18, %s6784_s28 }
0x11f4   :  { %4450 = vrot.lane.b32.xlu1 %v8510_v15, %s6787_s27 }
0x11f6   :  { %4394 = vrot.lane.b32.xlu0 %v8520_v32, %s6794_s3 }
0x11f8   :  { %4370 = vrot.lane.b32.xlu1 %v8520_v32, %s6797_s8 }
0x11fa   :  { %4448 = vrot.lane.b32.xlu0 %v8512_v18, %s6787_s27 }
0x11fc   :  { %4392 = vrot.lane.b32.xlu1 %v8528_v33, %s6794_s3 }
0x11fe   :  { %4368 = vrot.lane.b32.xlu0 %v8528_v33, %s6797_s8 }
0x1200   :  { %4388 = vrot.lane.b32.xlu1 %v8520_v32, %s6787_s27 }
0x1202   :  { %4386 = vrot.lane.b32.xlu0 %v8528_v33, %s6787_s27 }
0x1246   :  { %v4461_v26 = vpop.permute.xlu1 %4460 }
0x1247   :  { %4480 = vrot.lane.b32.xlu1 %v4461_v26, %s6794_s3 }
0x1248   :  { %v4459_v28 = vpop.permute.xlu0 %4458 }
0x1249   :  { %4478 = vrot.lane.b32.xlu0 %v4459_v28, %s6794_s3 }
0x124a   :  { %v8566_v37 = vpop.permute.xlu1 %4438 }
0x124b   :  { %4476 = vrot.lane.b32.xlu1 %v8566_v37, %s6794_s3 }
0x124c   :  { %v8570_v35 = vpop.permute.xlu0 %4436 }
0x124d   :  { %4444 = vrot.lane.b32.xlu0 %v8510_v15, %s6796_s1 }
0x124e   :  { %v4457_v41 = vpop.permute.xlu1 %4456 }
0x124f   :  { %4472 = vrot.lane.b32.xlu1 %v4457_v41, %s6794_s3  ;;  %v6617_v41 = vld [vmem:[#allocation6 + $0x38] ss:$24 sps:$4 sm:$0xff]  }
0x1250   :  { %v4383_v29 = vpop.permute.xlu0 %4382 }
0x1251   :  { %4474 = vrot.lane.b32.xlu0 %v8570_v35, %s6794_s3 }
0x1252   :  { %v4407_v30 = vpop.permute.xlu1 %4406 }
0x1253   :  { %4424 = vrot.lane.b32.xlu1 %v8520_v32, %s6792_s7  ;;  %6046 = vmatprep.subr.bf16.mxu1 %v4407_v30  ;;  %v6622_v30 = vld [vmem:[#allocation6 + $0x40] ss:$24 sps:$4 sm:$0xff]  }
0x1254   :  { %6047 = vmatpush3.bf16.msra.mxu1 %v4383_v29  ;;  %v4455_v0 = vpop.permute.xlu0 %4454  ;;  %v6625_v29 = vld [vmem:[#allocation6 + $0x6c] ss:$24 sps:$4 sm:$0xff]  }
0x1255   :  { %4422 = vrot.lane.b32.xlu0 %v8528_v33, %s6792_s7 }
0x1256   :  { %v4405_v42 = vpop.permute.xlu1 %4404 }
0x1257   :  { %4442 = vrot.lane.b32.xlu1 %v8512_v18, %s6796_s1  ;;  %6048 = vmatprep.subr.bf16.mxu1 %v4405_v42  ;;  %v6623_v42 = vld [vmem:[#allocation6 + $0x68] ss:$24 sps:$4 sm:$0xff]  }
0x1258   :  { %v4381_v43 = vpop.permute.xlu0 %4380 }
0x1259   :  { %4470 = vrot.lane.b32.xlu0 %v4455_v0, %s6794_s3  ;;  %6049 = vmatpush3.bf16.msra.mxu1 %v4381_v43  ;;  %v6626_v0 = vld [vmem:[#allocation6 + $0x74] ss:$24 sps:$4 sm:$0xff]  }
0x125a   :  { %v4465_v44 = vpop.permute.xlu1 %4464  ;;  %v6631_v43 = vld [vmem:[#allocation6 + $0x9c] ss:$24 sps:$4 sm:$0xff]  }
0x125b   :  { %4468 = vrot.lane.b32.xlu1 %v8510_v15, %s6794_s3 }
0x125c   :  { %v4401_v38 = vpop.permute.xlu0 %4400 }
0x125d   :  { %4418 = vrot.lane.b32.xlu0 %v8520_v32, %s6834_s4  ;;  %6050 = vmatprep.subr.bf16.mxu1 %v4401_v38  ;;  %v6632_v38 = vld [vmem:[#allocation6 + $0xa4] ss:$24 sps:$4 sm:$0xff]  }
0x125e   :  { %v4377_v39 = vpop.permute.xlu1 %4376 }
0x125f   :  { %4466 = vrot.lane.b32.xlu1 %v8512_v18, %s6794_s3  ;;  %6051 = vmatpush3.bf16.msra.mxu1 %v4377_v39  ;;  %v6629_v39 = vld [vmem:[#allocation6 + $0x98] ss:$24 sps:$4 sm:$0xff]  }
0x1260   :  { %v4375_v46 = vpop.permute.xlu0 %4374 }
0x1261   :  { %4416 = vrot.lane.b32.xlu0 %v8528_v33, %s6834_s4 }
0x1262   :  { %v4399_v8 = vpop.permute.xlu1 %4398 }
0x1263   :  { %4488 = vrot.lane.b32.xlu1 %v4465_v44, %s6794_s3  ;;  %6052 = vmatprep.subr.bf16.mxu1 %v4399_v8  ;;  %v6628_v44 = vld [vmem:[#allocation6 + $0x70] ss:$24 sps:$4 sm:$0xff]   ;;  %v4925_v8 = vsel %vm4923_vm6, %v4909_v47, 0 }
0x1264   :  { %6053 = vmatpush3.bf16.msra.mxu1 %v4375_v46  ;;  %v4463_v27 = vpop.permute.xlu0 %4462  ;;  %v6634_v46 = vld [vmem:[#allocation6 + $0xa0] ss:$24 sps:$4 sm:$0xff]  }
0x1265   :  { %4432 = vrot.lane.b32.xlu0 %v8510_v15, %s6797_s8 }
0x1266   :  { %v4451_v40 = vpop.permute.xlu1 %4450 }
0x1267   :  { %6086 = vmatprep.subr.bf16.mxu0 %v4451_v40  ;;  %4412 = vrot.lane.b32.xlu1 %v8520_v32, %s6793_s30 }
0x1268   :  { %6087 = vmatpush3.bf16.msra.mxu0 %v8510_v15  ;;  %v4395_v52 = vpop.permute.xlu0 %4394 }
0x1269   :  { %4486 = vrot.lane.b32.xlu0 %v4463_v27, %s6794_s3  ;;  %6054 = vmatprep.subr.bf16.mxu1 %v4395_v52 }
0x126a   :  { %v4371_v53 = vpop.permute.xlu1 %4370 }
0x126b   :  { %4430 = vrot.lane.b32.xlu1 %v8512_v18, %s6797_s8  ;;  %6055 = vmatpush3.bf16.msra.mxu1 %v4371_v53 }
0x126c   :  { %v4449_v54 = vpop.permute.xlu0 %4448 }
0x126d   :  { %4410 = vrot.lane.b32.xlu0 %v8528_v33, %s6793_s30  ;;  %6088 = vmatprep.subr.bf16.mxu0 %v4449_v54 }
0x126e   :  { %v4393_v55 = vpop.permute.xlu1 %4392  ;;  %6089 = vmatpush3.bf16.msra.mxu0 %v8512_v18 }
0x126f   :  { %4484 = vrot.lane.b32.xlu1 %v4451_v40, %s6794_s3  ;;  %6056 = vmatprep.subr.bf16.mxu1 %v4393_v55 }
0x1270   :  { %v4369_v57 = vpop.permute.xlu0 %4368 }
0x1271   :  { %4482 = vrot.lane.b32.xlu0 %v4449_v54, %s6794_s3  ;;  %6057 = vmatpush3.bf16.msra.mxu1 %v4369_v57 }
0x1272   :  { %v4389_v49 = vpop.permute.xlu1 %4388 }
0x1273   :  { %4536 = vperm.xlu1 %6311, %v4526_v48   ;;  %6058 = vmatprep.subr.bf16.mxu1 %v4389_v49 }
0x1274   :  { %v4387_v59 = vpop.permute.xlu0 %4386 }
0x1275   :  { %4541 = vperm.xlu0 %6310, %v4527_v58   ;;  %6059 = vmatpush3.bf16.msra.mxu1 %v8520_v32 }
0x1276   :  { %6060 = vmatprep.subr.bf16.mxu1 %v4387_v59 }
0x1277   :  { %4546 = vperm.xlu1 %6311, %v4528_v2  }
0x1279   :  { %4551 = vperm.xlu0 %6310, %v4529_v6   ;;  %6061 = vmatpush3.bf16.msra.mxu1 %v8528_v33  ;;  %v6611_v33 = vld [vmem:[#allocation6 + $0x8] ss:$24 sps:$4 sm:$0xff]  }
0x127a   :  { %4832 = vmatprep.subr.bf16.mxu1 %v6791_v5 }
0x127b   :  { %4556 = vperm.xlu1 %6311, %v4530_v20  }
0x127c   :  { %4735 = vmatmul.mubr.bf16.vlgmr.msra.gmra.mxu1 %v6599_v7 }
0x127d   :  { %4561 = vperm.xlu0 %6310, %v4531_v50   ;;  %4742 = vmatprep.mubr.bf16.mxu1 %v6604_v45 }
0x127f   :  { %4566 = vperm.xlu1 %6311, %v4532_v51  }
0x1281   :  { %4571 = vperm.xlu0 %6310, %v4533_v9  }
0x1284   :  { %4743 = vmatmul.mubr.bf16.gmra.mxu1 %v6602_v60 }
0x1285   :  { %4750 = vmatprep.mubr.bf16.mxu1 %v6607_v61 }
0x128c   :  { %4751 = vmatmul.mubr.bf16.gmra.mxu1 %v6605_v10 }
0x128d   :  { %4758 = vmatprep.mubr.bf16.mxu1 %v6610_v11 }
0x1294   :  { %4759 = vmatmul.mubr.bf16.gmra.mxu1 %v6608_v12 }
0x1295   :  { %5580 = vmatprep.mubr.msk.bf16.mxu1 %vm1500_vm1, %v6616_v62 }
0x12b9   :  { %v4481_v63 = vpop.permute.xlu1 %4480 }
0x12ba   :  { %4833 = vmatpush1.bf16.msra.mxu1 %v4481_v63 }
0x12bb   :  { %v4479_v13 = vpop.permute.xlu0 %4478  ;;  %4834 = vmatprep.subr.bf16.mxu1 %v6791_v5 }
0x12bd   :  { %v4477_v14 = vpop.permute.xlu1 %4476 }
0x12be   :  { %4835 = vmatpush1.bf16.msra.mxu1 %v4479_v13 }
0x12bf   :  { %v4445_v19 = vpop.permute.xlu0 %4444  ;;  %4836 = vmatprep.subr.bf16.mxu1 %v6791_v5 }
0x12c0   :  { %6090 = vmatprep.subr.bf16.mxu0 %v4445_v19 }
0x12c1   :  { %v4473_v36 = vpop.permute.xlu1 %4472 }
0x12c2   :  { %4837 = vmatpush1.bf16.msra.mxu1 %v4477_v14 }
0x12c3   :  { %v4475_v56 = vpop.permute.xlu0 %4474  ;;  %4838 = vmatprep.subr.bf16.mxu1 %v6791_v5 }
0x12c5   :  { %v4425_v4 = vpop.permute.xlu1 %4424 }
0x12c6   :  { %6091 = vmatpush3.bf16.msra.mxu0 %v4425_v4  ;;  %4839 = vmatpush1.bf16.msra.mxu1 %v4475_v56 }
0x12c7   :  { %v4423_v21 = vpop.permute.xlu0 %4422  ;;  %4840 = vmatprep.subr.bf16.mxu1 %v6791_v5 }
0x12c9   :  { %v4443_v22 = vpop.permute.xlu1 %4442 }
0x12ca   :  { %6092 = vmatprep.subr.bf16.mxu0 %v4443_v22  ;;  %4841 = vmatpush1.bf16.msra.mxu1 %v4473_v36 }
0x12cb   :  { %6093 = vmatpush3.bf16.msra.mxu0 %v4423_v21  ;;  %v4471_v23 = vpop.permute.xlu0 %4470  ;;  %4842 = vmatprep.subr.bf16.mxu1 %v6791_v5 }
0x12cc   :  { %6094 = vmatprep.subr.bf16.mxu0 %v8566_v37  ;;  %v6614_v37 = vld [vmem:[#allocation6 + $0x10] ss:$24 sps:$4 sm:$0xff]  }
0x12cd   :  { %v4469_v24 = vpop.permute.xlu1 %4468 }
0x12ce   :  { %4843 = vmatpush1.bf16.msra.mxu1 %v4471_v23 }
0x12cf   :  { %v4419_v25 = vpop.permute.xlu0 %4418  ;;  %4844 = vmatprep.subr.bf16.mxu1 %v6791_v5 }
0x12d0   :  { %6095 = vmatpush3.bf16.msra.mxu0 %v4419_v25 }
0x12d1   :  { %v4467_v16 = vpop.permute.xlu1 %4466  ;;  %6096 = vmatprep.subr.bf16.mxu0 %v8570_v35  ;;  %v6620_v35 = vld [vmem:[#allocation6 + $0x44] ss:$24 sps:$4 sm:$0xff]  }
0x12d2   :  { %4845 = vmatpush1.bf16.msra.mxu1 %v4469_v24 }
0x12d3   :  { %v4417_v17 = vpop.permute.xlu0 %4416  ;;  %4846 = vmatprep.subr.bf16.mxu1 %v6791_v5 }
0x12d4   :  { %6097 = vmatpush3.bf16.msra.mxu0 %v4417_v17 }
0x12d5   :  { %v4489_v3 = vpop.permute.xlu1 %4488 }
0x12d6   :  { %4847 = vmatpush1.bf16.msra.mxu1 %v4467_v16 }
0x12d7   :  { %v4433_v31 = vpop.permute.xlu0 %4432  ;;  %4856 = vmatprep.subr.bf16.mxu1 %v6791_v5 }
0x12d8   :  { %6098 = vmatprep.subr.bf16.mxu0 %v4433_v31 }
0x12d9   :  { %v4413_v15 = vpop.permute.xlu1 %4412 }
0x12da   :  { %6099 = vmatpush3.bf16.msra.mxu0 %v4413_v15  ;;  %4857 = vmatpush2.bf16.msra.mxu1 %v4489_v3 }
0x12db   :  { %v4487_v1 = vpop.permute.xlu0 %4486  ;;  %4858 = vmatprep.subr.bf16.mxu1 %v6791_v5 }
0x12dd   :  { %v4431_v18 = vpop.permute.xlu1 %4430 }
0x12de   :  { %6100 = vmatprep.subr.bf16.mxu0 %v4431_v18  ;;  %4859 = vmatpush2.bf16.msra.mxu1 %v4487_v1 }
0x12df   :  { %v4411_v32 = vpop.permute.xlu0 %4410  ;;  %4860 = vmatprep.subr.bf16.mxu1 %v6791_v5 }
0x12e0   :  { %6101 = vmatpush3.bf16.msra.mxu0 %v4411_v32 }
0x12e1   :  { %v4485_v26 = vpop.permute.xlu1 %4484  ;;  %6245 = vmatprep.subr.msk.bf16.mxu0 %vm4923_vm6, %v4909_v47 }
0x12e2   :  { %4861 = vmatpush2.bf16.msra.mxu1 %v4485_v26 }
0x12e3   :  { %4800 = vmatmul.mubr.bf16.vlgmr.msra.gmra.mxu0 %v6611_v33  ;;  %4862 = vmatprep.subr.bf16.mxu1 %v6791_v5  ;;  %v4483_v28 = vpop.permute.xlu0 %4482 }
0x12e4   :  { %4807 = vmatprep.mubr.bf16.mxu0 %v6619_v34  ;;  %6234 = vmatpush3.bf16.msra.mxu0 %v4925_v8 }
0x12e6   :  { %4863 = vmatpush2.bf16.msra.mxu1 %v4483_v28 }
0x12e9   :  { %4865 = vmatmul.mubr.bf16.vlgmr.msra.gmra.mxu1 %v6614_v37 }
0x12ea   :  { %5581 = vmatprep.mubr.msk.bf16.mxu1 %vm1500_vm1, %v6620_v35 }
0x12eb   :  { %4808 = vmatmul.mubr.bf16.gmra.mxu0 %v6617_v41 }
0x12ec   :  { %4815 = vmatprep.mubr.bf16.mxu0 %v6625_v29 }
0x12ee   :  { %v4537_v51 = vpop.permute.xlu1 %4536 }
0x12f0   :  { %v4542_v62 = vpop.permute.xlu0 %4541 }
0x12f1   :  { %4873 = vmatmul.mubr.bf16.gmra.mxu1 %v6622_v30 }
0x12f2   :  { %5582 = vmatprep.mubr.msk.bf16.mxu1 %vm1500_vm1, %v6626_v0  ;;  %v4547_v22 = vpop.permute.xlu1 %4546 }
0x12f3   :  { %4816 = vmatmul.mubr.bf16.gmra.mxu0 %v6623_v42 }
0x12f4   :  { %4823 = vmatprep.mubr.bf16.mxu0 %v6631_v43  ;;  %v4552_v32 = vpop.permute.xlu0 %4551 }
0x12f6   :  { %v4557_v43 = vpop.permute.xlu1 %4556 }
0x12f9   :  { %4881 = vmatmul.mubr.bf16.gmra.mxu1 %v6628_v44 }
0x12fa   :  { %5583 = vmatprep.mubr.msk.bf16.mxu1 %vm1500_vm1, %v6632_v38 }
0x12fb   :  { %4824 = vmatmul.mubr.bf16.gmra.mxu0 %v6629_v39 }
0x1301   :  { %4889 = vmatmul.mubr.bf16.gmra.mxu1 %v6634_v46 }
0x133c   :  { %v6062_v27 = vpop.f32.mrf.mxu1 }
0x133e   :  { %v6063_v40 = vpop.f32.mrf.mxu1 }
0x133f   :  { %v6064_v20 = vadd.f32 %v6063_v40, %v6062_v27 }
0x1340   :  { %v6065_v52 = vpop.f32.mrf.mxu1 }
0x1341   :  { %v4737_v60 = vadd.f32 %v6064_v20, %v4537_v51 }
0x1342   :  { %v6066_v53 = vpop.f32.mrf.mxu1 }
0x1343   :  { %v6067_v61 = vadd.f32 %v6066_v53, %v6065_v52 }
0x1344   :  { %v6068_v54 = vpop.f32.mrf.mxu1 }
0x1345   :  { %v4740_v19 = vadd.f32 %v6067_v61, %v4542_v62 }
0x1346   :  { %v6069_v55 = vpop.f32.mrf.mxu1 }
0x1347   :  { %v6070_v36 = vadd.f32 %v6069_v55, %v6068_v54  ;;  %v4562_v54 = vpop.permute.xlu0 %4561 }
0x1348   :  { %v6071_v57 = vpop.f32.mrf.mxu1 }
0x1349   :  { %v4745_v17 = vadd.f32 %v6070_v36, %v4547_v22 }
0x134a   :  { %v6072_v48 = vpop.f32.mrf.mxu1 }
0x134b   :  { %v6073_v3 = vadd.f32 %v6072_v48, %v6071_v57 }
0x134c   :  { %v6074_v49 = vpop.f32.mrf.mxu1 }
0x134d   :  { %v4748_v35 = vadd.f32 %v6073_v3, %v4552_v32 }
0x134e   :  { %v6075_v58 = vpop.f32.mrf.mxu1 }
0x134f   :  { %v6076_v41 = vadd.f32 %v6075_v58, %v6074_v49 }
0x1350   :  { %v6077_v59 = vpop.f32.mrf.mxu1 }
0x1351   :  { %v4753_v47 = vadd.f32 %v6076_v41, %v4557_v43 }
0x1352   :  { %v6078_v2 = vpop.f32.mrf.mxu1 }
0x1353   :  { %v6079_v8 = vadd.f32 %v6078_v2, %v6077_v59 }
0x1354   :  { %v8653_v6 = vpop.f32.mrf.mxu1 }
0x1355   :  { %v4756_v20 = vadd.f32 %v6079_v8, %v4562_v54 }
0x1356   :  { %v6081_v7 = vpop.f32.mrf.mxu1 }
0x1358   :  { %v8655_v45 = vpop.f32.mrf.mxu1 }
0x135a   :  { %v8657_v11 = vpop.f32.mrf.mxu1 }
0x13a3   :  { %v6102_v50 = vpop.f32.mrf.mxu0 }
0x13a5   :  { %v6103_v9 = vpop.f32.mrf.mxu0 }
0x13a6   :  { %v6104_v10 = vadd.f32 %v6103_v9, %v6102_v50  ;;  %v6082_v50 = vadd.f32 %v6081_v7, %v8653_v6  ;;  %v4572_v6 = vpop.permute.xlu0 %4571 }
0x13a7   :  { %v6105_v12 = vpop.f32.mrf.mxu0 }
0x13a8   :  { %v4802_v63 = vadd.f32 %v6104_v10, %v4737_v60  ;;  %v4567_v10 = vpop.permute.xlu1 %4566 }
0x13a9   :  { %v6106_v13 = vpop.f32.mrf.mxu0  ;;  %v4866_v14 = vpop.f32.mrf.mxu1 }
0x13aa   :  { %v6107_v56 = vadd.f32 %v6106_v13, %v6105_v12  ;;  %v4867_v23 = vadd.f32 %v4866_v14, %v4802_v63  ;;  %v4761_v63 = vadd.f32 %v6082_v50, %v4567_v10  ;;  %v6085_v13 = vadd.f32 %v8657_v11, %v8655_v45 }
0x13ab   :  { %v6108_v4 = vpop.f32.mrf.mxu0  ;;  %v4868_v21 = vpop.f32.mrf.mxu1 }
0x13ac   :  { %v4805_v24 = vadd.f32 %v6107_v56, %v4740_v19  ;;  %v4897_v33 = vmax.f32 %v4867_v23, 0.0 }
0x13ad   :  { %v6109_v25 = vpop.f32.mrf.mxu0  ;;  %v4869_v16 = vpop.f32.mrf.mxu1 }
0x13ae   :  { %v6110_v31 = vadd.f32 %v6109_v25, %v6108_v4  ;;  %v4870_v15 = vadd.f32 %v4869_v16, %v4805_v24  ;;  %v4764_v24 = vadd.f32 %v6085_v13, %v4572_v6  ;;  %v6635_v13 = vld [vmem:[#allocation7] ss:$24 sps:$4 sm:$0xff]  }
0x13af   :  { %v6111_v1 = vpop.f32.mrf.mxu0  ;;  %v4871_v18 = vpop.f32.mrf.mxu1 }
0x13b0   :  { %v4898_v34 = vmax.f32 %v4870_v15, 0.0  ;;  %v4810_v26 = vadd.f32 %v6110_v31, %v4745_v17 }
0x13b1   :  { %v6112_v28 = vpop.f32.mrf.mxu0  ;;  %v4874_v37 = vpop.f32.mrf.mxu1 }
0x13b2   :  { %v4905_v29 = vpack.c.bf16 %v4898_v34, %v4897_v33  ;;  %v6113_v30 = vadd.f32 %v6112_v28, %v6111_v1  ;;  %v4875_v44 = vadd.f32 %v4874_v37, %v4810_v26 }
0x13b3   :  { %v6114_v0 = vpop.f32.mrf.mxu0  ;;  %v4876_v42 = vpop.f32.mrf.mxu1 }
0x13b4   :  { %6235 = vmatprep.mubr.msk.bf16.mxu0 %vm692_vm0, %v4905_v29  ;;  %v4813_v38 = vadd.f32 %v6113_v30, %v4748_v35  ;;  %v4899_v55 = vmax.f32 %v4875_v44, 0.0  ;;  %v6637_v44 = vld [vmem:[#allocation7 + $0x4] ss:$24 sps:$4 sm:$0xff]  }
0x13b5   :  { %v6115_v39 = vpop.f32.mrf.mxu0  ;;  %v4877_v46 = vpop.f32.mrf.mxu1 }
0x13b6   :  { %v6116_v27 = vadd.f32 %v6115_v39, %v6114_v0  ;;  %v4878_v40 = vadd.f32 %v4877_v46, %v4813_v38 }
0x13b7   :  { %v6117_v52 = vpop.f32.mrf.mxu0  ;;  %v4879_v53 = vpop.f32.mrf.mxu1 }
0x13b8   :  { %v4900_v57 = vmax.f32 %v4878_v40, 0.0  ;;  %v4818_v48 = vadd.f32 %v6116_v27, %v4753_v47 }
0x13b9   :  { %v6118_v49 = vpop.f32.mrf.mxu0  ;;  %v4882_v58 = vpop.f32.mrf.mxu1 }
0x13ba   :  { %v4906_v51 = vpack.c.bf16 %v4900_v57, %v4899_v55  ;;  %v6119_v9 = vadd.f32 %v6118_v49, %v6117_v52  ;;  %v4883_v12 = vadd.f32 %v4882_v58, %v4818_v48  ;;  %v6640_v55 = vld [vmem:[#allocation7 + $0xc] ss:$24 sps:$4 sm:$0xff]  }
0x13bb   :  { %v6120_v60 = vpop.f32.mrf.mxu0  ;;  %v4884_v61 = vpop.f32.mrf.mxu1  ;;  %5243 = vmatprep.mubr.bf16.mxu1 %v6640_v55 }
0x13bc   :  { %6236 = vmatmul.mubr.msk.bf16.vlgmr.msra.gmra.mxu0 %vm692_vm0, %v4906_v51  ;;  %v4821_v59 = vadd.f32 %v6119_v9, %v4756_v20  ;;  %v4901_v7 = vmax.f32 %v4883_v12, 0.0 }
0x13bd   :  { %v6121_v2 = vpop.f32.mrf.mxu0  ;;  %v4885_v62 = vpop.f32.mrf.mxu1 }
0x13be   :  { %v6122_v14 = vadd.f32 %v6121_v2, %v6120_v60  ;;  %v4886_v19 = vadd.f32 %v4885_v62, %v4821_v59 }
0x13bf   :  { %v6123_v36 = vpop.f32.mrf.mxu0  ;;  %v4887_v56 = vpop.f32.mrf.mxu1 }
0x13c0   :  { %v4902_v4 = vmax.f32 %v4886_v19, 0.0  ;;  %v4826_v21 = vadd.f32 %v6122_v14, %v4761_v63  ;;  %v6643_v14 = vld [vmem:[#allocation7 + $0x14] ss:$24 sps:$4 sm:$0xff]  }
0x13c1   :  { %v6124_v22 = vpop.f32.mrf.mxu0  ;;  %v4890_v23 = vpop.f32.mrf.mxu1 }
0x13c2   :  { %v4907_v25 = vpack.c.bf16 %v4902_v4, %v4901_v7  ;;  %v6125_v16 = vadd.f32 %v6124_v22, %v6123_v36  ;;  %v4891_v3 = vadd.f32 %v4890_v23, %v4826_v21 }
0x13c3   :  { %v4892_v17 = vpop.f32.mrf.mxu1 }
0x13c4   :  { %6239 = vmatprep.mubr.msk.bf16.mxu0 %vm692_vm0, %v4907_v25  ;;  %v4829_v31 = vadd.f32 %v6125_v16, %v4764_v24  ;;  %v4903_v1 = vmax.f32 %v4891_v3, 0.0  ;;  %v6638_v3 = vld [vmem:[#allocation7 + $0x8] ss:$24 sps:$4 sm:$0xff]  }
0x13c5   :  { %v4893_v15 = vpop.f32.mrf.mxu1 }
0x13c6   :  { %v4894_v45 = vadd.f32 %v4893_v15, %v4829_v31 }
0x13c7   :  { %v4895_v11 = vpop.f32.mrf.mxu1 }
0x13c8   :  { %v4904_v18 = vmax.f32 %v4894_v45, 0.0  ;;  %v6641_v11 = vld [vmem:[#allocation7 + $0x10] ss:$24 sps:$4 sm:$0xff]  }
0x13ca   :  { %v4908_v32 = vpack.c.bf16 %v4904_v18, %v4903_v1 }
0x13cc   :  { %6240 = vmatmul.mubr.msk.bf16.gmra.mxu0 %vm692_vm0, %v4908_v32 }
0x13cd   :  { %5202 = vmatprep.mubr.bf16.mxu0 %v6637_v44 }
0x147c   :  { %v6237_v33 = vpop.f32.mrf.mxu0 }
0x147e   :  { %v4961_v34 = vpop.f32.mrf.mxu0 }
0x1480   :  { %v6238_v26 = vpop.f32.mrf.mxu0 }
0x1481   :  { %v8678_v42 = vpack.c.bf16 %v6238_v26, %v6237_v33 }
0x1482   :  { %v4964_v28 = vpop.f32.mrf.mxu0 }
0x1483   :  { %v8686_v43 = vpack.c.bf16 %v4964_v28, %v4961_v34 }
0x148c   :  { %v6241_v37 = vpop.f32.mrf.mxu0 }
0x148e   :  { %v4977_v35 = vpop.f32.mrf.mxu0 }
0x1490   :  { %v6242_v41 = vpop.f32.mrf.mxu0 }
0x1491   :  { %v8666_v29 = vpack.c.bf16 %v6242_v41, %v6241_v37 }
0x1492   :  { %v4980_v30 = vpop.f32.mrf.mxu0 }
0x1493   :  { %v8668_v0 = vpack.c.bf16 %v4980_v30, %v4977_v35  ;;  %5074 = vrot.lane.b32.xlu1 %v8666_v29, %s6795_s26 }
0x1495   :  { %5072 = vrot.lane.b32.xlu0 %v8668_v0, %s6795_s26 }
0x1497   :  { %5068 = vrot.lane.b32.xlu1 %v8666_v29, %s6787_s27 }
0x1499   :  { %5066 = vrot.lane.b32.xlu0 %v8668_v0, %s6787_s27 }
0x149b   :  { %5062 = vrot.lane.b32.xlu1 %v8666_v29, %s6786_s23 }
0x149d   :  { %5012 = vrot.lane.b32.xlu0 %v8678_v42, %s6795_s26 }
0x149f   :  { %5036 = vrot.lane.b32.xlu1 %v8678_v42, %s6797_s8 }
0x14a1   :  { %5060 = vrot.lane.b32.xlu0 %v8668_v0, %s6786_s23 }
0x14a3   :  { %5034 = vrot.lane.b32.xlu1 %v8686_v43, %s6797_s8 }
0x14a5   :  { %5010 = vrot.lane.b32.xlu0 %v8686_v43, %s6795_s26  ;;  %s8863_s26 = sld [smem:[#allocation27_spill]] }
0x14a7   :  { %5086 = vrot.lane.b32.xlu1 %v8666_v29, %s6792_s7 }
0x14a9   :  { %5030 = vrot.lane.b32.xlu0 %v8678_v42, %s6790_s2 }
0x14ab   :  { %5006 = vrot.lane.b32.xlu1 %v8678_v42, %s6787_s27 }
0x14ad   :  { %5004 = vrot.lane.b32.xlu0 %v8686_v43, %s6787_s27  ;;  %s8862_s27 = sld [smem:[#allocation26_spill]] }
0x14af   :  { %5028 = vrot.lane.b32.xlu1 %v8686_v43, %s6790_s2 }
0x14b1   :  { %5084 = vrot.lane.b32.xlu0 %v8668_v0, %s6792_s7 }
0x14b3   :  { %5080 = vrot.lane.b32.xlu1 %v8666_v29, %s6793_s30  ;;  %v5126_v61 = vld [vmem:[%s8862_s27] sm:$0xff]  ;;  %v5127_v59 = vld [vmem:[%s8862_s27 + $0x8] sm:$0xff] }
0x14b5   :  { %5024 = vrot.lane.b32.xlu0 %v8678_v42, %s6792_s7 }
0x14b7   :  { %5000 = vrot.lane.b32.xlu1 %v8678_v42, %s6786_s23 }
0x14b9   :  { %5078 = vrot.lane.b32.xlu0 %v8668_v0, %s6793_s30 }
0x14bb   :  { %5022 = vrot.lane.b32.xlu1 %v8686_v43, %s6792_s7 }
0x14bd   :  { %4998 = vrot.lane.b32.xlu0 %v8686_v43, %s6786_s23 }
0x14bf   :  { %5018 = vrot.lane.b32.xlu1 %v8678_v42, %s6793_s30 }
0x14c1   :  { %5016 = vrot.lane.b32.xlu0 %v8686_v43, %s6793_s30 }
0x1505   :  { %v5075_v38 = vpop.permute.xlu1 %5074 }
0x1506   :  { %5098 = vrot.lane.b32.xlu1 %v5075_v38, %s6792_s7 }
0x1507   :  { %v8723_v39 = vpop.permute.xlu0 %5072 }
0x1508   :  { %5096 = vrot.lane.b32.xlu0 %v8723_v39, %s6792_s7 }
0x1509   :  { %v8727_v46 = vpop.permute.xlu1 %5068 }
0x150a   :  { %5094 = vrot.lane.b32.xlu1 %v8727_v46, %s6792_s7 }
0x150b   :  { %v8731_v47 = vpop.permute.xlu0 %5066 }
0x150c   :  { %5092 = vrot.lane.b32.xlu0 %v8731_v47, %s6792_s7 }
0x150d   :  { %v8735_v8 = vpop.permute.xlu1 %5062 }
0x150e   :  { %5090 = vrot.lane.b32.xlu1 %v8735_v8, %s6792_s7 }
0x150f   :  { %v5013_v27 = vpop.permute.xlu0 %5012 }
0x1510   :  { %5054 = vrot.lane.b32.xlu0 %v8678_v42, %s6831_s0 }
0x1511   :  { %v5037_v40 = vpop.permute.xlu1 %5036 }
0x1512   :  { %6131 = vmatprep.subr.bf16.mxu0 %v5037_v40 }
0x1513   :  { %6132 = vmatpush3.bf16.msra.mxu0 %v5013_v27  ;;  %v8741_v52 = vpop.permute.xlu0 %5060 }
0x1514   :  { %5052 = vrot.lane.b32.xlu0 %v8686_v43, %s6831_s0  ;;  %5088 = vrot.lane.b32.xlu1 %v8741_v52, %s6792_s7 }
0x1515   :  { %v5035_v53 = vpop.permute.xlu1 %5034 }
0x1516   :  { %6133 = vmatprep.subr.bf16.mxu0 %v5035_v53 }
0x1517   :  { %v5011_v54 = vpop.permute.xlu0 %5010 }
0x1518   :  { %5046 = vrot.lane.b32.xlu0 %v8686_v43, %s6794_s3  ;;  %5048 = vrot.lane.b32.xlu1 %v8678_v42, %s6794_s3 }
0x1519   :  { %6134 = vmatpush3.bf16.msra.mxu0 %v5011_v54  ;;  %v8751_v57 = vpop.permute.xlu1 %5086 }
0x151b   :  { %v5031_v48 = vpop.permute.xlu0 %5030 }
0x151c   :  { %5042 = vrot.lane.b32.xlu0 %v8678_v42, %s6796_s1  ;;  %5106 = vrot.lane.b32.xlu1 %v8751_v57, %s6792_s7 }
0x151d   :  { %6135 = vmatprep.subr.bf16.mxu0 %v5031_v48  ;;  %v5007_v49 = vpop.permute.xlu1 %5006 }
0x151e   :  { %6136 = vmatpush3.bf16.msra.mxu0 %v5007_v49 }
0x151f   :  { %v5005_v58 = vpop.permute.xlu0 %5004 }
0x1520   :  { %5040 = vrot.lane.b32.xlu0 %v8686_v43, %s6796_s1 }
0x1521   :  { %v5029_v20 = vpop.permute.xlu1 %5028 }
0x1522   :  { %6137 = vmatprep.subr.bf16.mxu0 %v5029_v20 }
0x1523   :  { %6138 = vmatpush3.bf16.msra.mxu0 %v5005_v58  ;;  %v8759_v50 = vpop.permute.xlu0 %5084 }
0x1524   :  { %5104 = vrot.lane.b32.xlu1 %v8759_v50, %s6792_s7 }
0x1525   :  { %v5081_v51 = vpop.permute.xlu1 %5080 }
0x1526   :  { %6153 = vmatprep.subr.bf16.mxu1 %v5081_v51 }
0x1527   :  { %6154 = vmatpush3.bf16.msra.mxu1 %v8666_v29  ;;  %v5025_v9 = vpop.permute.xlu0 %5024 }
0x1528   :  { %5102 = vrot.lane.b32.xlu1 %v5081_v51, %s6792_s7  ;;  %6139 = vmatprep.subr.bf16.mxu0 %v5025_v9 }
0x1529   :  { %v5001_v60 = vpop.permute.xlu1 %5000 }
0x152a   :  { %6140 = vmatpush3.bf16.msra.mxu0 %v5001_v60 }
0x152b   :  { %v5079_v10 = vpop.permute.xlu0 %5078 }
0x152c   :  { %5130 = vperm.xlu1 %6311, %v5126_v61   ;;  %6155 = vmatprep.subr.bf16.mxu1 %v5079_v10 }
0x152d   :  { %5100 = vrot.lane.b32.xlu0 %v5079_v10, %s6792_s7  ;;  %v5023_v12 = vpop.permute.xlu1 %5022  ;;  %6156 = vmatpush3.bf16.msra.mxu1 %v8668_v0 }
0x152e   :  { %6141 = vmatprep.subr.bf16.mxu0 %v5023_v12  ;;  %6157 = vmatprep.subr.bf16.mxu1 %v5075_v38 }
0x152f   :  { %v4999_v2 = vpop.permute.xlu0 %4998 }
0x1530   :  { %6142 = vmatpush3.bf16.msra.mxu0 %v4999_v2 }
0x1531   :  { %5135 = vperm.xlu0 %6310, %v5127_v59   ;;  %v5019_v62 = vpop.permute.xlu1 %5018 }
0x1532   :  { %6143 = vmatprep.subr.bf16.mxu0 %v5019_v62 }
0x1533   :  { %v5017_v63 = vpop.permute.xlu0 %5016 }
0x1534   :  { %6144 = vmatpush3.bf16.msra.mxu0 %v8678_v42 }
0x1535   :  { %6145 = vmatprep.subr.bf16.mxu0 %v5017_v63 }
0x1538   :  { %6146 = vmatpush3.bf16.msra.mxu0 %v8686_v43 }
0x1539   :  { %5252 = vmatprep.subr.bf16.mxu0 %v6791_v5 }
0x153b   :  { %5203 = vmatmul.mubr.bf16.vlgmr.msra.gmra.mxu0 %v6635_v13 }
0x153c   :  { %5594 = vmatprep.mubr.msk.bf16.mxu0 %vm1500_vm1, %v6643_v14 }
0x1578   :  { %v5099_v19 = vpop.permute.xlu1 %5098 }
0x1579   :  { %5253 = vmatpush1.bf16.msra.mxu0 %v5099_v19 }
0x157a   :  { %v5097_v36 = vpop.permute.xlu0 %5096  ;;  %5254 = vmatprep.subr.bf16.mxu0 %v6791_v5 }
0x157c   :  { %v5095_v56 = vpop.permute.xlu1 %5094 }
0x157d   :  { %5255 = vmatpush1.bf16.msra.mxu0 %v5097_v36 }
0x157e   :  { %v5093_v6 = vpop.permute.xlu0 %5092  ;;  %5256 = vmatprep.subr.bf16.mxu0 %v6791_v5 }
0x1580   :  { %v5091_v7 = vpop.permute.xlu1 %5090 }
0x1581   :  { %5257 = vmatpush1.bf16.msra.mxu0 %v5095_v56 }
0x1582   :  { %v5055_v4 = vpop.permute.xlu0 %5054  ;;  %5258 = vmatprep.subr.bf16.mxu0 %v6791_v5 }
0x1583   :  { %6158 = vmatpush3.bf16.msra.mxu1 %v5055_v4 }
0x1584   :  { %6159 = vmatprep.subr.bf16.mxu1 %v8723_v39 }
0x1585   :  { %5259 = vmatpush1.bf16.msra.mxu0 %v5093_v6 }
0x1586   :  { %v5089_v21 = vpop.permute.xlu1 %5088  ;;  %v5053_v22 = vpop.permute.xlu0 %5052  ;;  %5260 = vmatprep.subr.bf16.mxu0 %v6791_v5 }
0x1587   :  { %6160 = vmatpush3.bf16.msra.mxu1 %v5053_v22 }
0x1588   :  { %6161 = vmatprep.subr.bf16.mxu1 %v8727_v46 }
0x1589   :  { %5261 = vmatpush1.bf16.msra.mxu0 %v5091_v7 }
0x158a   :  { %v5049_v23 = vpop.permute.xlu1 %5048  ;;  %v5047_v24 = vpop.permute.xlu0 %5046  ;;  %5262 = vmatprep.subr.bf16.mxu0 %v6791_v5 }
0x158b   :  { %6162 = vmatpush3.bf16.msra.mxu1 %v5049_v23 }
0x158c   :  { %6163 = vmatprep.subr.bf16.mxu1 %v8731_v47 }
0x158d   :  { %5263 = vmatpush1.bf16.msra.mxu0 %v5089_v21 }
0x158e   :  { %5264 = vmatprep.subr.bf16.mxu0 %v6791_v5  ;;  %v5043_v25 = vpop.permute.xlu0 %5042  ;;  %v5107_v16 = vpop.permute.xlu1 %5106 }
0x158f   :  { %6164 = vmatpush3.bf16.msra.mxu1 %v5047_v24 }
0x1590   :  { %6165 = vmatprep.subr.bf16.mxu1 %v8735_v8 }
0x1591   :  { %5265 = vmatpush1.bf16.msra.mxu0 %v8751_v57 }
0x1592   :  { %5266 = vmatprep.subr.bf16.mxu0 %v6791_v5  ;;  %v5041_v17 = vpop.permute.xlu0 %5040 }
0x1593   :  { %6166 = vmatpush3.bf16.msra.mxu1 %v5043_v25 }
0x1594   :  { %6167 = vmatprep.subr.bf16.mxu1 %v8741_v52 }
0x1595   :  { %5267 = vmatpush1.bf16.msra.mxu0 %v8759_v50 }
0x1596   :  { %5276 = vmatprep.subr.bf16.mxu0 %v6791_v5  ;;  %v5105_v31 = vpop.permute.xlu1 %5104 }
0x1597   :  { %6168 = vmatpush3.bf16.msra.mxu1 %v5041_v17 }
0x1599   :  { %5277 = vmatpush2.bf16.msra.mxu0 %v5107_v16 }
0x159a   :  { %5244 = vmatmul.mubr.bf16.vlgmr.msra.gmra.mxu1 %v6638_v3  ;;  %5278 = vmatprep.subr.bf16.mxu0 %v6791_v5  ;;  %v5103_v15 = vpop.permute.xlu1 %5102 }
0x159d   :  { %5279 = vmatpush2.bf16.msra.mxu0 %v5105_v31 }
0x159e   :  { %5280 = vmatprep.subr.bf16.mxu0 %v6791_v5 }
0x159f   :  { %v5101_v45 = vpop.permute.xlu0 %5100 }
0x15a1   :  { %5281 = vmatpush2.bf16.msra.mxu0 %v5103_v15 }
0x15a2   :  { %5282 = vmatprep.subr.bf16.mxu0 %v6791_v5 }
0x15a5   :  { %5283 = vmatpush2.bf16.msra.mxu0 %v5101_v45 }
0x15a7   :  { %v5131_v41 = vpop.permute.xlu1 %5130 }
0x15a8   :  { %5285 = vmatmul.mubr.bf16.vlgmr.msra.gmra.mxu0 %v6641_v11 }
0x15ac   :  { %v5136_v5 = vpop.permute.xlu0 %5135 }
0x15fb   :  { %v6147_v1 = vpop.f32.mrf.mxu0 }
0x15fd   :  { %v6148_v18 = vpop.f32.mrf.mxu0 }
0x15fe   :  { %v6149_v28 = vadd.f32 %v6148_v18, %v6147_v1 }
0x15ff   :  { %v6150_v34 = vpop.f32.mrf.mxu0 }
0x1600   :  { %v5205_v30 = vadd.f32 %v6149_v28, %v5131_v41 }
0x1601   :  { %v6151_v37 = vpop.f32.mrf.mxu0 }
0x1602   :  { %v6152_v0 = vadd.f32 %v6151_v37, %v6150_v34 }
0x1604   :  { %v5208_v38 = vadd.f32 %v6152_v0, %v5136_v5 }
0x165a   :  { %v6169_v32 = vpop.f32.mrf.mxu1 }
0x165c   :  { %v6170_v33 = vpop.f32.mrf.mxu1 }
0x165d   :  { %v6171_v35 = vadd.f32 %v6170_v33, %v6169_v32 }
0x165e   :  { %v6172_v26 = vpop.f32.mrf.mxu1 }
0x165f   :  { %v5246_v43 = vadd.f32 %v6171_v35, %v5205_v30 }
0x1660   :  { %v6173_v29 = vpop.f32.mrf.mxu1 }
0x1661   :  { %v6174_v42 = vadd.f32 %v6173_v29, %v6172_v26 }
0x1663   :  { %v5249_v47 = vadd.f32 %v6174_v42, %v5208_v38 }
0x1668   :  { %v5286_v44 = vpop.f32.mrf.mxu0 }
0x1669   :  { %v5287_v39 = vadd.f32 %v5286_v44, %v5246_v43 }
0x166a   :  { %v5288_v46 = vpop.f32.mrf.mxu0 }
0x166b   :  { %v5293_v8 = vsel %vm692_vm0, %v5287_v39, 0.0 }
0x166c   :  { %v5289_v27 = vpop.f32.mrf.mxu0  ;;  %5294 = vadd.xlane.f32.xlu1 %v5293_v8 }
0x166d   :  { %v5290_v40 = vadd.f32 %v5289_v27, %v5249_v47 }
0x166e   :  { %v5291_v52 = vpop.f32.mrf.mxu0 }
0x166f   :  { %v5296_v53 = vsel %vm692_vm0, %v5290_v40, 0.0 }
0x1670   :  { %5297 = vadd.xlane.f32.xlu0 %v5296_v53 }
0x16f5   :  { %v5295_v54 = vpop.xlane.xlu1 %5294 }
0x16f6   :  { %v5300_v55 = vmul.f32 0.5, %v5295_v54 }
0x16f8   :  { %5303 = vst.msk [vmem:[%s8863_s26] sm:$0xff] %vm5302_vm10, %v5300_v55 }
0x16f9   :  { %v5298_v57 = vpop.xlane.xlu0 %5297 }
0x16fa   :  { %v5301_v48 = vmul.f32 0.5, %v5298_v57 }
0x16fc   :  { %5304 = vst.msk [vmem:[%s8863_s26 + $0x8] sm:$0xff] %vm5302_vm10, %v5301_v48 }
0x16fd   :  { %5309 = vsyncpa [#allocation3], 1 }
0x16fe   :  { %5310 = vsyncpa [#allocation5], 1 }
0x16ff   :  { %5311 = vsyncpa [#allocation8], 1 }
0x1700   :  { %5312 = vsyncpa [#allocation11], 1 }

</bundles_post_ra>
